<compile_context>
chip_gen: v6e
topology: v6e:2x2x1
jax: 0.10.0
libtpu: 0.0.40
codegen_flags: <defaults>
</compile_context>

<pallas_src>
import functools
import math

import jax
import jax.numpy as jnp
from jax.experimental import pallas as pl
from jax.experimental.pallas import tpu as pltpu

BN_EPS = 1e-5


def _round_up(x, m):
    return (x + m - 1) // m * m


# ---------------------------------------------------------------------------
# host-side (XLA) layout helpers: im2col in channel-major layout
# ---------------------------------------------------------------------------
def im2col_cnhw(x, k=3, stride=1, pad=1):
    """x: (C, b, h, w) -> (C*k*k, b*oh*ow); row index = c*k*k + ki*k + kj."""
    C, b, h, w = x.shape
    xp = jnp.pad(x, ((0, 0), (0, 0), (pad, pad), (pad, pad)))
    oh = (h + 2 * pad - k) // stride + 1
    ow = (w + 2 * pad - k) // stride + 1
    cols = []
    for ki in range(k):
        for kj in range(k):
            sl = xp[:, :, ki:ki + stride * oh:stride, kj:kj + stride * ow:stride]
            cols.append(sl.reshape(C, b * oh * ow))
    X = jnp.stack(cols, axis=1).reshape(C * k * k, b * oh * ow)
    return X, oh, ow


def unfold_k3_cnhw(x):
    """x: (C, b, h, w) -> (9, C, b*h*w)  (k=3, stride=1, pad=1), kidx = ki*3+kj."""
    C, b, h, w = x.shape
    xp = jnp.pad(x, ((0, 0), (0, 0), (1, 1), (1, 1)))
    outs = []
    for ki in range(3):
        for kj in range(3):
            outs.append(xp[:, :, ki:ki + h, kj:kj + w].reshape(C, b * h * w))
    return jnp.stack(outs, axis=0)


# ---------------------------------------------------------------------------
# Pallas kernel 1: fused conv3x3 (im2col matmul) + BatchNorm + activation
#                  lane-dense output (cout, M), bf16 MXU operands, f32 accum
# ---------------------------------------------------------------------------
def _conv_bn_act_kernel(x_ref, w_ref, o_ref, *, act):
    y = jnp.dot(w_ref[...], x_ref[...], preferred_element_type=jnp.float32)
    mean = jnp.mean(y, axis=1, keepdims=True)              # BN over batch*spatial
    var = jnp.mean((y - mean) ** 2, axis=1, keepdims=True)
    y = (y - mean) * jax.lax.rsqrt(var + BN_EPS)           # gamma=1, beta=0
    if act == "relu":
        y = jnp.maximum(y, 0.0)
    o_ref[...] = y


def _conv_a_pose_kernel(x_ref, w_ref, p_ref, a_ref, *, n_pose):
    # fused conv_pose + conv_a (shared im2col X), per-channel BN, sigmoid on a
    y = jnp.dot(w_ref[...], x_ref[...], preferred_element_type=jnp.float32)
    mean = jnp.mean(y, axis=1, keepdims=True)
    var = jnp.mean((y - mean) ** 2, axis=1, keepdims=True)
    y = (y - mean) * jax.lax.rsqrt(var + BN_EPS)
    p_ref[...] = y[:n_pose]
    # sigmoid via EUP exp + approx reciprocal
    a_ref[...] = pl.reciprocal(1.0 + jnp.exp(-y[n_pose:]), approx=True)


def _conv_matmul_inputs(x_cm, w_flat, stride):
    X, oh, ow = im2col_cnhw(x_cm, 3, stride, 1)
    K, M = X.shape
    Kp = _round_up(K, 16)                                  # bf16 sublane tile
    Xp = jnp.zeros((Kp, M), jnp.bfloat16).at[:K].set(X.astype(jnp.bfloat16))
    Wp = jnp.zeros((w_flat.shape[0], Kp), jnp.bfloat16).at[:, :K].set(
        w_flat.astype(jnp.bfloat16))
    return Xp, Wp, oh, ow, M, Kp


def conv3x3_bn_act(x_cm, w, *, stride=1, act="none"):
    """x_cm: (Cin, b, H, W); w: (Cout, Cin, 3, 3) -> (Cout, b, oh, ow)."""
    cout = w.shape[0]
    b = x_cm.shape[1]
    Xp, Wp, oh, ow, M, Kp = _conv_matmul_inputs(x_cm, w.reshape(cout, -1), stride)
    out = pl.pallas_call(
        functools.partial(_conv_bn_act_kernel, act=act),
        out_shape=jax.ShapeDtypeStruct((cout, M), jnp.float32),
        grid=(1,),
        in_specs=[pl.BlockSpec((Kp, M), lambda i: (0, 0)),
                  pl.BlockSpec((cout, Kp), lambda i: (0, 0))],
        out_specs=pl.BlockSpec((cout, M), lambda i: (0, 0)),
        compiler_params=pltpu.CompilerParams(dimension_semantics=("arbitrary",)),
    )(Xp, Wp)
    return out.reshape(cout, b, oh, ow)


def conv_a_pose_bn(x_cm, w_a, w_pose):
    """Fused a = sigmoid(bn_a(conv_a(x))), pose = bn_pose(conv_pose(x)).
    Returns a: (A, b, h, w), pose: (A*C, b, h, w) in channel-major layout."""
    n_a, n_pose = w_a.shape[0], w_pose.shape[0]
    b = x_cm.shape[1]
    w_cat = jnp.concatenate([w_pose.reshape(n_pose, -1), w_a.reshape(n_a, -1)], 0)
    Xp, Wp, oh, ow, M, Kp = _conv_matmul_inputs(x_cm, w_cat, 1)
    cout = n_pose + n_a
    pose, a = pl.pallas_call(
        functools.partial(_conv_a_pose_kernel, n_pose=n_pose),
        out_shape=(jax.ShapeDtypeStruct((n_pose, M), jnp.float32),
                   jax.ShapeDtypeStruct((n_a, M), jnp.float32)),
        grid=(1,),
        in_specs=[pl.BlockSpec((Kp, M), lambda i: (0, 0)),
                  pl.BlockSpec((cout, Kp), lambda i: (0, 0))],
        out_specs=(pl.BlockSpec((n_pose, M), lambda i: (0, 0)),
                   pl.BlockSpec((n_a, M), lambda i: (0, 0))),
        compiler_params=pltpu.CompilerParams(dimension_semantics=("arbitrary",)),
    )(Xp, Wp)
    return a.reshape(n_a, b, oh, ow), pose.reshape(n_pose, b, oh, ow)


# ---------------------------------------------------------------------------
# Pallas kernel 2: SelfRouting2d (pose_out=True) + fused pose BatchNorm
# ---------------------------------------------------------------------------
def _sr_pose_kernel(pose_ref, a_ref, w2_ref, b2_ref, w1_ref, aout_ref, pout_ref,
                    *, B, C, kkA_pad):
    M = pose_ref.shape[-1]
    pose2 = pose_ref[...]                                           # (kkA_pad*C, M) bf16
    a = a_ref[...]                                                  # (kkA_pad, M) f32
    # routing logits: one block-diagonal MXU matmul for all kkA positions
    logit = jnp.dot(w2_ref[...], pose2,
                    preferred_element_type=jnp.float32) + b2_ref[...]
    logit = logit.reshape(B, kkA_pad, M)
    mx = jnp.max(logit, axis=0, keepdims=True)                      # softmax over B
    e = jnp.exp(logit - mx)
    r = e * pl.reciprocal(jnp.sum(e, axis=0, keepdims=True), approx=True)
    ar = a[None, :, :] * r                                          # (B, kkA_pad, M)
    ar_sum = jnp.sum(ar, axis=1)                                    # (B, M)
    a_sum = jnp.sum(a, axis=0, keepdims=True)                       # (1, M)
    aout_ref[...] = ar_sum * pl.reciprocal(a_sum, approx=True)
    coeff = ar * pl.reciprocal(ar_sum, approx=True)[:, None, :]     # (B, kkA_pad, M)
    # weighted pose, then one big (B*D, B*kkA_pad*C) @ (B*kkA_pad*C, M) matmul
    pose3 = pose2.astype(jnp.float32).reshape(kkA_pad, C, M)
    wp = (coeff[:, :, None, :] * pose3[None]).astype(jnp.bfloat16)
    wp = wp.reshape(B * kkA_pad * C, M)
    p = jnp.dot(w1_ref[...], wp, preferred_element_type=jnp.float32)  # (B*D, M)
    # fused following BatchNorm2d (training-mode batch stats, gamma=1, beta=0)
    mean = jnp.mean(p, axis=1, keepdims=True)
    var = jnp.mean((p - mean) ** 2, axis=1, keepdims=True)
    pout_ref[...] = (p - mean) * jax.lax.rsqrt(var + BN_EPS)


# ---------------------------------------------------------------------------
# Pallas kernel 3: SelfRouting2d, activation output only (pose_out=False)
# ---------------------------------------------------------------------------
def _sr_a_kernel(pose_ref, a_ref, w2_ref, b2_ref, aout_ref, *, B, kkA_pad):
    M = pose_ref.shape[-1]
    logit = jnp.dot(w2_ref[...], pose_ref[...],
                    preferred_element_type=jnp.float32) + b2_ref[...]
    logit = logit.reshape(B, kkA_pad, M)
    mx = jnp.max(logit, axis=0, keepdims=True)
    e = jnp.exp(logit - mx)
    r = e * pl.reciprocal(jnp.sum(e, axis=0, keepdims=True), approx=True)
    a = a_ref[...]
    ar = a[None, :, :] * r
    ar_sum = jnp.sum(ar, axis=1)
    a_sum = jnp.sum(a, axis=0, keepdims=True)
    aout_ref[...] = ar_sum * pl.reciprocal(a_sum, approx=True)


def self_routing2d(a_cm, pose_cm, W2, b2, W1=None, *, A, B, C, D):
    """SelfRouting2d forward (k=3, stride=1, pad=1, as hard-coded in the module).
    a_cm: (A, b, h, w); pose_cm: (A*C, b, h, w) in channel-major layout.
    Returns (a_out, pose_out_or_None) in the same layout."""
    _, bsz, h, w = a_cm.shape
    kkA = 9 * A
    kkA_pad = _round_up(kkA, 8)          # aligned sublane splits, zero-padded rows
    M = bsz * h * w

    # unfold with torch ordering: kkA index = kk*A + a, column m = b*(h*w) + pos
    pose_u = unfold_k3_cnhw(pose_cm).reshape(kkA * C, M)
    pose_u = jnp.zeros((kkA_pad * C, M), jnp.bfloat16).at[:kkA * C].set(
        pose_u.astype(jnp.bfloat16))
    a_u = jnp.zeros((kkA_pad, M), jnp.float32).at[:kkA].set(
        unfold_k3_cnhw(a_cm).reshape(kkA, M))

    # block-diagonal logit weights: W2blk[b*kkA_pad + k, k*C + c] = W2[k, b, c]
    eyeK = jnp.eye(kkA_pad, dtype=jnp.float32)[:kkA]                   # (kkA, kkA_pad)
    w2b = jnp.einsum("bkc,kj->bkjc", jnp.transpose(W2, (1, 0, 2)), eyeK)
    w2b = jnp.zeros((B, kkA_pad, kkA_pad, C), jnp.float32).at[:, :kkA].set(w2b)
    W2blk = w2b.reshape(B * kkA_pad, kkA_pad * C).astype(jnp.bfloat16)
    b2p = jnp.zeros((B, kkA_pad), jnp.float32).at[:, :kkA].set(b2.T)
    b2p = b2p.reshape(B * kkA_pad, 1)

    cp = pltpu.CompilerParams(dimension_semantics=("arbitrary",))
    if W1 is not None:
        # block-diag vote weights: W1blk[b*D+d, (b*kkA_pad + k)*C + c] = W1[k, b*D+d, c]
        w1r = jnp.transpose(W1.reshape(kkA, B, D, C), (1, 2, 0, 3))    # (B, D, kkA, C)
        w1pad = jnp.zeros((B, D, kkA_pad, C), jnp.float32).at[:, :, :kkA, :].set(w1r)
        W1blk = jnp.einsum("bdkc,be->bdekc", w1pad, jnp.eye(B, dtype=jnp.float32))
        W1blk = W1blk.reshape(B * D, B * kkA_pad * C).astype(jnp.bfloat16)

        a_out, p_out = pl.pallas_call(
            functools.partial(_sr_pose_kernel, B=B, C=C, kkA_pad=kkA_pad),
            out_shape=(jax.ShapeDtypeStruct((B, M), jnp.float32),
                       jax.ShapeDtypeStruct((B * D, M), jnp.float32)),
            grid=(1,),
            in_specs=[pl.BlockSpec((kkA_pad * C, M), lambda i: (0, 0)),
                      pl.BlockSpec((kkA_pad, M), lambda i: (0, 0)),
                      pl.BlockSpec((B * kkA_pad, kkA_pad * C), lambda i: (0, 0)),
                      pl.BlockSpec((B * kkA_pad, 1), lambda i: (0, 0)),
                      pl.BlockSpec((B * D, B * kkA_pad * C), lambda i: (0, 0))],
            out_specs=(pl.BlockSpec((B, M), lambda i: (0, 0)),
                       pl.BlockSpec((B * D, M), lambda i: (0, 0))),
            compiler_params=cp,
        )(pose_u, a_u, W2blk, b2p, W1blk)
        return a_out.reshape(B, bsz, h, w), p_out.reshape(B * D, bsz, h, w)

    a_out = pl.pallas_call(
        functools.partial(_sr_a_kernel, B=B, kkA_pad=kkA_pad),
        out_shape=jax.ShapeDtypeStruct((B, M), jnp.float32),
        grid=(1,),
        in_specs=[pl.BlockSpec((kkA_pad * C, M), lambda i: (0, 0)),
                  pl.BlockSpec((kkA_pad, M), lambda i: (0, 0)),
                  pl.BlockSpec((B * kkA_pad, kkA_pad * C), lambda i: (0, 0)),
                  pl.BlockSpec((B * kkA_pad, 1), lambda i: (0, 0))],
        out_specs=pl.BlockSpec((B, M), lambda i: (0, 0)),
        compiler_params=cp,
    )(pose_u, a_u, W2blk, b2p)
    return a_out.reshape(B, bsz, h, w), None


# ---------------------------------------------------------------------------
# ConvNet forward (mode == 'SR')
# ---------------------------------------------------------------------------
def convnet_forward(x, params, *, classes):
    # NCHW input -> channel-major (C, b, h, w) working layout (kept end-to-end)
    x_cm = jnp.transpose(x, (1, 0, 2, 3))
    out = conv3x3_bn_act(x_cm, params["conv1"], stride=1, act="relu")
    out = conv3x3_bn_act(out, params["conv2"], stride=2, act="relu")
    out = conv3x3_bn_act(out, params["conv3"], stride=1, act="relu")
    # a = sigmoid(bn_a(conv_a(out)));  pose = bn_pose(conv_pose(out))  -- one kernel
    a, pose = conv_a_pose_bn(out, params["conv_a"], params["conv_pose"])
    # capsule routing layers; pose BatchNorm (norm_layers) fused in the kernels
    a, pose = self_routing2d(a, pose, params["sr1_W2"], params["sr1_b2"],
                             params["sr1_W1"], A=4, B=2, C=16, D=16)
    a, pose = self_routing2d(a, pose, params["sr2_W2"], params["sr2_b2"],
                             params["sr2_W1"], A=2, B=2, C=16, D=16)
    # fc = SelfRouting2d(2, classes, 16, 1, pose_out=False)
    a, _ = self_routing2d(a, pose, params["fc_W2"], params["fc_b2"], None,
                          A=2, B=classes, C=16, D=1)
    # a: (classes, b, h, w) -> (b, classes*h*w), matching torch's a.view(b, -1)
    cls, bsz, h, w = a.shape
    out = jnp.transpose(a.reshape(cls, bsz, h * w), (1, 0, 2)).reshape(bsz, cls * h * w)
    return jnp.log(out)


def kaiming_uniform(key, shape, fan_in):
    bound = math.sqrt(6.0 / fan_in)
    return jax.random.uniform(key, shape, jnp.float32, -bound, bound)


if __name__ == "__main__":
    batch, channels, H, W = 2, 3, 16, 16
    planes, num_caps, caps_size, classes = 8, 4, 16, 10

    ks = jax.random.split(jax.random.PRNGKey(0), 16)
    params = {
        "conv1": kaiming_uniform(ks[0], (planes, channels, 3, 3), channels * 9),
        "conv2": kaiming_uniform(ks[1], (2 * planes, planes, 3, 3), planes * 9),
        "conv3": kaiming_uniform(ks[2], (4 * planes, 2 * planes, 3, 3), 2 * planes * 9),
        "conv_a": kaiming_uniform(ks[3], (num_caps, 4 * planes, 3, 3), 4 * planes * 9),
        "conv_pose": kaiming_uniform(ks[4], (num_caps * caps_size, 4 * planes, 3, 3),
                                     4 * planes * 9),
        # SelfRouting2d(4, 2, 16, 16, pose_out=True): kkA = 36
        "sr1_W1": kaiming_uniform(ks[5], (36, 2 * 16, 16), 2 * 16 * 16),
        "sr1_W2": 0.1 * jax.random.normal(ks[6], (36, 2, 16), jnp.float32),
        "sr1_b2": 0.1 * jax.random.normal(ks[7], (36, 2), jnp.float32),
        # SelfRouting2d(2, 2, 16, 16, pose_out=True): kkA = 18
        "sr2_W1": kaiming_uniform(ks[8], (18, 2 * 16, 16), 2 * 16 * 16),
        "sr2_W2": 0.1 * jax.random.normal(ks[9], (18, 2, 16), jnp.float32),
        "sr2_b2": 0.1 * jax.random.normal(ks[10], (18, 2), jnp.float32),
        # fc = SelfRouting2d(2, classes, 16, 1, pose_out=False): kkA = 18
        "fc_W2": 0.1 * jax.random.normal(ks[11], (18, classes, 16), jnp.float32),
        "fc_b2": 0.1 * jax.random.normal(ks[12], (18, classes), jnp.float32),
    }

    x = jax.random.normal(ks[13], (batch, channels, H, W), jnp.float32)
    fwd = jax.jit(functools.partial(convnet_forward, classes=classes))
    out = jax.block_until_ready(fwd(x, params))

    assert out.shape == (batch, classes * (H // 2) * (W // 2)), out.shape
    assert bool(jnp.all(jnp.isfinite(out)))
    print("KERNEL_OK")
</pallas_src>

<mosaic_0001>
module attributes {stable_mosaic.version = 11 : i64} {
  func.func @_conv_bn_act_kernel(%arg0: i32, %arg1: memref<32x512xbf16, #tpu.memory_space<vmem>>, %arg2: memref<8x32xbf16, #tpu.memory_space<vmem>>, %arg3: memref<8x512xf32, #tpu.memory_space<vmem>>) attributes {dimension_semantics = [#tpu.dimension_semantics<arbitrary>], iteration_bounds = array<i64: 1>, scalar_prefetch = 0 : i64, scratch_operands = 0 : i64, tpu.core_type = #tpu.core_type<tc>, window_params = [{pipeline_mode = #tpu.pipeline_mode<synchronous>, transform_indices = @transform_0, window_bounds = array<i64: 32, 512>}, {pipeline_mode = #tpu.pipeline_mode<synchronous>, transform_indices = @transform_1, window_bounds = array<i64: 8, 32>}, {pipeline_mode = #tpu.pipeline_mode<synchronous>, transform_indices = @transform_2, window_bounds = array<i64: 8, 512>}]} {
    %c0 = arith.constant 0 : index
    %c0_0 = arith.constant 0 : index
    %0 = vector.load %arg2[%c0, %c0_0] : memref<8x32xbf16, #tpu.memory_space<vmem>>, vector<8x32xbf16>
    %c0_1 = arith.constant 0 : index
    %c0_2 = arith.constant 0 : index
    %1 = vector.load %arg1[%c0_1, %c0_2] : memref<32x512xbf16, #tpu.memory_space<vmem>>, vector<32x512xbf16>
    %cst = arith.constant dense<0.000000e+00> : vector<8x512xf32>
    %2 = tpu.matmul %0, %1, %cst {dimension_numbers = #tpu.dot_dimension_numbers<[1], [0], [0], [1], [0, 0, 1, 1], [], []>} : vector<8x32xbf16>, vector<32x512xbf16>, vector<8x512xf32> -> vector<8x512xf32>
    %cst_3 = arith.constant dense<0.000000e+00> : vector<8xf32>
    %3 = vector.multi_reduction <add>, %2, %cst_3 [1] : vector<8x512xf32> to vector<8xf32>
    %4 = vector.shape_cast %3 : vector<8xf32> to vector<8x1xf32>
    %cst_4 = arith.constant 5.120000e+02 : f32
    %5 = vector.broadcast %cst_4 : f32 to vector<8x1xf32>
    %6 = arith.divf %4, %5 : vector<8x1xf32>
    %7 = vector.broadcast %6 : vector<8x1xf32> to vector<8x512xf32>
    %8 = arith.subf %2, %7 : vector<8x512xf32>
    %9 = arith.mulf %8, %8 : vector<8x512xf32>
    %cst_5 = arith.constant dense<0.000000e+00> : vector<8xf32>
    %10 = vector.multi_reduction <add>, %9, %cst_5 [1] : vector<8x512xf32> to vector<8xf32>
    %11 = vector.shape_cast %10 : vector<8xf32> to vector<8x1xf32>
    %cst_6 = arith.constant 5.120000e+02 : f32
    %12 = vector.broadcast %cst_6 : f32 to vector<8x1xf32>
    %13 = arith.divf %11, %12 : vector<8x1xf32>
    %14 = vector.broadcast %6 : vector<8x1xf32> to vector<8x512xf32>
    %15 = arith.subf %2, %14 : vector<8x512xf32>
    %cst_7 = arith.constant 9.99999974E-6 : f32
    %16 = vector.broadcast %cst_7 : f32 to vector<8x1xf32>
    %17 = arith.addf %13, %16 : vector<8x1xf32>
    %18 = math.rsqrt %17 : vector<8x1xf32>
    %19 = vector.broadcast %18 : vector<8x1xf32> to vector<8x512xf32>
    %20 = arith.mulf %15, %19 : vector<8x512xf32>
    %cst_8 = arith.constant 0.000000e+00 : f32
    %21 = vector.broadcast %cst_8 : f32 to vector<8x512xf32>
    %22 = arith.maximumf %20, %21 : vector<8x512xf32>
    %c0_9 = arith.constant 0 : index
    %c0_10 = arith.constant 0 : index
    %23 = vector.load %arg3[%c0_9, %c0_10] : memref<8x512xf32, #tpu.memory_space<vmem>>, vector<8x512xf32>
    tpu.vector_store %arg3[%c0_9, %c0_10], %22 {strides = array<i32>} : memref<8x512xf32, #tpu.memory_space<vmem>>, vector<8x512xf32>,
    return
  }
  func.func @transform_0(%arg0: i32) -> (i32, i32) {
    %c0_i32 = arith.constant 0 : i32
    %c0_i32_0 = arith.constant 0 : i32
    %c0_i32_1 = arith.constant 0 : i32
    return %c0_i32, %c0_i32_0 : i32, i32
  }
  func.func @transform_1(%arg0: i32) -> (i32, i32) {
    %c0_i32 = arith.constant 0 : i32
    %c0_i32_0 = arith.constant 0 : i32
    %c0_i32_1 = arith.constant 0 : i32
    return %c0_i32, %c0_i32_0 : i32, i32
  }
  func.func @transform_2(%arg0: i32) -> (i32, i32) {
    %c0_i32 = arith.constant 0 : i32
    %c0_i32_0 = arith.constant 0 : i32
    %c0_i32_1 = arith.constant 0 : i32
    return %c0_i32, %c0_i32_0 : i32, i32
  }
}

module attributes {stable_mosaic.version = 11 : i64} {
  func.func @_conv_bn_act_kernel(%arg0: i32, %arg1: memref<80x128xbf16, #tpu.memory_space<vmem>>, %arg2: memref<16x80xbf16, #tpu.memory_space<vmem>>, %arg3: memref<16x128xf32, #tpu.memory_space<vmem>>) attributes {dimension_semantics = [#tpu.dimension_semantics<arbitrary>], iteration_bounds = array<i64: 1>, scalar_prefetch = 0 : i64, scratch_operands = 0 : i64, tpu.core_type = #tpu.core_type<tc>, window_params = [{pipeline_mode = #tpu.pipeline_mode<synchronous>, transform_indices = @transform_0, window_bounds = array<i64: 80, 128>}, {pipeline_mode = #tpu.pipeline_mode<synchronous>, transform_indices = @transform_1, window_bounds = array<i64: 16, 80>}, {pipeline_mode = #tpu.pipeline_mode<synchronous>, transform_indices = @transform_2, window_bounds = array<i64: 16, 128>}]} {
    %c0 = arith.constant 0 : index
    %c0_0 = arith.constant 0 : index
    %0 = vector.load %arg2[%c0, %c0_0] : memref<16x80xbf16, #tpu.memory_space<vmem>>, vector<16x80xbf16>
    %c0_1 = arith.constant 0 : index
    %c0_2 = arith.constant 0 : index
    %1 = vector.load %arg1[%c0_1, %c0_2] : memref<80x128xbf16, #tpu.memory_space<vmem>>, vector<80x128xbf16>
    %cst = arith.constant dense<0.000000e+00> : vector<16x128xf32>
    %2 = tpu.matmul %0, %1, %cst {dimension_numbers = #tpu.dot_dimension_numbers<[1], [0], [0], [1], [0, 0, 1, 1], [], []>} : vector<16x80xbf16>, vector<80x128xbf16>, vector<16x128xf32> -> vector<16x128xf32>
    %cst_3 = arith.constant dense<0.000000e+00> : vector<16xf32>
    %3 = vector.multi_reduction <add>, %2, %cst_3 [1] : vector<16x128xf32> to vector<16xf32>
    %4 = vector.shape_cast %3 : vector<16xf32> to vector<16x1xf32>
    %cst_4 = arith.constant 1.280000e+02 : f32
    %5 = vector.broadcast %cst_4 : f32 to vector<16x1xf32>
    %6 = arith.divf %4, %5 : vector<16x1xf32>
    %7 = vector.broadcast %6 : vector<16x1xf32> to vector<16x128xf32>
    %8 = arith.subf %2, %7 : vector<16x128xf32>
    %9 = arith.mulf %8, %8 : vector<16x128xf32>
    %cst_5 = arith.constant dense<0.000000e+00> : vector<16xf32>
    %10 = vector.multi_reduction <add>, %9, %cst_5 [1] : vector<16x128xf32> to vector<16xf32>
    %11 = vector.shape_cast %10 : vector<16xf32> to vector<16x1xf32>
    %cst_6 = arith.constant 1.280000e+02 : f32
    %12 = vector.broadcast %cst_6 : f32 to vector<16x1xf32>
    %13 = arith.divf %11, %12 : vector<16x1xf32>
    %14 = vector.broadcast %6 : vector<16x1xf32> to vector<16x128xf32>
    %15 = arith.subf %2, %14 : vector<16x128xf32>
    %cst_7 = arith.constant 9.99999974E-6 : f32
    %16 = vector.broadcast %cst_7 : f32 to vector<16x1xf32>
    %17 = arith.addf %13, %16 : vector<16x1xf32>
    %18 = math.rsqrt %17 : vector<16x1xf32>
    %19 = vector.broadcast %18 : vector<16x1xf32> to vector<16x128xf32>
    %20 = arith.mulf %15, %19 : vector<16x128xf32>
    %cst_8 = arith.constant 0.000000e+00 : f32
    %21 = vector.broadcast %cst_8 : f32 to vector<16x128xf32>
    %22 = arith.maximumf %20, %21 : vector<16x128xf32>
    %c0_9 = arith.constant 0 : index
    %c0_10 = arith.constant 0 : index
    %23 = vector.load %arg3[%c0_9, %c0_10] : memref<16x128xf32, #tpu.memory_space<vmem>>, vector<16x128xf32>
    tpu.vector_store %arg3[%c0_9, %c0_10], %22 {strides = array<i32>} : memref<16x128xf32, #tpu.memory_space<vmem>>, vector<16x128xf32>,
    return
  }
  func.func @transform_0(%arg0: i32) -> (i32, i32) {
    %c0_i32 = arith.constant 0 : i32
    %c0_i32_0 = arith.constant 0 : i32
    %c0_i32_1 = arith.constant 0 : i32
    return %c0_i32, %c0_i32_0 : i32, i32
  }
  func.func @transform_1(%arg0: i32) -> (i32, i32) {
    %c0_i32 = arith.constant 0 : i32
    %c0_i32_0 = arith.constant 0 : i32
    %c0_i32_1 = arith.constant 0 : i32
    return %c0_i32, %c0_i32_0 : i32, i32
  }
  func.func @transform_2(%arg0: i32) -> (i32, i32) {
    %c0_i32 = arith.constant 0 : i32
    %c0_i32_0 = arith.constant 0 : i32
    %c0_i32_1 = arith.constant 0 : i32
    return %c0_i32, %c0_i32_0 : i32, i32
  }
}

module attributes {stable_mosaic.version = 11 : i64} {
  func.func @_conv_bn_act_kernel(%arg0: i32, %arg1: memref<144x128xbf16, #tpu.memory_space<vmem>>, %arg2: memref<32x144xbf16, #tpu.memory_space<vmem>>, %arg3: memref<32x128xf32, #tpu.memory_space<vmem>>) attributes {dimension_semantics = [#tpu.dimension_semantics<arbitrary>], iteration_bounds = array<i64: 1>, scalar_prefetch = 0 : i64, scratch_operands = 0 : i64, tpu.core_type = #tpu.core_type<tc>, window_params = [{pipeline_mode = #tpu.pipeline_mode<synchronous>, transform_indices = @transform_0, window_bounds = array<i64: 144, 128>}, {pipeline_mode = #tpu.pipeline_mode<synchronous>, transform_indices = @transform_1, window_bounds = array<i64: 32, 144>}, {pipeline_mode = #tpu.pipeline_mode<synchronous>, transform_indices = @transform_2, window_bounds = array<i64: 32, 128>}]} {
    %c0 = arith.constant 0 : index
    %c0_0 = arith.constant 0 : index
    %0 = vector.load %arg2[%c0, %c0_0] : memref<32x144xbf16, #tpu.memory_space<vmem>>, vector<32x144xbf16>
    %c0_1 = arith.constant 0 : index
    %c0_2 = arith.constant 0 : index
    %1 = vector.load %arg1[%c0_1, %c0_2] : memref<144x128xbf16, #tpu.memory_space<vmem>>, vector<144x128xbf16>
    %cst = arith.constant dense<0.000000e+00> : vector<32x128xf32>
    %2 = tpu.matmul %0, %1, %cst {dimension_numbers = #tpu.dot_dimension_numbers<[1], [0], [0], [1], [0, 0, 1, 1], [], []>} : vector<32x144xbf16>, vector<144x128xbf16>, vector<32x128xf32> -> vector<32x128xf32>
    %cst_3 = arith.constant dense<0.000000e+00> : vector<32xf32>
    %3 = vector.multi_reduction <add>, %2, %cst_3 [1] : vector<32x128xf32> to vector<32xf32>
    %4 = vector.shape_cast %3 : vector<32xf32> to vector<32x1xf32>
    %cst_4 = arith.constant 1.280000e+02 : f32
    %5 = vector.broadcast %cst_4 : f32 to vector<32x1xf32>
    %6 = arith.divf %4, %5 : vector<32x1xf32>
    %7 = vector.broadcast %6 : vector<32x1xf32> to vector<32x128xf32>
    %8 = arith.subf %2, %7 : vector<32x128xf32>
    %9 = arith.mulf %8, %8 : vector<32x128xf32>
    %cst_5 = arith.constant dense<0.000000e+00> : vector<32xf32>
    %10 = vector.multi_reduction <add>, %9, %cst_5 [1] : vector<32x128xf32> to vector<32xf32>
    %11 = vector.shape_cast %10 : vector<32xf32> to vector<32x1xf32>
    %cst_6 = arith.constant 1.280000e+02 : f32
    %12 = vector.broadcast %cst_6 : f32 to vector<32x1xf32>
    %13 = arith.divf %11, %12 : vector<32x1xf32>
    %14 = vector.broadcast %6 : vector<32x1xf32> to vector<32x128xf32>
    %15 = arith.subf %2, %14 : vector<32x128xf32>
    %cst_7 = arith.constant 9.99999974E-6 : f32
    %16 = vector.broadcast %cst_7 : f32 to vector<32x1xf32>
    %17 = arith.addf %13, %16 : vector<32x1xf32>
    %18 = math.rsqrt %17 : vector<32x1xf32>
    %19 = vector.broadcast %18 : vector<32x1xf32> to vector<32x128xf32>
    %20 = arith.mulf %15, %19 : vector<32x128xf32>
    %cst_8 = arith.constant 0.000000e+00 : f32
    %21 = vector.broadcast %cst_8 : f32 to vector<32x128xf32>
    %22 = arith.maximumf %20, %21 : vector<32x128xf32>
    %c0_9 = arith.constant 0 : index
    %c0_10 = arith.constant 0 : index
    %23 = vector.load %arg3[%c0_9, %c0_10] : memref<32x128xf32, #tpu.memory_space<vmem>>, vector<32x128xf32>
    tpu.vector_store %arg3[%c0_9, %c0_10], %22 {strides = array<i32>} : memref<32x128xf32, #tpu.memory_space<vmem>>, vector<32x128xf32>,
    return
  }
  func.func @transform_0(%arg0: i32) -> (i32, i32) {
    %c0_i32 = arith.constant 0 : i32
    %c0_i32_0 = arith.constant 0 : i32
    %c0_i32_1 = arith.constant 0 : i32
    return %c0_i32, %c0_i32_0 : i32, i32
  }
  func.func @transform_1(%arg0: i32) -> (i32, i32) {
    %c0_i32 = arith.constant 0 : i32
    %c0_i32_0 = arith.constant 0 : i32
    %c0_i32_1 = arith.constant 0 : i32
    return %c0_i32, %c0_i32_0 : i32, i32
  }
  func.func @transform_2(%arg0: i32) -> (i32, i32) {
    %c0_i32 = arith.constant 0 : i32
    %c0_i32_0 = arith.constant 0 : i32
    %c0_i32_1 = arith.constant 0 : i32
    return %c0_i32, %c0_i32_0 : i32, i32
  }
}

module attributes {stable_mosaic.version = 11 : i64} {
  func.func @_conv_a_pose_kernel(%arg0: i32, %arg1: memref<288x128xbf16, #tpu.memory_space<vmem>>, %arg2: memref<68x288xbf16, #tpu.memory_space<vmem>>, %arg3: memref<64x128xf32, #tpu.memory_space<vmem>>, %arg4: memref<4x128xf32, #tpu.memory_space<vmem>>) attributes {dimension_semantics = [#tpu.dimension_semantics<arbitrary>], iteration_bounds = array<i64: 1>, scalar_prefetch = 0 : i64, scratch_operands = 0 : i64, tpu.core_type = #tpu.core_type<tc>, window_params = [{pipeline_mode = #tpu.pipeline_mode<synchronous>, transform_indices = @transform_0, window_bounds = array<i64: 288, 128>}, {pipeline_mode = #tpu.pipeline_mode<synchronous>, transform_indices = @transform_1, window_bounds = array<i64: 68, 288>}, {pipeline_mode = #tpu.pipeline_mode<synchronous>, transform_indices = @transform_2, window_bounds = array<i64: 64, 128>}, {pipeline_mode = #tpu.pipeline_mode<synchronous>, transform_indices = @transform_3, window_bounds = array<i64: 4, 128>}]} {
    %c0 = arith.constant 0 : index
    %c0_0 = arith.constant 0 : index
    %0 = vector.load %arg2[%c0, %c0_0] : memref<68x288xbf16, #tpu.memory_space<vmem>>, vector<68x288xbf16>
    %c0_1 = arith.constant 0 : index
    %c0_2 = arith.constant 0 : index
    %1 = vector.load %arg1[%c0_1, %c0_2] : memref<288x128xbf16, #tpu.memory_space<vmem>>, vector<288x128xbf16>
    %cst = arith.constant dense<0.000000e+00> : vector<68x128xf32>
    %2 = tpu.matmul %0, %1, %cst {dimension_numbers = #tpu.dot_dimension_numbers<[1], [0], [0], [1], [0, 0, 1, 1], [], []>} : vector<68x288xbf16>, vector<288x128xbf16>, vector<68x128xf32> -> vector<68x128xf32>
    %cst_3 = arith.constant dense<0.000000e+00> : vector<68xf32>
    %3 = vector.multi_reduction <add>, %2, %cst_3 [1] : vector<68x128xf32> to vector<68xf32>
    %4 = vector.shape_cast %3 : vector<68xf32> to vector<68x1xf32>
    %cst_4 = arith.constant 1.280000e+02 : f32
    %5 = vector.broadcast %cst_4 : f32 to vector<68x1xf32>
    %6 = arith.divf %4, %5 : vector<68x1xf32>
    %7 = vector.broadcast %6 : vector<68x1xf32> to vector<68x128xf32>
    %8 = arith.subf %2, %7 : vector<68x128xf32>
    %9 = arith.mulf %8, %8 : vector<68x128xf32>
    %cst_5 = arith.constant dense<0.000000e+00> : vector<68xf32>
    %10 = vector.multi_reduction <add>, %9, %cst_5 [1] : vector<68x128xf32> to vector<68xf32>
    %11 = vector.shape_cast %10 : vector<68xf32> to vector<68x1xf32>
    %cst_6 = arith.constant 1.280000e+02 : f32
    %12 = vector.broadcast %cst_6 : f32 to vector<68x1xf32>
    %13 = arith.divf %11, %12 : vector<68x1xf32>
    %14 = vector.broadcast %6 : vector<68x1xf32> to vector<68x128xf32>
    %15 = arith.subf %2, %14 : vector<68x128xf32>
    %cst_7 = arith.constant 9.99999974E-6 : f32
    %16 = vector.broadcast %cst_7 : f32 to vector<68x1xf32>
    %17 = arith.addf %13, %16 : vector<68x1xf32>
    %18 = math.rsqrt %17 : vector<68x1xf32>
    %19 = vector.broadcast %18 : vector<68x1xf32> to vector<68x128xf32>
    %20 = arith.mulf %15, %19 : vector<68x128xf32>
    %21 = vector.extract_strided_slice %20 {offsets = [0, 0], sizes = [64, 128], strides = [1, 1]} : vector<68x128xf32> to vector<64x128xf32>
    %c0_8 = arith.constant 0 : index
    %c0_9 = arith.constant 0 : index
    %22 = vector.load %arg3[%c0_8, %c0_9] : memref<64x128xf32, #tpu.memory_space<vmem>>, vector<64x128xf32>
    tpu.vector_store %arg3[%c0_8, %c0_9], %21 {strides = array<i32>} : memref<64x128xf32, #tpu.memory_space<vmem>>, vector<64x128xf32>,
    %23 = vector.extract_strided_slice %20 {offsets = [64, 0], sizes = [4, 128], strides = [1, 1]} : vector<68x128xf32> to vector<4x128xf32>
    %cst_10 = arith.constant 0.000000e+00 : f32
    %24 = vector.broadcast %cst_10 : f32 to vector<4x128xf32>
    %25 = arith.subf %24, %23 : vector<4x128xf32>
    %26 = math.exp %25 : vector<4x128xf32>
    %cst_11 = arith.constant 1.000000e+00 : f32
    %27 = vector.broadcast %cst_11 : f32 to vector<4x128xf32>
    %28 = arith.addf %27, %26 : vector<4x128xf32>
    %29 = tpu.reciprocal %28 {approx = true} : vector<4x128xf32> -> vector<4x128xf32>
    %c0_12 = arith.constant 0 : index
    %c0_13 = arith.constant 0 : index
    %30 = vector.load %arg4[%c0_12, %c0_13] : memref<4x128xf32, #tpu.memory_space<vmem>>, vector<4x128xf32>
    tpu.vector_store %arg4[%c0_12, %c0_13], %29 {strides = array<i32>} : memref<4x128xf32, #tpu.memory_space<vmem>>, vector<4x128xf32>,
    return
  }
  func.func @transform_0(%arg0: i32) -> (i32, i32) {
    %c0_i32 = arith.constant 0 : i32
    %c0_i32_0 = arith.constant 0 : i32
    %c0_i32_1 = arith.constant 0 : i32
    return %c0_i32, %c0_i32_0 : i32, i32
  }
  func.func @transform_1(%arg0: i32) -> (i32, i32) {
    %c0_i32 = arith.constant 0 : i32
    %c0_i32_0 = arith.constant 0 : i32
    %c0_i32_1 = arith.constant 0 : i32
    return %c0_i32, %c0_i32_0 : i32, i32
  }
  func.func @transform_2(%arg0: i32) -> (i32, i32) {
    %c0_i32 = arith.constant 0 : i32
    %c0_i32_0 = arith.constant 0 : i32
    %c0_i32_1 = arith.constant 0 : i32
    return %c0_i32, %c0_i32_0 : i32, i32
  }
  func.func @transform_3(%arg0: i32) -> (i32, i32) {
    %c0_i32 = arith.constant 0 : i32
    %c0_i32_0 = arith.constant 0 : i32
    %c0_i32_1 = arith.constant 0 : i32
    return %c0_i32, %c0_i32_0 : i32, i32
  }
}

module attributes {stable_mosaic.version = 11 : i64} {
  func.func @_sr_pose_kernel(%arg0: i32, %arg1: memref<640x128xbf16, #tpu.memory_space<vmem>>, %arg2: memref<40x128xf32, #tpu.memory_space<vmem>>, %arg3: memref<80x640xbf16, #tpu.memory_space<vmem>>, %arg4: memref<80x1xf32, #tpu.memory_space<vmem>>, %arg5: memref<32x1280xbf16, #tpu.memory_space<vmem>>, %arg6: memref<2x128xf32, #tpu.memory_space<vmem>>, %arg7: memref<32x128xf32, #tpu.memory_space<vmem>>) attributes {dimension_semantics = [#tpu.dimension_semantics<arbitrary>], iteration_bounds = array<i64: 1>, scalar_prefetch = 0 : i64, scratch_operands = 0 : i64, tpu.core_type = #tpu.core_type<tc>, window_params = [{pipeline_mode = #tpu.pipeline_mode<synchronous>, transform_indices = @transform_0, window_bounds = array<i64: 640, 128>}, {pipeline_mode = #tpu.pipeline_mode<synchronous>, transform_indices = @transform_1, window_bounds = array<i64: 40, 128>}, {pipeline_mode = #tpu.pipeline_mode<synchronous>, transform_indices = @transform_2, window_bounds = array<i64: 80, 640>}, {pipeline_mode = #tpu.pipeline_mode<synchronous>, transform_indices = @transform_3, window_bounds = array<i64: 80, 1>}, {pipeline_mode = #tpu.pipeline_mode<synchronous>, transform_indices = @transform_4, window_bounds = array<i64: 32, 1280>}, {pipeline_mode = #tpu.pipeline_mode<synchronous>, transform_indices = @transform_5, window_bounds = array<i64: 2, 128>}, {pipeline_mode = #tpu.pipeline_mode<synchronous>, transform_indices = @transform_6, window_bounds = array<i64: 32, 128>}]} {
    %c0 = arith.constant 0 : index
    %c0_0 = arith.constant 0 : index
    %0 = vector.load %arg1[%c0, %c0_0] : memref<640x128xbf16, #tpu.memory_space<vmem>>, vector<640x128xbf16>
    %c0_1 = arith.constant 0 : index
    %c0_2 = arith.constant 0 : index
    %1 = vector.load %arg2[%c0_1, %c0_2] : memref<40x128xf32, #tpu.memory_space<vmem>>, vector<40x128xf32>
    %c0_3 = arith.constant 0 : index
    %c0_4 = arith.constant 0 : index
    %2 = vector.load %arg3[%c0_3, %c0_4] : memref<80x640xbf16, #tpu.memory_space<vmem>>, vector<80x640xbf16>
    %cst = arith.constant dense<0.000000e+00> : vector<80x128xf32>
    %3 = tpu.matmul %2, %0, %cst {dimension_numbers = #tpu.dot_dimension_numbers<[1], [0], [0], [1], [0, 0, 1, 1], [], []>} : vector<80x640xbf16>, vector<640x128xbf16>, vector<80x128xf32> -> vector<80x128xf32>
    %c0_5 = arith.constant 0 : index
    %c0_6 = arith.constant 0 : index
    %4 = vector.load %arg4[%c0_5, %c0_6] : memref<80x1xf32, #tpu.memory_space<vmem>>, vector<80x1xf32>
    %5 = vector.broadcast %4 : vector<80x1xf32> to vector<80x128xf32>
    %6 = arith.addf %3, %5 : vector<80x128xf32>
    %7 = vector.shape_cast %6 : vector<80x128xf32> to vector<2x40x128xf32>
    %cst_7 = arith.constant dense<0xFF800000> : vector<40x128xf32>
    %8 = vector.multi_reduction <maximumf>, %7, %cst_7 [0] : vector<2x40x128xf32> to vector<40x128xf32>
    %9 = vector.shape_cast %8 : vector<40x128xf32> to vector<1x40x128xf32>
    %10 = vector.broadcast %9 : vector<1x40x128xf32> to vector<2x40x128xf32>
    %11 = arith.subf %7, %10 : vector<2x40x128xf32>
    %12 = math.exp %11 : vector<2x40x128xf32>
    %cst_8 = arith.constant dense<0.000000e+00> : vector<40x128xf32>
    %13 = vector.multi_reduction <add>, %12, %cst_8 [0] : vector<2x40x128xf32> to vector<40x128xf32>
    %14 = vector.shape_cast %13 : vector<40x128xf32> to vector<1x40x128xf32>
    %15 = tpu.reciprocal %14 {approx = true} : vector<1x40x128xf32> -> vector<1x40x128xf32>
    %16 = vector.broadcast %15 : vector<1x40x128xf32> to vector<2x40x128xf32>
    %17 = arith.mulf %12, %16 : vector<2x40x128xf32>
    %18 = vector.shape_cast %1 : vector<40x128xf32> to vector<1x40x128xf32>
    %19 = vector.broadcast %18 : vector<1x40x128xf32> to vector<2x40x128xf32>
    %20 = arith.mulf %19, %17 : vector<2x40x128xf32>
    %cst_9 = arith.constant dense<0.000000e+00> : vector<2x128xf32>
    %21 = vector.multi_reduction <add>, %20, %cst_9 [1] : vector<2x40x128xf32> to vector<2x128xf32>
    %cst_10 = arith.constant dense<0.000000e+00> : vector<128xf32>
    %22 = vector.multi_reduction <add>, %1, %cst_10 [0] : vector<40x128xf32> to vector<128xf32>
    %23 = vector.shape_cast %22 : vector<128xf32> to vector<1x128xf32>
    %24 = tpu.reciprocal %23 {approx = true} : vector<1x128xf32> -> vector<1x128xf32>
    %25 = vector.broadcast %24 : vector<1x128xf32> to vector<2x128xf32>
    %26 = arith.mulf %21, %25 : vector<2x128xf32>
    %c0_11 = arith.constant 0 : index
    %c0_12 = arith.constant 0 : index
    %27 = vector.load %arg6[%c0_11, %c0_12] : memref<2x128xf32, #tpu.memory_space<vmem>>, vector<2x128xf32>
    tpu.vector_store %arg6[%c0_11, %c0_12], %26 {strides = array<i32>} : memref<2x128xf32, #tpu.memory_space<vmem>>, vector<2x128xf32>,
    %28 = tpu.reciprocal %21 {approx = true} : vector<2x128xf32> -> vector<2x128xf32>
    %29 = vector.shape_cast %28 : vector<2x128xf32> to vector<2x1x128xf32>
    %30 = vector.broadcast %29 : vector<2x1x128xf32> to vector<2x40x128xf32>
    %31 = arith.mulf %20, %30 : vector<2x40x128xf32>
    %32 = arith.extf %0 : vector<640x128xbf16> to vector<640x128xf32>
    %33 = vector.shape_cast %32 : vector<640x128xf32> to vector<40x16x128xf32>
    %34 = vector.shape_cast %31 : vector<2x40x128xf32> to vector<2x40x1x128xf32>
    %35 = vector.shape_cast %33 : vector<40x16x128xf32> to vector<1x40x16x128xf32>
    %36 = vector.broadcast %34 : vector<2x40x1x128xf32> to vector<2x40x16x128xf32>
    %37 = vector.broadcast %35 : vector<1x40x16x128xf32> to vector<2x40x16x128xf32>
    %38 = arith.mulf %36, %37 : vector<2x40x16x128xf32>
    %39 = arith.truncf %38 : vector<2x40x16x128xf32> to vector<2x40x16x128xbf16>
    %40 = vector.shape_cast %39 : vector<2x40x16x128xbf16> to vector<1280x128xbf16>
    %c0_13 = arith.constant 0 : index
    %c0_14 = arith.constant 0 : index
    %41 = vector.load %arg5[%c0_13, %c0_14] : memref<32x1280xbf16, #tpu.memory_space<vmem>>, vector<32x1280xbf16>
    %cst_15 = arith.constant dense<0.000000e+00> : vector<32x128xf32>
    %42 = tpu.matmul %41, %40, %cst_15 {dimension_numbers = #tpu.dot_dimension_numbers<[1], [0], [0], [1], [0, 0, 1, 1], [], []>} : vector<32x1280xbf16>, vector<1280x128xbf16>, vector<32x128xf32> -> vector<32x128xf32>
    %cst_16 = arith.constant dense<0.000000e+00> : vector<32xf32>
    %43 = vector.multi_reduction <add>, %42, %cst_16 [1] : vector<32x128xf32> to vector<32xf32>
    %44 = vector.shape_cast %43 : vector<32xf32> to vector<32x1xf32>
    %cst_17 = arith.constant 1.280000e+02 : f32
    %45 = vector.broadcast %cst_17 : f32 to vector<32x1xf32>
    %46 = arith.divf %44, %45 : vector<32x1xf32>
    %47 = vector.broadcast %46 : vector<32x1xf32> to vector<32x128xf32>
    %48 = arith.subf %42, %47 : vector<32x128xf32>
    %49 = arith.mulf %48, %48 : vector<32x128xf32>
    %cst_18 = arith.constant dense<0.000000e+00> : vector<32xf32>
    %50 = vector.multi_reduction <add>, %49, %cst_18 [1] : vector<32x128xf32> to vector<32xf32>
    %51 = vector.shape_cast %50 : vector<32xf32> to vector<32x1xf32>
    %cst_19 = arith.constant 1.280000e+02 : f32
    %52 = vector.broadcast %cst_19 : f32 to vector<32x1xf32>
    %53 = arith.divf %51, %52 : vector<32x1xf32>
    %54 = vector.broadcast %46 : vector<32x1xf32> to vector<32x128xf32>
    %55 = arith.subf %42, %54 : vector<32x128xf32>
    %cst_20 = arith.constant 9.99999974E-6 : f32
    %56 = vector.broadcast %cst_20 : f32 to vector<32x1xf32>
    %57 = arith.addf %53, %56 : vector<32x1xf32>
    %58 = math.rsqrt %57 : vector<32x1xf32>
    %59 = vector.broadcast %58 : vector<32x1xf32> to vector<32x128xf32>
    %60 = arith.mulf %55, %59 : vector<32x128xf32>
    %c0_21 = arith.constant 0 : index
    %c0_22 = arith.constant 0 : index
    %61 = vector.load %arg7[%c0_21, %c0_22] : memref<32x128xf32, #tpu.memory_space<vmem>>, vector<32x128xf32>
    tpu.vector_store %arg7[%c0_21, %c0_22], %60 {strides = array<i32>} : memref<32x128xf32, #tpu.memory_space<vmem>>, vector<32x128xf32>,
    return
  }
  func.func @transform_0(%arg0: i32) -> (i32, i32) {
    %c0_i32 = arith.constant 0 : i32
    %c0_i32_0 = arith.constant 0 : i32
    %c0_i32_1 = arith.constant 0 : i32
    return %c0_i32, %c0_i32_0 : i32, i32
  }
  func.func @transform_1(%arg0: i32) -> (i32, i32) {
    %c0_i32 = arith.constant 0 : i32
    %c0_i32_0 = arith.constant 0 : i32
    %c0_i32_1 = arith.constant 0 : i32
    return %c0_i32, %c0_i32_0 : i32, i32
  }
  func.func @transform_2(%arg0: i32) -> (i32, i32) {
    %c0_i32 = arith.constant 0 : i32
    %c0_i32_0 = arith.constant 0 : i32
    %c0_i32_1 = arith.constant 0 : i32
    return %c0_i32, %c0_i32_0 : i32, i32
  }
  func.func @transform_3(%arg0: i32) -> (i32, i32) {
    %c0_i32 = arith.constant 0 : i32
    %c0_i32_0 = arith.constant 0 : i32
    %c0_i32_1 = arith.constant 0 : i32
    return %c0_i32, %c0_i32_0 : i32, i32
  }
  func.func @transform_4(%arg0: i32) -> (i32, i32) {
    %c0_i32 = arith.constant 0 : i32
    %c0_i32_0 = arith.constant 0 : i32
    %c0_i32_1 = arith.constant 0 : i32
    return %c0_i32, %c0_i32_0 : i32, i32
  }
  func.func @transform_5(%arg0: i32) -> (i32, i32) {
    %c0_i32 = arith.constant 0 : i32
    %c0_i32_0 = arith.constant 0 : i32
    %c0_i32_1 = arith.constant 0 : i32
    return %c0_i32, %c0_i32_0 : i32, i32
  }
  func.func @transform_6(%arg0: i32) -> (i32, i32) {
    %c0_i32 = arith.constant 0 : i32
    %c0_i32_0 = arith.constant 0 : i32
    %c0_i32_1 = arith.constant 0 : i32
    return %c0_i32, %c0_i32_0 : i32, i32
  }
}

module attributes {stable_mosaic.version = 11 : i64} {
  func.func @_sr_pose_kernel(%arg0: i32, %arg1: memref<384x128xbf16, #tpu.memory_space<vmem>>, %arg2: memref<24x128xf32, #tpu.memory_space<vmem>>, %arg3: memref<48x384xbf16, #tpu.memory_space<vmem>>, %arg4: memref<48x1xf32, #tpu.memory_space<vmem>>, %arg5: memref<32x768xbf16, #tpu.memory_space<vmem>>, %arg6: memref<2x128xf32, #tpu.memory_space<vmem>>, %arg7: memref<32x128xf32, #tpu.memory_space<vmem>>) attributes {dimension_semantics = [#tpu.dimension_semantics<arbitrary>], iteration_bounds = array<i64: 1>, scalar_prefetch = 0 : i64, scratch_operands = 0 : i64, tpu.core_type = #tpu.core_type<tc>, window_params = [{pipeline_mode = #tpu.pipeline_mode<synchronous>, transform_indices = @transform_0, window_bounds = array<i64: 384, 128>}, {pipeline_mode = #tpu.pipeline_mode<synchronous>, transform_indices = @transform_1, window_bounds = array<i64: 24, 128>}, {pipeline_mode = #tpu.pipeline_mode<synchronous>, transform_indices = @transform_2, window_bounds = array<i64: 48, 384>}, {pipeline_mode = #tpu.pipeline_mode<synchronous>, transform_indices = @transform_3, window_bounds = array<i64: 48, 1>}, {pipeline_mode = #tpu.pipeline_mode<synchronous>, transform_indices = @transform_4, window_bounds = array<i64: 32, 768>}, {pipeline_mode = #tpu.pipeline_mode<synchronous>, transform_indices = @transform_5, window_bounds = array<i64: 2, 128>}, {pipeline_mode = #tpu.pipeline_mode<synchronous>, transform_indices = @transform_6, window_bounds = array<i64: 32, 128>}]} {
    %c0 = arith.constant 0 : index
    %c0_0 = arith.constant 0 : index
    %0 = vector.load %arg1[%c0, %c0_0] : memref<384x128xbf16, #tpu.memory_space<vmem>>, vector<384x128xbf16>
    %c0_1 = arith.constant 0 : index
    %c0_2 = arith.constant 0 : index
    %1 = vector.load %arg2[%c0_1, %c0_2] : memref<24x128xf32, #tpu.memory_space<vmem>>, vector<24x128xf32>
    %c0_3 = arith.constant 0 : index
    %c0_4 = arith.constant 0 : index
    %2 = vector.load %arg3[%c0_3, %c0_4] : memref<48x384xbf16, #tpu.memory_space<vmem>>, vector<48x384xbf16>
    %cst = arith.constant dense<0.000000e+00> : vector<48x128xf32>
    %3 = tpu.matmul %2, %0, %cst {dimension_numbers = #tpu.dot_dimension_numbers<[1], [0], [0], [1], [0, 0, 1, 1], [], []>} : vector<48x384xbf16>, vector<384x128xbf16>, vector<48x128xf32> -> vector<48x128xf32>
    %c0_5 = arith.constant 0 : index
    %c0_6 = arith.constant 0 : index
    %4 = vector.load %arg4[%c0_5, %c0_6] : memref<48x1xf32, #tpu.memory_space<vmem>>, vector<48x1xf32>
    %5 = vector.broadcast %4 : vector<48x1xf32> to vector<48x128xf32>
    %6 = arith.addf %3, %5 : vector<48x128xf32>
    %7 = vector.shape_cast %6 : vector<48x128xf32> to vector<2x24x128xf32>
    %cst_7 = arith.constant dense<0xFF800000> : vector<24x128xf32>
    %8 = vector.multi_reduction <maximumf>, %7, %cst_7 [0] : vector<2x24x128xf32> to vector<24x128xf32>
    %9 = vector.shape_cast %8 : vector<24x128xf32> to vector<1x24x128xf32>
    %10 = vector.broadcast %9 : vector<1x24x128xf32> to vector<2x24x128xf32>
    %11 = arith.subf %7, %10 : vector<2x24x128xf32>
    %12 = math.exp %11 : vector<2x24x128xf32>
    %cst_8 = arith.constant dense<0.000000e+00> : vector<24x128xf32>
    %13 = vector.multi_reduction <add>, %12, %cst_8 [0] : vector<2x24x128xf32> to vector<24x128xf32>
    %14 = vector.shape_cast %13 : vector<24x128xf32> to vector<1x24x128xf32>
    %15 = tpu.reciprocal %14 {approx = true} : vector<1x24x128xf32> -> vector<1x24x128xf32>
    %16 = vector.broadcast %15 : vector<1x24x128xf32> to vector<2x24x128xf32>
    %17 = arith.mulf %12, %16 : vector<2x24x128xf32>
    %18 = vector.shape_cast %1 : vector<24x128xf32> to vector<1x24x128xf32>
    %19 = vector.broadcast %18 : vector<1x24x128xf32> to vector<2x24x128xf32>
    %20 = arith.mulf %19, %17 : vector<2x24x128xf32>
    %cst_9 = arith.constant dense<0.000000e+00> : vector<2x128xf32>
    %21 = vector.multi_reduction <add>, %20, %cst_9 [1] : vector<2x24x128xf32> to vector<2x128xf32>
    %cst_10 = arith.constant dense<0.000000e+00> : vector<128xf32>
    %22 = vector.multi_reduction <add>, %1, %cst_10 [0] : vector<24x128xf32> to vector<128xf32>
    %23 = vector.shape_cast %22 : vector<128xf32> to vector<1x128xf32>
    %24 = tpu.reciprocal %23 {approx = true} : vector<1x128xf32> -> vector<1x128xf32>
    %25 = vector.broadcast %24 : vector<1x128xf32> to vector<2x128xf32>
    %26 = arith.mulf %21, %25 : vector<2x128xf32>
    %c0_11 = arith.constant 0 : index
    %c0_12 = arith.constant 0 : index
    %27 = vector.load %arg6[%c0_11, %c0_12] : memref<2x128xf32, #tpu.memory_space<vmem>>, vector<2x128xf32>
    tpu.vector_store %arg6[%c0_11, %c0_12], %26 {strides = array<i32>} : memref<2x128xf32, #tpu.memory_space<vmem>>, vector<2x128xf32>,
    %28 = tpu.reciprocal %21 {approx = true} : vector<2x128xf32> -> vector<2x128xf32>
    %29 = vector.shape_cast %28 : vector<2x128xf32> to vector<2x1x128xf32>
    %30 = vector.broadcast %29 : vector<2x1x128xf32> to vector<2x24x128xf32>
    %31 = arith.mulf %20, %30 : vector<2x24x128xf32>
    %32 = arith.extf %0 : vector<384x128xbf16> to vector<384x128xf32>
    %33 = vector.shape_cast %32 : vector<384x128xf32> to vector<24x16x128xf32>
    %34 = vector.shape_cast %31 : vector<2x24x128xf32> to vector<2x24x1x128xf32>
    %35 = vector.shape_cast %33 : vector<24x16x128xf32> to vector<1x24x16x128xf32>
    %36 = vector.broadcast %34 : vector<2x24x1x128xf32> to vector<2x24x16x128xf32>
    %37 = vector.broadcast %35 : vector<1x24x16x128xf32> to vector<2x24x16x128xf32>
    %38 = arith.mulf %36, %37 : vector<2x24x16x128xf32>
    %39 = arith.truncf %38 : vector<2x24x16x128xf32> to vector<2x24x16x128xbf16>
    %40 = vector.shape_cast %39 : vector<2x24x16x128xbf16> to vector<768x128xbf16>
    %c0_13 = arith.constant 0 : index
    %c0_14 = arith.constant 0 : index
    %41 = vector.load %arg5[%c0_13, %c0_14] : memref<32x768xbf16, #tpu.memory_space<vmem>>, vector<32x768xbf16>
    %cst_15 = arith.constant dense<0.000000e+00> : vector<32x128xf32>
    %42 = tpu.matmul %41, %40, %cst_15 {dimension_numbers = #tpu.dot_dimension_numbers<[1], [0], [0], [1], [0, 0, 1, 1], [], []>} : vector<32x768xbf16>, vector<768x128xbf16>, vector<32x128xf32> -> vector<32x128xf32>
    %cst_16 = arith.constant dense<0.000000e+00> : vector<32xf32>
    %43 = vector.multi_reduction <add>, %42, %cst_16 [1] : vector<32x128xf32> to vector<32xf32>
    %44 = vector.shape_cast %43 : vector<32xf32> to vector<32x1xf32>
    %cst_17 = arith.constant 1.280000e+02 : f32
    %45 = vector.broadcast %cst_17 : f32 to vector<32x1xf32>
    %46 = arith.divf %44, %45 : vector<32x1xf32>
    %47 = vector.broadcast %46 : vector<32x1xf32> to vector<32x128xf32>
    %48 = arith.subf %42, %47 : vector<32x128xf32>
    %49 = arith.mulf %48, %48 : vector<32x128xf32>
    %cst_18 = arith.constant dense<0.000000e+00> : vector<32xf32>
    %50 = vector.multi_reduction <add>, %49, %cst_18 [1] : vector<32x128xf32> to vector<32xf32>
    %51 = vector.shape_cast %50 : vector<32xf32> to vector<32x1xf32>
    %cst_19 = arith.constant 1.280000e+02 : f32
    %52 = vector.broadcast %cst_19 : f32 to vector<32x1xf32>
    %53 = arith.divf %51, %52 : vector<32x1xf32>
    %54 = vector.broadcast %46 : vector<32x1xf32> to vector<32x128xf32>
    %55 = arith.subf %42, %54 : vector<32x128xf32>
    %cst_20 = arith.constant 9.99999974E-6 : f32
    %56 = vector.broadcast %cst_20 : f32 to vector<32x1xf32>
    %57 = arith.addf %53, %56 : vector<32x1xf32>
    %58 = math.rsqrt %57 : vector<32x1xf32>
    %59 = vector.broadcast %58 : vector<32x1xf32> to vector<32x128xf32>
    %60 = arith.mulf %55, %59 : vector<32x128xf32>
    %c0_21 = arith.constant 0 : index
    %c0_22 = arith.constant 0 : index
    %61 = vector.load %arg7[%c0_21, %c0_22] : memref<32x128xf32, #tpu.memory_space<vmem>>, vector<32x128xf32>
    tpu.vector_store %arg7[%c0_21, %c0_22], %60 {strides = array<i32>} : memref<32x128xf32, #tpu.memory_space<vmem>>, vector<32x128xf32>,
    return
  }
  func.func @transform_0(%arg0: i32) -> (i32, i32) {
    %c0_i32 = arith.constant 0 : i32
    %c0_i32_0 = arith.constant 0 : i32
    %c0_i32_1 = arith.constant 0 : i32
    return %c0_i32, %c0_i32_0 : i32, i32
  }
  func.func @transform_1(%arg0: i32) -> (i32, i32) {
    %c0_i32 = arith.constant 0 : i32
    %c0_i32_0 = arith.constant 0 : i32
    %c0_i32_1 = arith.constant 0 : i32
    return %c0_i32, %c0_i32_0 : i32, i32
  }
  func.func @transform_2(%arg0: i32) -> (i32, i32) {
    %c0_i32 = arith.constant 0 : i32
    %c0_i32_0 = arith.constant 0 : i32
    %c0_i32_1 = arith.constant 0 : i32
    return %c0_i32, %c0_i32_0 : i32, i32
  }
  func.func @transform_3(%arg0: i32) -> (i32, i32) {
    %c0_i32 = arith.constant 0 : i32
    %c0_i32_0 = arith.constant 0 : i32
    %c0_i32_1 = arith.constant 0 : i32
    return %c0_i32, %c0_i32_0 : i32, i32
  }
  func.func @transform_4(%arg0: i32) -> (i32, i32) {
    %c0_i32 = arith.constant 0 : i32
    %c0_i32_0 = arith.constant 0 : i32
    %c0_i32_1 = arith.constant 0 : i32
    return %c0_i32, %c0_i32_0 : i32, i32
  }
  func.func @transform_5(%arg0: i32) -> (i32, i32) {
    %c0_i32 = arith.constant 0 : i32
    %c0_i32_0 = arith.constant 0 : i32
    %c0_i32_1 = arith.constant 0 : i32
    return %c0_i32, %c0_i32_0 : i32, i32
  }
  func.func @transform_6(%arg0: i32) -> (i32, i32) {
    %c0_i32 = arith.constant 0 : i32
    %c0_i32_0 = arith.constant 0 : i32
    %c0_i32_1 = arith.constant 0 : i32
    return %c0_i32, %c0_i32_0 : i32, i32
  }
}

module attributes {stable_mosaic.version = 11 : i64} {
  func.func @_sr_a_kernel(%arg0: i32, %arg1: memref<384x128xbf16, #tpu.memory_space<vmem>>, %arg2: memref<24x128xf32, #tpu.memory_space<vmem>>, %arg3: memref<240x384xbf16, #tpu.memory_space<vmem>>, %arg4: memref<240x1xf32, #tpu.memory_space<vmem>>, %arg5: memref<10x128xf32, #tpu.memory_space<vmem>>) attributes {dimension_semantics = [#tpu.dimension_semantics<arbitrary>], iteration_bounds = array<i64: 1>, scalar_prefetch = 0 : i64, scratch_operands = 0 : i64, tpu.core_type = #tpu.core_type<tc>, window_params = [{pipeline_mode = #tpu.pipeline_mode<synchronous>, transform_indices = @transform_0, window_bounds = array<i64: 384, 128>}, {pipeline_mode = #tpu.pipeline_mode<synchronous>, transform_indices = @transform_1, window_bounds = array<i64: 24, 128>}, {pipeline_mode = #tpu.pipeline_mode<synchronous>, transform_indices = @transform_2, window_bounds = array<i64: 240, 384>}, {pipeline_mode = #tpu.pipeline_mode<synchronous>, transform_indices = @transform_3, window_bounds = array<i64: 240, 1>}, {pipeline_mode = #tpu.pipeline_mode<synchronous>, transform_indices = @transform_4, window_bounds = array<i64: 10, 128>}]} {
    %c0 = arith.constant 0 : index
    %c0_0 = arith.constant 0 : index
    %0 = vector.load %arg3[%c0, %c0_0] : memref<240x384xbf16, #tpu.memory_space<vmem>>, vector<240x384xbf16>
    %c0_1 = arith.constant 0 : index
    %c0_2 = arith.constant 0 : index
    %1 = vector.load %arg1[%c0_1, %c0_2] : memref<384x128xbf16, #tpu.memory_space<vmem>>, vector<384x128xbf16>
    %cst = arith.constant dense<0.000000e+00> : vector<240x128xf32>
    %2 = tpu.matmul %0, %1, %cst {dimension_numbers = #tpu.dot_dimension_numbers<[1], [0], [0], [1], [0, 0, 1, 1], [], []>} : vector<240x384xbf16>, vector<384x128xbf16>, vector<240x128xf32> -> vector<240x128xf32>
    %c0_3 = arith.constant 0 : index
    %c0_4 = arith.constant 0 : index
    %3 = vector.load %arg4[%c0_3, %c0_4] : memref<240x1xf32, #tpu.memory_space<vmem>>, vector<240x1xf32>
    %4 = vector.broadcast %3 : vector<240x1xf32> to vector<240x128xf32>
    %5 = arith.addf %2, %4 : vector<240x128xf32>
    %6 = vector.shape_cast %5 : vector<240x128xf32> to vector<10x24x128xf32>
    %cst_5 = arith.constant dense<0xFF800000> : vector<24x128xf32>
    %7 = vector.multi_reduction <maximumf>, %6, %cst_5 [0] : vector<10x24x128xf32> to vector<24x128xf32>
    %8 = vector.shape_cast %7 : vector<24x128xf32> to vector<1x24x128xf32>
    %9 = vector.broadcast %8 : vector<1x24x128xf32> to vector<10x24x128xf32>
    %10 = arith.subf %6, %9 : vector<10x24x128xf32>
    %11 = math.exp %10 : vector<10x24x128xf32>
    %cst_6 = arith.constant dense<0.000000e+00> : vector<24x128xf32>
    %12 = vector.multi_reduction <add>, %11, %cst_6 [0] : vector<10x24x128xf32> to vector<24x128xf32>
    %13 = vector.shape_cast %12 : vector<24x128xf32> to vector<1x24x128xf32>
    %14 = tpu.reciprocal %13 {approx = true} : vector<1x24x128xf32> -> vector<1x24x128xf32>
    %15 = vector.broadcast %14 : vector<1x24x128xf32> to vector<10x24x128xf32>
    %16 = arith.mulf %11, %15 : vector<10x24x128xf32>
    %c0_7 = arith.constant 0 : index
    %c0_8 = arith.constant 0 : index
    %17 = vector.load %arg2[%c0_7, %c0_8] : memref<24x128xf32, #tpu.memory_space<vmem>>, vector<24x128xf32>
    %18 = vector.shape_cast %17 : vector<24x128xf32> to vector<1x24x128xf32>
    %19 = vector.broadcast %18 : vector<1x24x128xf32> to vector<10x24x128xf32>
    %20 = arith.mulf %19, %16 : vector<10x24x128xf32>
    %cst_9 = arith.constant dense<0.000000e+00> : vector<10x128xf32>
    %21 = vector.multi_reduction <add>, %20, %cst_9 [1] : vector<10x24x128xf32> to vector<10x128xf32>
    %cst_10 = arith.constant dense<0.000000e+00> : vector<128xf32>
    %22 = vector.multi_reduction <add>, %17, %cst_10 [0] : vector<24x128xf32> to vector<128xf32>
    %23 = vector.shape_cast %22 : vector<128xf32> to vector<1x128xf32>
    %24 = tpu.reciprocal %23 {approx = true} : vector<1x128xf32> -> vector<1x128xf32>
    %25 = vector.broadcast %24 : vector<1x128xf32> to vector<10x128xf32>
    %26 = arith.mulf %21, %25 : vector<10x128xf32>
    %c0_11 = arith.constant 0 : index
    %c0_12 = arith.constant 0 : index
    %27 = vector.load %arg5[%c0_11, %c0_12] : memref<10x128xf32, #tpu.memory_space<vmem>>, vector<10x128xf32>
    tpu.vector_store %arg5[%c0_11, %c0_12], %26 {strides = array<i32>} : memref<10x128xf32, #tpu.memory_space<vmem>>, vector<10x128xf32>,
    return
  }
  func.func @transform_0(%arg0: i32) -> (i32, i32) {
    %c0_i32 = arith.constant 0 : i32
    %c0_i32_0 = arith.constant 0 : i32
    %c0_i32_1 = arith.constant 0 : i32
    return %c0_i32, %c0_i32_0 : i32, i32
  }
  func.func @transform_1(%arg0: i32) -> (i32, i32) {
    %c0_i32 = arith.constant 0 : i32
    %c0_i32_0 = arith.constant 0 : i32
    %c0_i32_1 = arith.constant 0 : i32
    return %c0_i32, %c0_i32_0 : i32, i32
  }
  func.func @transform_2(%arg0: i32) -> (i32, i32) {
    %c0_i32 = arith.constant 0 : i32
    %c0_i32_0 = arith.constant 0 : i32
    %c0_i32_1 = arith.constant 0 : i32
    return %c0_i32, %c0_i32_0 : i32, i32
  }
  func.func @transform_3(%arg0: i32) -> (i32, i32) {
    %c0_i32 = arith.constant 0 : i32
    %c0_i32_0 = arith.constant 0 : i32
    %c0_i32_1 = arith.constant 0 : i32
    return %c0_i32, %c0_i32_0 : i32, i32
  }
  func.func @transform_4(%arg0: i32) -> (i32, i32) {
    %c0_i32 = arith.constant 0 : i32
    %c0_i32_0 = arith.constant 0 : i32
    %c0_i32_1 = arith.constant 0 : i32
    return %c0_i32, %c0_i32_0 : i32, i32
  }
}

</mosaic_0001>

<bundles_post_ra>
// kernel: convnet_forward.7
= control target key start
LH: loop header
LB: loop body
LE: loop exit
PB: predicated region body
PF: predicated region fallthrough
CT: control target
= control target key end

     0   :  { %v211_v1 = vmov 0   ;;  %vm61_vm0 = vcmask 261120   ;;  %s266_s0 = inlined_call_operand.vmem [shape: bf16[32,512], index: 0, kind: input, shape index: {}]   ;;  %s267_s1 = inlined_call_operand.vmem [shape: bf16[8,32], index: 1, kind: input, shape index: {}]   ;;  %s268_s2 = inlined_call_operand.vmem [shape: f32[8,512], index: 2, kind: output, shape index: {}]  }
   0x1   :  { %v197_v0 = vld [vmem:[%s266_s0 + $0x24] ss:$16 sps:$4 sm:$0xff]   ;;  %97 = vmatprep.mubr.bf16.mxu0 %v211_v1  ;;  %138 = vmatprep.mubr.bf16.mxu1 %v211_v1  ;;  %v199_v2 = vld [vmem:[%s266_s0 + $0x2c] ss:$16 sps:$4 sm:$0xff]   ;;  %v201_v3 = vld [vmem:[%s266_s0 + $0x20] ss:$16 sps:$4 sm:$0xff]  }
   0x2   :  { %77 = vmatprep.subr.bf16.mxu0 %v197_v0  ;;  %v202_v4 = vld [vmem:[%s266_s0 + $0x28] ss:$16 sps:$4 sm:$0xff]   ;;  %118 = vmatprep.subr.bf16.mxu1 %v199_v2  ;;  %v203_v5 = vld [vmem:[%s266_s0 + $0x4] ss:$16 sps:$4 sm:$0xff]   ;;  %v205_v6 = vld [vmem:[%s266_s0 + $0xc] ss:$16 sps:$4 sm:$0xff]  }
   0x3   :  { %78 = vmatpush1.bf16.msra.mxu0 %v201_v3  ;;  %119 = vmatpush1.bf16.msra.mxu1 %v202_v4  ;;  %v207_v7 = vld [vmem:[%s266_s0] ss:$16 sps:$4 sm:$0xff]   ;;  %v208_v8 = vld [vmem:[%s266_s0 + $0x8] ss:$16 sps:$4 sm:$0xff]  }
   0x4   :  { %79 = vmatprep.subr.bf16.mxu0 %v203_v5  ;;  %120 = vmatprep.subr.bf16.mxu1 %v205_v6  ;;  %v12_v9 = vld [vmem:[%s267_s1] sm:$0xf] }
   0x7   :  { %80 = vmatpush1.bf16.msra.mxu0 %v207_v7  ;;  %121 = vmatpush1.bf16.msra.mxu1 %v208_v8 }
   0xa   :  { %194 = vmatmul.mubr.msk.bf16.vlgmr.msra.gmra.mxu0 %vm61_vm0, %v12_v9  ;;  %195 = vmatmul.mubr.msk.bf16.vlgmr.msra.gmra.mxu1 %vm61_vm0, %v12_v9 }
  0xca   :  { %v99_v10 = vpop.f32.mrf.mxu0  ;;  %v140_v11 = vpop.f32.mrf.mxu1 }
  0xcc   :  { %v101_v12 = vpop.f32.mrf.mxu0  ;;  %v142_v13 = vpop.f32.mrf.mxu1 }
  0xcd   :  { %v147_v14 = vadd.f32 %v101_v12, %v99_v10 }
  0xce   :  { %v103_v15 = vpop.f32.mrf.mxu0  ;;  %v144_v16 = vpop.f32.mrf.mxu1 }
  0xcf   :  { %v148_v17 = vadd.f32 %v147_v14, %v140_v11 }
  0xd0   :  { %v104_v18 = vpop.f32.mrf.mxu0  ;;  %v145_v19 = vpop.f32.mrf.mxu1 }
  0xd1   :  { %v149_v20 = vadd.f32 %v148_v17, %v142_v13 }
  0xd3   :  { %150 = vadd.xlane.f32.xlu0 %v149_v20 }
 0x15c   :  { %v151_v21 = vpop.xlane.xlu0 %150 }
 0x15d   :  { %v153_v22 = vmul.f32 0.001953125, %v151_v21 }
 0x15f   :  { %v154_v23 = vsub.f32 %v99_v10, %v153_v22  ;;  %v155_v24 = vsub.f32 %v101_v12, %v153_v22  ;;  %v156_v25 = vsub.f32 %v140_v11, %v153_v22  ;;  %v157_v26 = vsub.f32 %v142_v13, %v153_v22 }
 0x161   :  { %v158_v27 = vmul.f32 %v154_v23, %v154_v23  ;;  %v159_v28 = vmul.f32 %v155_v24, %v155_v24  ;;  %v160_v29 = vmul.f32 %v156_v25, %v156_v25  ;;  %v161_v31 = vmul.f32 %v157_v26, %v157_v26 }
 0x163   :  { %v162_v30 = vadd.f32 %v159_v28, %v158_v27 }
 0x165   :  { %v163_v32 = vadd.f32 %v162_v30, %v160_v29 }
 0x167   :  { %v164_v33 = vadd.f32 %v163_v32, %v161_v31 }
 0x169   :  { %165 = vadd.xlane.f32.xlu0 %v164_v33 }
 0x1f2   :  { %v166_v34 = vpop.xlane.xlu0 %165 }
 0x1f3   :  { %v167_v35 = vmul.f32 0.001953125, %v166_v34 }
 0x1f5   :  { %v168_v36 = vadd.f32 1e-05, %v167_v35 }
 0x1f7   :  { %209 = vrsqrt.f32 %v168_v36 }
 0x204   :  { %v210_v37 = vpop.eup %209 }
 0x205   :  { %v170_v38 = vmul.f32 %v210_v37, %v154_v23  ;;  %v171_v39 = vmul.f32 %v210_v37, %v155_v24  ;;  %v172_v40 = vmul.f32 %v210_v37, %v156_v25  ;;  %v173_v41 = vmul.f32 %v210_v37, %v157_v26 }
 0x207   :  { %v174_v42 = vmax.f32 %v170_v38, 0.0  ;;  %v175_v43 = vmax.f32 %v171_v39, 0.0  ;;  %v176_v44 = vmax.f32 %v172_v40, 0.0  ;;  %v177_v45 = vmax.f32 %v173_v41, 0.0 }
 0x209   :  { %178 = vst [vmem:[%s268_s2] sm:$0xff] %v174_v42  ;;  %179 = vst [vmem:[%s268_s2 + $0x8] sm:$0xff] %v175_v43 }
 0x20a   :  { %180 = vst [vmem:[%s268_s2 + $0x10] sm:$0xff] %v176_v44  ;;  %181 = vst [vmem:[%s268_s2 + $0x18] sm:$0xff] %v177_v45 }

// kernel: convnet_forward.8
= control target key start
LH: loop header
LB: loop body
LE: loop exit
PB: predicated region body
PF: predicated region fallthrough
CT: control target
= control target key end

     0   :  { %v174_v0 = vmov 0.0   ;;  %vm175_vm0 = vmmov 0   ;;  %vm59_vm1 = vcmask 654336   ;;  %s215_s0 = inlined_call_operand.vmem [shape: bf16[80,128], index: 0, kind: input, shape index: {}]   ;;  %s216_s1 = inlined_call_operand.vmem [shape: bf16[16,80], index: 1, kind: input, shape index: {}]   ;;  %s217_s2 = inlined_call_operand.vmem [shape: f32[16,128], index: 2, kind: output, shape index: {}]  }
   0x1   :  { %148 = vmatprep.subr.bf16.mxu0 %v174_v0  ;;  %v164_v1 = vld [vmem:[%s215_s0 + $0x20] sm:$0xff]   ;;  %158 = vmatprep.mubr.msk.bf16.mxu0 %vm175_vm0, %v174_v0  ;;  %v165_v2 = vld [vmem:[%s215_s0 + $0x18] sm:$0xff]   ;;  %v166_v3 = vld [vmem:[%s215_s0 + $0x10] sm:$0xff]  }
   0x2   :  { %149 = vmatpush3.bf16.msra.mxu0 %v164_v1  ;;  %v167_v4 = vld [vmem:[%s215_s0 + $0x8] sm:$0xff]   ;;  %v168_v5 = vld [vmem:[%s215_s0] sm:$0xff]  }
   0x3   :  { %150 = vmatprep.subr.bf16.mxu0 %v174_v0  ;;  %v169_v6 = vld [vmem:[%s216_s1] sm:$0xff]  }
   0x6   :  { %151 = vmatpush3.bf16.msra.mxu0 %v165_v2 }
   0x7   :  { %152 = vmatprep.subr.bf16.mxu0 %v174_v0 }
   0xa   :  { %153 = vmatpush3.bf16.msra.mxu0 %v166_v3 }
   0xb   :  { %154 = vmatprep.subr.bf16.mxu0 %v174_v0 }
   0xe   :  { %155 = vmatpush3.bf16.msra.mxu0 %v167_v4 }
   0xf   :  { %156 = vmatprep.subr.bf16.mxu0 %v174_v0 }
  0x12   :  { %157 = vmatpush3.bf16.msra.mxu0 %v168_v5 }
  0x15   :  { %159 = vmatmul.mubr.msk.bf16.vlgmr.msra.gmra.mxu0 %vm59_vm1, %v169_v6 }
  0xd5   :  { %v97_v7 = vpop.f32.mrf.mxu0 }
  0xd6   :  { %104 = vadd.xlane.f32.xlu0 %v97_v7 }
  0xd7   :  { %v160_v8 = vpop.f32.mrf.mxu0 }
  0xd9   :  { %v100_v9 = vpop.f32.mrf.mxu0 }
  0xda   :  { %106 = vadd.xlane.f32.xlu0 %v100_v9 }
  0xdb   :  { %v161_v10 = vpop.f32.mrf.mxu0 }
 0x15f   :  { %v105_v11 = vpop.xlane.xlu0 %104 }
 0x160   :  { %v109_v12 = vmul.f32 0.0078125, %v105_v11 }
 0x162   :  { %v111_v13 = vsub.f32 %v97_v7, %v109_v12 }
 0x163   :  { %v107_v14 = vpop.xlane.xlu0 %106 }
 0x164   :  { %v110_v15 = vmul.f32 0.0078125, %v107_v14  ;;  %v113_v16 = vmul.f32 %v111_v13, %v111_v13 }
 0x166   :  { %v112_v17 = vsub.f32 %v100_v9, %v110_v15  ;;  %115 = vadd.xlane.f32.xlu1 %v113_v16 }
 0x168   :  { %v114_v18 = vmul.f32 %v112_v17, %v112_v17 }
 0x16a   :  { %117 = vadd.xlane.f32.xlu1 %v114_v18 }
 0x1ef   :  { %v116_v19 = vpop.xlane.xlu1 %115 }
 0x1f0   :  { %v119_v20 = vmul.f32 0.0078125, %v116_v19 }
 0x1f2   :  { %v121_v21 = vadd.f32 1e-05, %v119_v20 }
 0x1f3   :  { %v118_v22 = vpop.xlane.xlu1 %117 }
 0x1f4   :  { %170 = vrsqrt.f32 %v121_v21  ;;  %v120_v23 = vmul.f32 0.0078125, %v118_v22 }
 0x1f6   :  { %v122_v24 = vadd.f32 1e-05, %v120_v23 }
 0x1f8   :  { %172 = vrsqrt.f32 %v122_v24 }
 0x201   :  { %v171_v25 = vpop.eup %170 }
 0x202   :  { %v125_v26 = vmul.f32 %v171_v25, %v111_v13 }
 0x204   :  { %v127_v27 = vmax.f32 %v125_v26, 0.0 }
 0x205   :  { %v173_v28 = vpop.eup %172 }
 0x206   :  { %129 = vst [vmem:[%s217_s2] sm:$0xff] %v127_v27  ;;  %v126_v29 = vmul.f32 %v173_v28, %v112_v17 }
 0x208   :  { %v128_v30 = vmax.f32 %v126_v29, 0.0 }
 0x20a   :  { %130 = vst [vmem:[%s217_s2 + $0x8] sm:$0xff] %v128_v30 }

// kernel: convnet_forward.9
= control target key start
LH: loop header
LB: loop body
LE: loop exit
PB: predicated region body
PF: predicated region fallthrough
CT: control target
= control target key end

     0   :  { %v276_v0 = vmov 0   ;;  %vm106_vm0 = vcmask 130048   ;;  %s343_s0 = inlined_call_operand.vmem [shape: bf16[144,128], index: 0, kind: input, shape index: {}]   ;;  %s344_s1 = inlined_call_operand.vmem [shape: bf16[32,144], index: 1, kind: input, shape index: {}]   ;;  %s345_s2 = inlined_call_operand.vmem [shape: f32[32,128], index: 2, kind: output, shape index: {}]  }
   0x1   :  { %113 = vmatprep.subr.bf16.mxu0 %v276_v0  ;;  %234 = vmatprep.subr.bf16.mxu1 %v276_v0  ;;  %v253_v1 = vld [vmem:[%s343_s0 + $0x38] sm:$0xff]   ;;  %v254_v2 = vld [vmem:[%s343_s0 + $0x30] sm:$0xff]   ;;  %v255_v3 = vld [vmem:[%s343_s0 + $0x28] sm:$0xff]  }
   0x2   :  { %114 = vmatpush1.bf16.msra.mxu0 %v253_v1  ;;  %243 = vmatpush1.bf16.msra.mxu1 %v253_v1  ;;  %v256_v4 = vld [vmem:[%s343_s0 + $0x20] sm:$0xff]   ;;  %v267_v6 = vld [vmem:[%s344_s1 + $0x14] ss:$8 sps:$4 sm:$0xff]   ;;  %v259_v9 = vld [vmem:[%s343_s0 + $0x8] sm:$0xff]  }
   0x3   :  { %115 = vmatprep.subr.bf16.mxu0 %v276_v0  ;;  %235 = vmatprep.subr.bf16.mxu1 %v276_v0  ;;  %v264_v5 = vld [vmem:[%s344_s1 + $0x4] ss:$8 sps:$4 sm:$0xff]   ;;  %v257_v7 = vld [vmem:[%s343_s0 + $0x18] sm:$0xff]   ;;  %v258_v8 = vld [vmem:[%s343_s0 + $0x10] sm:$0xff]  }
   0x4   :  { %232 = vmatprep.mubr.msk.bf16.mxu0 %vm106_vm0, %v264_v5  ;;  %233 = vmatprep.mubr.msk.bf16.mxu1 %vm106_vm0, %v267_v6  ;;  %v260_v10 = vld [vmem:[%s343_s0] sm:$0xff]   ;;  %v265_v13 = vld [vmem:[%s344_s1 + $0x10] ss:$8 sps:$4 sm:$0xff]  }
   0x5   :  { %v261_v11 = vld [vmem:[%s343_s0 + $0x40] sm:$0xff]  }
   0x6   :  { %116 = vmatpush1.bf16.msra.mxu0 %v254_v2  ;;  %244 = vmatpush1.bf16.msra.mxu1 %v254_v2  ;;  %v262_v12 = vld [vmem:[%s344_s1] ss:$8 sps:$4 sm:$0xff]  }
   0x7   :  { %117 = vmatprep.subr.bf16.mxu0 %v276_v0  ;;  %236 = vmatprep.subr.bf16.mxu1 %v276_v0 }
   0xa   :  { %118 = vmatpush1.bf16.msra.mxu0 %v255_v3  ;;  %245 = vmatpush1.bf16.msra.mxu1 %v255_v3 }
   0xb   :  { %119 = vmatprep.subr.bf16.mxu0 %v276_v0  ;;  %237 = vmatprep.subr.bf16.mxu1 %v276_v0 }
   0xe   :  { %120 = vmatpush1.bf16.msra.mxu0 %v256_v4  ;;  %246 = vmatpush1.bf16.msra.mxu1 %v256_v4 }
   0xf   :  { %121 = vmatprep.subr.bf16.mxu0 %v276_v0  ;;  %238 = vmatprep.subr.bf16.mxu1 %v276_v0 }
  0x12   :  { %122 = vmatpush1.bf16.msra.mxu0 %v257_v7  ;;  %247 = vmatpush1.bf16.msra.mxu1 %v257_v7 }
  0x13   :  { %123 = vmatprep.subr.bf16.mxu0 %v276_v0  ;;  %239 = vmatprep.subr.bf16.mxu1 %v276_v0 }
  0x16   :  { %124 = vmatpush1.bf16.msra.mxu0 %v258_v8  ;;  %248 = vmatpush1.bf16.msra.mxu1 %v258_v8 }
  0x17   :  { %125 = vmatprep.subr.bf16.mxu0 %v276_v0  ;;  %240 = vmatprep.subr.bf16.mxu1 %v276_v0 }
  0x1a   :  { %126 = vmatpush1.bf16.msra.mxu0 %v259_v9  ;;  %249 = vmatpush1.bf16.msra.mxu1 %v259_v9 }
  0x1b   :  { %127 = vmatprep.subr.bf16.mxu0 %v276_v0  ;;  %241 = vmatprep.subr.bf16.mxu1 %v276_v0 }
  0x1e   :  { %128 = vmatpush1.bf16.msra.mxu0 %v260_v10  ;;  %250 = vmatpush1.bf16.msra.mxu1 %v260_v10 }
  0x1f   :  { %143 = vmatprep.subr.bf16.mxu0 %v276_v0  ;;  %242 = vmatprep.subr.bf16.mxu1 %v276_v0 }
  0x22   :  { %144 = vmatpush2.bf16.msra.mxu0 %v261_v11  ;;  %251 = vmatpush2.bf16.msra.mxu1 %v261_v11 }
  0x25   :  { %146 = vmatmul.mubr.bf16.vlgmr.msra.gmra.mxu0 %v262_v12  ;;  %154 = vmatmul.mubr.bf16.vlgmr.msra.gmra.mxu1 %v265_v13 }
  0xe5   :  { %v147_v14 = vpop.f32.mrf.mxu0  ;;  %v155_v15 = vpop.f32.mrf.mxu1 }
  0xe6   :  { %166 = vadd.xlane.f32.xlu1 %v155_v15  ;;  %162 = vadd.xlane.f32.xlu0 %v147_v14 }
  0xe7   :  { %v149_v16 = vpop.f32.mrf.mxu0  ;;  %v157_v17 = vpop.f32.mrf.mxu1 }
  0xe9   :  { %v150_v18 = vpop.f32.mrf.mxu0  ;;  %v158_v19 = vpop.f32.mrf.mxu1 }
  0xea   :  { %168 = vadd.xlane.f32.xlu1 %v158_v19  ;;  %164 = vadd.xlane.f32.xlu0 %v150_v18 }
  0xeb   :  { %v152_v20 = vpop.f32.mrf.mxu0  ;;  %v160_v21 = vpop.f32.mrf.mxu1 }
 0x16f   :  { %v167_v22 = vpop.xlane.xlu1 %166  ;;  %v163_v23 = vpop.xlane.xlu0 %162 }
 0x170   :  { %v173_v24 = vmul.f32 0.0078125, %v167_v22  ;;  %v171_v25 = vmul.f32 0.0078125, %v163_v23 }
 0x172   :  { %v175_v26 = vsub.f32 %v147_v14, %v171_v25  ;;  %v177_v29 = vsub.f32 %v155_v15, %v173_v24 }
 0x173   :  { %v169_v27 = vpop.xlane.xlu1 %168  ;;  %v165_v28 = vpop.xlane.xlu0 %164 }
 0x174   :  { %v174_v30 = vmul.f32 0.0078125, %v169_v27  ;;  %v172_v31 = vmul.f32 0.0078125, %v165_v28  ;;  %v179_v32 = vmul.f32 %v175_v26, %v175_v26  ;;  %v181_v35 = vmul.f32 %v177_v29, %v177_v29 }
 0x176   :  { %v176_v33 = vsub.f32 %v150_v18, %v172_v31  ;;  %183 = vadd.xlane.f32.xlu0 %v179_v32  ;;  %v178_v34 = vsub.f32 %v158_v19, %v174_v30 }
 0x178   :  { %v180_v36 = vmul.f32 %v176_v33, %v176_v33  ;;  %v182_v37 = vmul.f32 %v178_v34, %v178_v34 }
 0x17a   :  { %187 = vadd.xlane.f32.xlu0 %v181_v35  ;;  %185 = vadd.xlane.f32.xlu1 %v180_v36 }
 0x17e   :  { %189 = vadd.xlane.f32.xlu1 %v182_v37 }
 0x1ff   :  { %v184_v38 = vpop.xlane.xlu0 %183 }
 0x200   :  { %v191_v39 = vmul.f32 0.0078125, %v184_v38 }
 0x202   :  { %v195_v40 = vadd.f32 1e-05, %v191_v39 }
 0x203   :  { %v186_v41 = vpop.xlane.xlu1 %185  ;;  %v188_v42 = vpop.xlane.xlu0 %187 }
 0x204   :  { %268 = vrsqrt.f32 %v195_v40  ;;  %v192_v43 = vmul.f32 0.0078125, %v186_v41  ;;  %v193_v44 = vmul.f32 0.0078125, %v188_v42 }
 0x206   :  { %v196_v45 = vadd.f32 1e-05, %v192_v43  ;;  %v197_v46 = vadd.f32 1e-05, %v193_v44 }
 0x207   :  { %v190_v47 = vpop.xlane.xlu1 %189 }
 0x208   :  { %270 = vrsqrt.f32 %v196_v45  ;;  %v194_v48 = vmul.f32 0.0078125, %v190_v47 }
 0x209   :  { %272 = vrsqrt.f32 %v197_v46 }
 0x20a   :  { %v198_v49 = vadd.f32 1e-05, %v194_v48 }
 0x20c   :  { %274 = vrsqrt.f32 %v198_v49 }
 0x211   :  { %v269_v50 = vpop.eup %268 }
 0x212   :  { %v203_v51 = vmul.f32 %v269_v50, %v175_v26 }
 0x214   :  { %v207_v52 = vmax.f32 %v203_v51, 0.0 }
 0x215   :  { %v271_v53 = vpop.eup %270 }
 0x216   :  { %v273_v54 = vpop.eup %272  ;;  %211 = vst [vmem:[%s345_s2] sm:$0xff] %v207_v52  ;;  %v204_v55 = vmul.f32 %v271_v53, %v176_v33 }
 0x217   :  { %v205_v56 = vmul.f32 %v273_v54, %v177_v29 }
 0x218   :  { %v208_v57 = vmax.f32 %v204_v55, 0.0 }
 0x219   :  { %v275_v58 = vpop.eup %274  ;;  %v209_v59 = vmax.f32 %v205_v56, 0.0 }
 0x21a   :  { %212 = vst [vmem:[%s345_s2 + $0x8] sm:$0xff] %v208_v57  ;;  %v206_v60 = vmul.f32 %v275_v58, %v178_v34 }
 0x21b   :  { %213 = vst [vmem:[%s345_s2 + $0x10] sm:$0xff] %v209_v59 }
 0x21c   :  { %v210_v61 = vmax.f32 %v206_v60, 0.0 }
 0x21e   :  { %214 = vst [vmem:[%s345_s2 + $0x18] sm:$0xff] %v210_v61 }

// kernel: convnet_forward.10
= control target key start
LH: loop header
LB: loop body
LE: loop exit
PB: predicated region body
PF: predicated region fallthrough
CT: control target
= control target key end

     0   :  { %v707_v1 = vmov 0.0   ;;  %vm708_vm0 = vmmov 0   ;;  %vm246_vm1 = vcmask 261120   ;;  %vm422_vm2 = vcmask 1043456   ;;  %s916_s0 = inlined_call_operand.vmem [shape: bf16[288,128], index: 0, kind: input, shape index: {}]   ;;  %s917_s1 = inlined_call_operand.vmem [shape: bf16[68,288], index: 1, kind: input, shape index: {}]   ;;  %s918_s2 = inlined_call_operand.vmem [shape: f32[64,128], index: 2, kind: output, shape index: {0}]   ;;  %s919_s3 = inlined_call_operand.vmem [shape: f32[4,128], index: 3, kind: output, shape index: {1}]  }
   0x1   :  { %v648_v0 = vld [vmem:[%s916_s0 + $0x78] sm:$0xff]   ;;  %622 = vmatprep.subr.bf16.mxu1 %v707_v1  ;;  %626 = vmatprep.mubr.msk.bf16.mxu1 %vm708_vm0, %v707_v1  ;;  %v650_v3 = vld [vmem:[%s916_s0 + $0x70] sm:$0xff]   ;;  %v652_v5 = vld [vmem:[%s916_s0 + $0x68] sm:$0xff]  }
   0x2   :  { %v649_v2 = vld [vmem:[%s916_s0 + $0x38] sm:$0xff]   ;;  %569 = vmatprep.subr.bf16.mxu0 %v648_v0  ;;  %v651_v4 = vld [vmem:[%s916_s0 + $0x30] sm:$0xff]   ;;  %v653_v6 = vld [vmem:[%s916_s0 + $0x28] sm:$0xff]  }
   0x3   :  { %570 = vmatpush3.bf16.msra.mxu0 %v649_v2  ;;  %v654_v7 = vld [vmem:[%s916_s0 + $0x60] sm:$0xff]   ;;  %v656_v9 = vld [vmem:[%s916_s0 + $0x58] sm:$0xff]   ;;  %v660_v10 = vld [vmem:[%s916_s0 + $0x88] sm:$0xff]  }
   0x4   :  { %571 = vmatprep.subr.bf16.mxu0 %v650_v3  ;;  %v655_v8 = vld [vmem:[%s916_s0 + $0x20] sm:$0xff]   ;;  %v657_v11 = vld [vmem:[%s916_s0 + $0x18] sm:$0xff]   ;;  %623 = vmatpush3.bf16.msra.mxu1 %v660_v10  ;;  %v658_v13 = vld [vmem:[%s916_s0 + $0x50] sm:$0xff]  }
   0x5   :  { %624 = vmatprep.subr.bf16.mxu1 %v707_v1  ;;  %v663_v12 = vld [vmem:[%s916_s0 + $0x80] sm:$0xff]   ;;  %v659_v14 = vld [vmem:[%s916_s0 + $0x10] sm:$0xff]   ;;  %v661_v16 = vld [vmem:[%s916_s0 + $0x48] sm:$0xff]  }
   0x6   :  { %v666_v15 = vld [vmem:[%s917_s1 + $0x8] ss:$12 sps:$4 sm:$0xff]   ;;  %v669_v17 = vld [vmem:[%s917_s1 + $0x4] ss:$12 sps:$4 sm:$0xff]   ;;  %v670_v20 = vld [vmem:[%s917_s1 + $0x20] ss:$12 sps:$4 sm:$0xff]  }
   0x7   :  { %572 = vmatpush3.bf16.msra.mxu0 %v651_v4  ;;  %294 = vmatprep.mubr.bf16.mxu0 %v669_v17  ;;  %v662_v18 = vld [vmem:[%s916_s0 + $0x8] sm:$0xff]   ;;  %v664_v19 = vld [vmem:[%s916_s0 + $0x40] sm:$0xff]   ;;  %v678_v27 = vld [vmem:[%s917_s1 + $0x50] ss:$12 sps:$4 sm:$0xff]  }
   0x8   :  { %573 = vmatprep.subr.bf16.mxu0 %v652_v5  ;;  %625 = vmatpush3.bf16.msra.mxu1 %v663_v12  ;;  %v665_v21 = vld [vmem:[%s916_s0] sm:$0xff]   ;;  %v671_v23 = vld [vmem:[%s917_s1 + $0x1c] ss:$12 sps:$4 sm:$0xff]   ;;  %v679_v29 = vld [vmem:[%s917_s1 + $0x4c] ss:$12 sps:$4 sm:$0xff]  }
   0x9   :  { %v667_v22 = vld [vmem:[%s917_s1] ss:$12 sps:$4 sm:$0xff]   ;;  %v674_v24 = vld [vmem:[%s917_s1 + $0x38] ss:$12 sps:$4 sm:$0xff]   ;;  %v677_v28 = vld [vmem:[%s917_s1 + $0x30] ss:$12 sps:$4 sm:$0xff]  }
   0xa   :  { %v673_v25 = vld [vmem:[%s917_s1 + $0x18] ss:$12 sps:$4 sm:$0xff]   ;;  %v675_v26 = vld [vmem:[%s917_s1 + $0x34] ss:$12 sps:$4 sm:$0xff]  }
   0xb   :  { %574 = vmatpush3.bf16.msra.mxu0 %v653_v6  ;;  %627 = vmatmul.mubr.msk.bf16.vlgmr.msra.gmra.mxu1 %vm246_vm1, %v666_v15  ;;  %v682_v30 = vld [vmem:[%s917_s1 + $0x68] ss:$0 sps:$4 sm:$0x33]   ;;  %v30_v31 = vld [vmem:[%s917_s1 + $0x60] sm:$0x33] }
   0xc   :  { %575 = vmatprep.subr.bf16.mxu0 %v654_v7  ;;  %630 = vmatprep.mubr.msk.bf16.mxu1 %vm708_vm0, %v707_v1  ;;  %v681_v32 = vld [vmem:[%s917_s1 + $0x48] ss:$12 sps:$4 sm:$0xff]   ;;  %v544_v33 = vcombine.high %v30_v31, %v30_v31  ;;  %v543_v34 = vcombine.low %v30_v31, %v30_v31 }
   0xf   :  { %576 = vmatpush3.bf16.msra.mxu0 %v655_v8 }
  0x10   :  { %577 = vmatprep.subr.bf16.mxu0 %v656_v9 }
  0x13   :  { %578 = vmatpush3.bf16.msra.mxu0 %v657_v11  ;;  %631 = vmatmul.mubr.msk.bf16.gmra.mxu1 %vm246_vm1, %v670_v20 }
  0x14   :  { %579 = vmatprep.subr.bf16.mxu0 %v658_v13  ;;  %634 = vmatprep.mubr.msk.bf16.mxu1 %vm708_vm0, %v707_v1 }
  0x17   :  { %580 = vmatpush3.bf16.msra.mxu0 %v659_v14 }
  0x18   :  { %581 = vmatprep.subr.bf16.mxu0 %v661_v16 }
  0x1b   :  { %582 = vmatpush3.bf16.msra.mxu0 %v662_v18  ;;  %635 = vmatmul.mubr.msk.bf16.gmra.mxu1 %vm246_vm1, %v674_v24 }
  0x1c   :  { %583 = vmatprep.subr.bf16.mxu0 %v664_v19  ;;  %638 = vmatprep.mubr.msk.bf16.mxu1 %vm708_vm0, %v707_v1 }
  0x1f   :  { %584 = vmatpush3.bf16.msra.mxu0 %v665_v21 }
  0x22   :  { %295 = vmatmul.mubr.bf16.vlgmr.msra.gmra.mxu0 %v667_v22 }
  0x23   :  { %302 = vmatprep.mubr.bf16.mxu0 %v671_v23  ;;  %639 = vmatmul.mubr.msk.bf16.gmra.mxu1 %vm246_vm1, %v678_v27 }
  0x24   :  { %642 = vmatprep.mubr.msk.bf16.mxu1 %vm708_vm0, %v707_v1 }
  0x2a   :  { %303 = vmatmul.mubr.bf16.gmra.mxu0 %v673_v25 }
  0x2b   :  { %310 = vmatprep.mubr.bf16.mxu0 %v675_v26  ;;  %643 = vmatmul.mubr.msk.bf16.gmra.mxu1 %vm246_vm1, %v682_v30 }
  0x32   :  { %311 = vmatmul.mubr.bf16.gmra.mxu0 %v677_v28 }
  0x33   :  { %318 = vmatprep.mubr.bf16.mxu0 %v679_v29 }
  0x3a   :  { %319 = vmatmul.mubr.bf16.gmra.mxu0 %v681_v32 }
  0x3b   :  { %326 = vmatprep.mubr.bf16.mxu0 %v544_v33 }
  0x42   :  { %327 = vmatmul.mubr.bf16.gmra.mxu0 %v543_v34 }
  0xcb   :  { %v368_v35 = vpop.f32.mrf.mxu1 }
  0xcd   :  { %v628_v36 = vpop.f32.mrf.mxu1 }
  0xcf   :  { %v371_v37 = vpop.f32.mrf.mxu1 }
  0xd1   :  { %v629_v38 = vpop.f32.mrf.mxu1 }
  0xd3   :  { %v376_v39 = vpop.f32.mrf.mxu1 }
  0xd5   :  { %v632_v40 = vpop.f32.mrf.mxu1 }
  0xd7   :  { %v379_v41 = vpop.f32.mrf.mxu1 }
  0xd9   :  { %v633_v43 = vpop.f32.mrf.mxu1 }
  0xdb   :  { %v384_v45 = vpop.f32.mrf.mxu1 }
  0xdd   :  { %v636_v47 = vpop.f32.mrf.mxu1 }
  0xdf   :  { %v387_v50 = vpop.f32.mrf.mxu1 }
  0xe1   :  { %v637_v53 = vpop.f32.mrf.mxu1 }
  0xe2   :  { %v585_v42 = vpop.f32.mrf.mxu0 }
  0xe3   :  { %v392_v56 = vpop.f32.mrf.mxu1 }
  0xe4   :  { %v586_v44 = vpop.f32.mrf.mxu0 }
  0xe5   :  { %v640_v59 = vpop.f32.mrf.mxu1  ;;  %v587_v20 = vadd.f32 %v586_v44, %v585_v42 }
  0xe6   :  { %v588_v46 = vpop.f32.mrf.mxu0 }
  0xe7   :  { %v395_v61 = vpop.f32.mrf.mxu1  ;;  %v369_v24 = vadd.f32 %v587_v20, %v368_v35 }
  0xe8   :  { %v589_v48 = vpop.f32.mrf.mxu0 }
  0xe9   :  { %v590_v49 = vadd.f32 %v589_v48, %v588_v46  ;;  %v641_v63 = vpop.f32.mrf.mxu1 }
  0xea   :  { %v591_v51 = vpop.f32.mrf.mxu0 }
  0xeb   :  { %v372_v52 = vadd.f32 %v590_v49, %v371_v37  ;;  %v400_v2 = vpop.f32.mrf.mxu1 }
  0xec   :  { %v592_v54 = vpop.f32.mrf.mxu0 }
  0xed   :  { %v593_v55 = vadd.f32 %v592_v54, %v591_v51  ;;  %408 = vadd.xlane.f32.xlu1 %v372_v52  ;;  %v644_v5 = vpop.f32.mrf.mxu1 }
  0xee   :  { %v594_v57 = vpop.f32.mrf.mxu0 }
  0xef   :  { %v377_v58 = vadd.f32 %v593_v55, %v376_v39  ;;  %v403_v7 = vpop.f32.mrf.mxu1 }
  0xf0   :  { %v595_v60 = vpop.f32.mrf.mxu0 }
  0xf1   :  { %410 = vadd.xlane.f32.xlu1 %v377_v58  ;;  %v645_v9 = vpop.f32.mrf.mxu1  ;;  %v596_v23 = vadd.f32 %v595_v60, %v594_v57 }
  0xf2   :  { %v597_v62 = vpop.f32.mrf.mxu0 }
  0xf3   :  { %v380_v26 = vadd.f32 %v596_v23, %v379_v41 }
  0xf4   :  { %v598_v0 = vpop.f32.mrf.mxu0 }
  0xf5   :  { %v599_v1 = vadd.f32 %v598_v0, %v597_v62 }
  0xf6   :  { %v600_v3 = vpop.f32.mrf.mxu0 }
  0xf7   :  { %v385_v4 = vadd.f32 %v599_v1, %v384_v45 }
  0xf8   :  { %v601_v6 = vpop.f32.mrf.mxu0 }
  0xf9   :  { %414 = vadd.xlane.f32.xlu1 %v385_v4  ;;  %v602_v25 = vadd.f32 %v601_v6, %v600_v3 }
  0xfa   :  { %v603_v8 = vpop.f32.mrf.mxu0 }
  0xfb   :  { %v388_v28 = vadd.f32 %v602_v25, %v387_v50 }
  0xfc   :  { %v604_v10 = vpop.f32.mrf.mxu0 }
  0xfd   :  { %v605_v11 = vadd.f32 %v604_v10, %v603_v8 }
  0xfe   :  { %v606_v12 = vpop.f32.mrf.mxu0 }
  0xff   :  { %v393_v13 = vadd.f32 %v605_v11, %v392_v56 }
 0x100   :  { %v607_v14 = vpop.f32.mrf.mxu0 }
 0x101   :  { %418 = vadd.xlane.f32.xlu1 %v393_v13  ;;  %v608_v27 = vadd.f32 %v607_v14, %v606_v12 }
 0x102   :  { %v609_v15 = vpop.f32.mrf.mxu0 }
 0x103   :  { %v396_v29 = vadd.f32 %v608_v27, %v395_v61 }
 0x104   :  { %v610_v16 = vpop.f32.mrf.mxu0 }
 0x105   :  { %v611_v17 = vadd.f32 %v610_v16, %v609_v15 }
 0x106   :  { %v612_v18 = vpop.f32.mrf.mxu0 }
 0x107   :  { %v401_v19 = vadd.f32 %v611_v17, %v400_v2 }
 0x108   :  { %v613_v21 = vpop.f32.mrf.mxu0 }
 0x109   :  { %v423_v22 = vsel %vm422_vm2, %v401_v19, 0.0 }
 0x10a   :  { %424 = vadd.xlane.f32.xlu0 %v423_v22 }
 0x10e   :  { %406 = vadd.xlane.f32.xlu0 %v369_v24 }
 0x112   :  { %412 = vadd.xlane.f32.xlu0 %v380_v26 }
 0x116   :  { %416 = vadd.xlane.f32.xlu0 %v388_v28 }
 0x11a   :  { %420 = vadd.xlane.f32.xlu0 %v396_v29 }
 0x176   :  { %v409_v30 = vpop.xlane.xlu1 %408 }
 0x177   :  { %v428_v34 = vmul.f32 0.0078125, %v409_v30 }
 0x179   :  { %v847_v40 = vsub.f32 %v372_v52, %v428_v34 }
 0x17a   :  { %v411_v32 = vpop.xlane.xlu1 %410 }
 0x17b   :  { %v429_v37 = vmul.f32 0.0078125, %v411_v32  ;;  %v446_v50 = vmul.f32 %v847_v40, %v847_v40 }
 0x17d   :  { %v852_v44 = vsub.f32 %v377_v58, %v429_v37 }
 0x17f   :  { %v447_v53 = vmul.f32 %v852_v44, %v852_v44 }
 0x182   :  { %v415_v41 = vpop.xlane.xlu1 %414 }
 0x183   :  { %v431_v46 = vmul.f32 0.0078125, %v415_v41 }
 0x185   :  { %v862_v54 = vsub.f32 %v385_v4, %v431_v46 }
 0x187   :  { %v449_v62 = vmul.f32 %v862_v54, %v862_v54 }
 0x18a   :  { %v419_v49 = vpop.xlane.xlu1 %418 }
 0x18b   :  { %v433_v55 = vmul.f32 0.0078125, %v419_v49 }
 0x18d   :  { %v868_v60 = vsub.f32 %v393_v13, %v433_v55 }
 0x18f   :  { %v451_v1 = vmul.f32 %v868_v60, %v868_v60 }
 0x193   :  { %v425_v31 = vpop.xlane.xlu0 %424 }
 0x194   :  { %v435_v33 = vmul.f32 0.0078125, %v425_v31 }
 0x196   :  { %v843_v36 = vsub.f32 %v401_v19, %v435_v33 }
 0x197   :  { %v407_v38 = vpop.xlane.xlu0 %406 }
 0x198   :  { %v427_v39 = vmul.f32 0.0078125, %v407_v38  ;;  %v453_v35 = vmul.f32 %v843_v36, %v843_v36 }
 0x19a   :  { %v849_v42 = vsub.f32 %v369_v24, %v427_v39  ;;  %v470_v43 = vsel %vm422_vm2, %v453_v35, 0.0 }
 0x19b   :  { %471 = vadd.xlane.f32.xlu1 %v470_v43  ;;  %v413_v45 = vpop.xlane.xlu0 %412 }
 0x19c   :  { %v430_v47 = vmul.f32 0.0078125, %v413_v45  ;;  %v445_v48 = vmul.f32 %v849_v42, %v849_v42 }
 0x19e   :  { %v858_v51 = vsub.f32 %v380_v26, %v430_v47  ;;  %454 = vadd.xlane.f32.xlu0 %v445_v48 }
 0x19f   :  { %456 = vadd.xlane.f32.xlu1 %v446_v50  ;;  %v417_v52 = vpop.xlane.xlu0 %416 }
 0x1a0   :  { %v432_v56 = vmul.f32 0.0078125, %v417_v52  ;;  %v448_v57 = vmul.f32 %v858_v51, %v858_v51 }
 0x1a2   :  { %v866_v58 = vsub.f32 %v388_v28, %v432_v56  ;;  %458 = vadd.xlane.f32.xlu0 %v447_v53 }
 0x1a3   :  { %460 = vadd.xlane.f32.xlu1 %v448_v57  ;;  %v421_v59 = vpop.xlane.xlu0 %420 }
 0x1a4   :  { %v434_v61 = vmul.f32 0.0078125, %v421_v59  ;;  %v450_v63 = vmul.f32 %v866_v58, %v866_v58 }
 0x1a6   :  { %v874_v0 = vsub.f32 %v396_v29, %v434_v61  ;;  %462 = vadd.xlane.f32.xlu0 %v449_v62 }
 0x1a7   :  { %464 = vadd.xlane.f32.xlu1 %v450_v63 }
 0x1a8   :  { %v452_v2 = vmul.f32 %v874_v0, %v874_v0 }
 0x1aa   :  { %466 = vadd.xlane.f32.xlu0 %v451_v1 }
 0x1ab   :  { %468 = vadd.xlane.f32.xlu1 %v452_v2 }
 0x224   :  { %v472_v3 = vpop.xlane.xlu1 %471 }
 0x225   :  { %v481_v4 = vmul.f32 0.0078125, %v472_v3 }
 0x227   :  { %v490_v5 = vadd.f32 1e-05, %v481_v4  ;;  %v455_v6 = vpop.xlane.xlu0 %454 }
 0x228   :  { %v473_v7 = vmul.f32 0.0078125, %v455_v6  ;;  %v457_v8 = vpop.xlane.xlu1 %456 }
 0x229   :  { %685 = vrsqrt.f32 %v490_v5  ;;  %v474_v9 = vmul.f32 0.0078125, %v457_v8 }
 0x22a   :  { %v482_v10 = vadd.f32 1e-05, %v473_v7 }
 0x22b   :  { %v483_v11 = vadd.f32 1e-05, %v474_v9  ;;  %v459_v12 = vpop.xlane.xlu0 %458 }
 0x22c   :  { %687 = vrsqrt.f32 %v482_v10  ;;  %v475_v13 = vmul.f32 0.0078125, %v459_v12  ;;  %v461_v14 = vpop.xlane.xlu1 %460 }
 0x22d   :  { %689 = vrsqrt.f32 %v483_v11  ;;  %v476_v15 = vmul.f32 0.0078125, %v461_v14 }
 0x22e   :  { %v484_v16 = vadd.f32 1e-05, %v475_v13 }
 0x22f   :  { %v485_v17 = vadd.f32 1e-05, %v476_v15  ;;  %v463_v18 = vpop.xlane.xlu0 %462 }
 0x230   :  { %691 = vrsqrt.f32 %v484_v16  ;;  %v477_v19 = vmul.f32 0.0078125, %v463_v18  ;;  %v465_v20 = vpop.xlane.xlu1 %464 }
 0x231   :  { %693 = vrsqrt.f32 %v485_v17  ;;  %v478_v21 = vmul.f32 0.0078125, %v465_v20 }
 0x232   :  { %v486_v22 = vadd.f32 1e-05, %v477_v19 }
 0x233   :  { %v487_v23 = vadd.f32 1e-05, %v478_v21  ;;  %v467_v24 = vpop.xlane.xlu0 %466 }
 0x234   :  { %695 = vrsqrt.f32 %v486_v22  ;;  %v479_v25 = vmul.f32 0.0078125, %v467_v24  ;;  %v469_v26 = vpop.xlane.xlu1 %468 }
 0x235   :  { %697 = vrsqrt.f32 %v487_v23  ;;  %v480_v27 = vmul.f32 0.0078125, %v469_v26 }
 0x236   :  { %v686_v28 = vpop.eup %685  ;;  %v488_v29 = vadd.f32 1e-05, %v479_v25 }
 0x237   :  { %v508_v30 = vmul.f32 %v686_v28, %v843_v36  ;;  %v489_v31 = vadd.f32 1e-05, %v480_v27 }
 0x238   :  { %699 = vrsqrt.f32 %v488_v29 }
 0x239   :  { %v688_v32 = vpop.eup %687  ;;  %v517_v33 = vsub.f32 0.0, %v508_v30  ;;  %701 = vrsqrt.f32 %v489_v31 }
 0x23a   :  { %v690_v34 = vpop.eup %689  ;;  %v500_v37 = vmul.f32 %v688_v32, %v849_v42 }
 0x23b   :  { %v518_v38 = vmul.f32 1.442695, %v517_v33  ;;  %v501_v39 = vmul.f32 %v690_v34, %v847_v40 }
 0x23c   :  { %509 = vst [vmem:[%s918_s2] sm:$0xff] %v500_v37 }
 0x23d   :  { %v692_v35 = vpop.eup %691  ;;  %703 = vpow2.f32 %v518_v38  ;;  %510 = vst [vmem:[%s918_s2 + $0x8] sm:$0xff] %v501_v39 }
 0x23e   :  { %v694_v36 = vpop.eup %693  ;;  %v502_v41 = vmul.f32 %v692_v35, %v852_v44 }
 0x23f   :  { %v503_v43 = vmul.f32 %v694_v36, %v858_v51 }
 0x240   :  { %511 = vst [vmem:[%s918_s2 + $0x10] sm:$0xff] %v502_v41 }
 0x241   :  { %v696_v40 = vpop.eup %695  ;;  %512 = vst [vmem:[%s918_s2 + $0x18] sm:$0xff] %v503_v43 }
 0x242   :  { %v698_v42 = vpop.eup %697  ;;  %v504_v45 = vmul.f32 %v696_v40, %v862_v54 }
 0x243   :  { %v505_v46 = vmul.f32 %v698_v42, %v866_v58 }
 0x244   :  { %513 = vst [vmem:[%s918_s2 + $0x20] sm:$0xff] %v504_v45 }
 0x245   :  { %v700_v44 = vpop.eup %699  ;;  %514 = vst [vmem:[%s918_s2 + $0x28] sm:$0xff] %v505_v46 }
 0x246   :  { %v702_v47 = vpop.eup %701  ;;  %v506_v48 = vmul.f32 %v700_v44, %v868_v60 }
 0x247   :  { %v507_v49 = vmul.f32 %v702_v47, %v874_v0 }
 0x248   :  { %515 = vst [vmem:[%s918_s2 + $0x30] sm:$0xff] %v506_v48 }
 0x249   :  { %516 = vst [vmem:[%s918_s2 + $0x38] sm:$0xff] %v507_v49 }
 0x24a   :  { %v704_v50 = vpop.eup %703 }
 0x24b   :  { %v520_v51 = vadd.f32 1.0, %v704_v50 }
 0x24d   :  { %705 = vrcp.f32 %v520_v51 }
 0x25a   :  { %v706_v52 = vpop.eup %705 }
 0x25b   :  { %522 = vst [vmem:[%s919_s3] sm:$0xf] %v706_v52 }

// kernel: convnet_forward.11
= control target key start
LH: loop header
LB: loop body
LE: loop exit
PB: predicated region body
PF: predicated region fallthrough
CT: control target
= control target key end

     0   :  { %v3112_v3 = vmov 0   ;;  %v3113_v40 = vmov 0.0   ;;  %vm3114_vm0 = vmmov 0   ;;  %vm888_vm1 = vcmask 1041409   ;;  %s4392_s0 = inlined_call_operand.vmem [shape: bf16[640,128], index: 0, kind: input, shape index: {}]   ;;  %s4393_s2 = inlined_call_operand.vmem [shape: bf16[80,640], index: 2, kind: input, shape index: {}]   ;;  %s4394_s3 = inlined_call_operand.vmem [shape: f32[80,1], index: 3, kind: input, shape index: {}]   ;;  %s4395_s1 = inlined_call_operand.vmem [shape: f32[40,128], index: 1, kind: input, shape index: {}]   ;;  %s4396_s4 = inlined_call_operand.vmem [shape: bf16[32,1280], index: 4, kind: input, shape index: {}]   ;;  %s4397_s5 = inlined_call_operand.vmem [shape: f32[2,128], index: 5, kind: output, shape index: {0}]   ;;  %s4398_s6 = inlined_call_operand.vmem [shape: f32[32,128], index: 6, kind: output, shape index: {1}]  }
   0x1   :  { %v3154_v0 = vld [vmem:[%s4392_s0 + $0x78] sm:$0xff]   ;;  %2916 = vset.pattern.permute.xlu0 %v3112_v3  ;;  %2917 = vset.pattern.permute.xlu1 %v3112_v3  ;;  %v3174_v5 = vld [vmem:[%s4392_s0 + $0x70] sm:$0xff]   ;;  %v3197_v9 = vld [vmem:[%s4392_s0 + $0x68] sm:$0xff]  }
   0x2   :  { %4490 = vst [vmem:[#allocation2_spill] sm:$0xff] %v3154_v0  ;;  %v3159_v1 = vld [vmem:[%s4392_s0 + $0x38] sm:$0xff]   ;;  %4493 = vst [vmem:[#allocation5_spill] sm:$0xff] %v3174_v5  ;;  %v3179_v6 = vld [vmem:[%s4392_s0 + $0x30] sm:$0xff]   ;;  %2631 = vmatprep.subr.bf16.mxu0 %v3154_v0 }
   0x3   :  { %v3164_v2 = vld [vmem:[%s4392_s0 + $0xf8] sm:$0xff]   ;;  %4494 = vst [vmem:[#allocation6_spill] sm:$0xff] %v3179_v6  ;;  %v3184_v7 = vld [vmem:[%s4392_s0 + $0xf0] sm:$0xff]   ;;  %2632 = vmatpush3.bf16.msra.mxu0 %v3159_v1  ;;  %4497 = vst [vmem:[#allocation9_spill] sm:$0xff] %v3197_v9 }
   0x4   :  { %4491 = vst [vmem:[#allocation3_spill] sm:$0xff] %v3164_v2  ;;  %v3169_v4 = vld [vmem:[%s4392_s0 + $0xb8] sm:$0xff]   ;;  %4495 = vst [vmem:[#allocation7_spill] sm:$0xff] %v3184_v7  ;;  %v3190_v8 = vld [vmem:[%s4392_s0 + $0xb0] sm:$0xff]   ;;  %2677 = vmatprep.subr.bf16.mxu1 %v3164_v2  ;;  %2633 = vmatprep.subr.bf16.mxu0 %v3174_v5 }
   0x5   :  { %4492 = vst [vmem:[#allocation4_spill] sm:$0xff] %v3169_v4  ;;  %4496 = vst [vmem:[#allocation8_spill] sm:$0xff] %v3190_v8  ;;  %2678 = vmatpush3.bf16.msra.mxu1 %v3169_v4  ;;  %v3203_v10 = vld [vmem:[%s4392_s0 + $0x28] sm:$0xff]   ;;  %v3220_v13 = vld [vmem:[%s4392_s0 + $0x60] sm:$0xff]  }
   0x6   :  { %4498 = vst [vmem:[#allocation10_spill] sm:$0xff] %v3203_v10  ;;  %v3208_v11 = vld [vmem:[%s4392_s0 + $0xe8] sm:$0xff]   ;;  %2679 = vmatprep.subr.bf16.mxu1 %v3184_v7  ;;  %4501 = vst [vmem:[#allocation13_spill] sm:$0xff] %v3220_v13  ;;  %v3226_v14 = vld [vmem:[%s4392_s0 + $0xe0] sm:$0xff]  }
   0x7   :  { %4499 = vst [vmem:[#allocation11_spill] sm:$0xff] %v3208_v11  ;;  %v3214_v12 = vld [vmem:[%s4392_s0 + $0xa8] sm:$0xff]   ;;  %2634 = vmatpush3.bf16.msra.mxu0 %v3179_v6  ;;  %4502 = vst [vmem:[#allocation14_spill] sm:$0xff] %v3226_v14  ;;  %v3233_v15 = vld [vmem:[%s4392_s0 + $0x20] sm:$0xff]  }
   0x8   :  { %4500 = vst [vmem:[#allocation12_spill] sm:$0xff] %v3214_v12  ;;  %2635 = vmatprep.subr.bf16.mxu0 %v3197_v9  ;;  %4503 = vst [vmem:[#allocation15_spill] sm:$0xff] %v3233_v15  ;;  %v3238_v16 = vld [vmem:[%s4392_s0 + $0xa0] sm:$0xff]   ;;  %v3244_v17 = vld [vmem:[%s4392_s0 + $0x58] sm:$0xff]  }
   0x9   :  { %2680 = vmatpush3.bf16.msra.mxu1 %v3190_v8  ;;  %4504 = vst [vmem:[#allocation16_spill] sm:$0xff] %v3238_v16  ;;  %4505 = vst [vmem:[#allocation17_spill] sm:$0xff] %v3244_v17  ;;  %v3249_v18 = vld [vmem:[%s4392_s0 + $0xd8] sm:$0xff]   ;;  %v2955_v21 = vld [vmem:[%s4393_s2 + $0xc] ss:$20 sps:$4 sm:$0xff]  }
   0xa   :  { %2681 = vmatprep.subr.bf16.mxu1 %v3208_v11  ;;  %4506 = vst [vmem:[#allocation18_spill] sm:$0xff] %v3249_v18  ;;  %v2951_v19 = vld [vmem:[%s4393_s2 + $0x4] ss:$20 sps:$4 sm:$0xff]   ;;  %v3274_v23 = vld [vmem:[%s4392_s0 + $0x50] sm:$0xff]   ;;  %673 = vmatprep.mubr.bf16.mxu1 %v2955_v21  ;;  %v3298_v27 = vld [vmem:[%s4392_s0 + $0x48] sm:$0xff]  }
   0xb   :  { %2636 = vmatpush3.bf16.msra.mxu0 %v3203_v10  ;;  %v3258_v20 = vld [vmem:[%s4392_s0 + $0x18] sm:$0xff]   ;;  %4509 = vst [vmem:[#allocation21_spill] sm:$0xff] %v3274_v23  ;;  %600 = vmatprep.mubr.bf16.mxu0 %v2951_v19  ;;  %v3279_v24 = vld [vmem:[%s4392_s0 + $0xd0] sm:$0xff]   ;;  %4513 = vst [vmem:[#allocation25_spill] sm:$0xff] %v3298_v27 }
   0xc   :  { %4507 = vst [vmem:[#allocation19_spill] sm:$0xff] %v3258_v20  ;;  %2637 = vmatprep.subr.bf16.mxu0 %v3220_v13  ;;  %v3269_v22 = vld [vmem:[%s4392_s0 + $0x98] sm:$0xff]   ;;  %4510 = vst [vmem:[#allocation22_spill] sm:$0xff] %v3279_v24  ;;  %v3287_v25 = vld [vmem:[%s4392_s0 + $0x10] sm:$0xff]  }
   0xd   :  { %2682 = vmatpush3.bf16.msra.mxu1 %v3214_v12  ;;  %4508 = vst [vmem:[#allocation20_spill] sm:$0xff] %v3269_v22  ;;  %4511 = vst [vmem:[#allocation23_spill] sm:$0xff] %v3287_v25  ;;  %v3292_v26 = vld [vmem:[%s4392_s0 + $0x90] sm:$0xff]   ;;  %v73_v28 = vld [vmem:[%s4392_s0 + $0xc8] sm:$0xff]  }
   0xe   :  { %2683 = vmatprep.subr.bf16.mxu1 %v3226_v14  ;;  %4512 = vst [vmem:[#allocation24_spill] sm:$0xff] %v3292_v26  ;;  %v3309_v29 = vld [vmem:[%s4392_s0 + $0x8] sm:$0xff]   ;;  %v3318_v31 = vld [vmem:[%s4392_s0 + $0x40] sm:$0xff]   ;;  %v3339_v35 = vld [vmem:[%s4392_s0 + $0x138] sm:$0xff]  }
   0xf   :  { %2638 = vmatpush3.bf16.msra.mxu0 %v3233_v15  ;;  %4514 = vst [vmem:[#allocation26_spill] sm:$0xff] %v3309_v29  ;;  %v57_v30 = vld [vmem:[%s4392_s0 + $0x88] sm:$0xff]   ;;  %4515 = vst [vmem:[#allocation27_spill] sm:$0xff] %v3318_v31  ;;  %v71_v32 = vld [vmem:[%s4392_s0 + $0xc0] sm:$0xff]  }
  0x10   :  { %2639 = vmatprep.subr.bf16.mxu0 %v3244_v17  ;;  %v3329_v33 = vld [vmem:[%s4392_s0] sm:$0xff]   ;;  %4517 = vst [vmem:[#allocation29_spill] sm:$0xff] %v3339_v35  ;;  %v2953_v38 = vld [vmem:[%s4393_s2 + $0x8] ss:$20 sps:$4 sm:$0xff]   ;;  %v3364_v43 = vld [vmem:[%s4392_s0 + $0x130] sm:$0xff]  }
  0x11   :  { %2684 = vmatpush3.bf16.msra.mxu1 %v3238_v16  ;;  %4516 = vst [vmem:[#allocation28_spill] sm:$0xff] %v3329_v33  ;;  %v55_v34 = vld [vmem:[%s4392_s0 + $0x80] sm:$0xff]   ;;  %v2960_v41 = vld [vmem:[%s4393_s2 + $0x34] ss:$20 sps:$4 sm:$0xff]   ;;  %4518 = vst [vmem:[#allocation30_spill] sm:$0xff] %v3364_v43 }
  0x12   :  { %2685 = vmatprep.subr.bf16.mxu1 %v3249_v18  ;;  %v2949_v36 = vld [vmem:[%s4393_s2] ss:$20 sps:$4 sm:$0xff]   ;;  %v143_v42 = vld [vmem:[%s4394_s3 + $0x28] sm:$0xff]  ;;  %v2962_v49 = vld [vmem:[%s4393_s2 + $0x30] ss:$20 sps:$4 sm:$0xff]  }
  0x13   :  { %2640 = vmatpush3.bf16.msra.mxu0 %v3258_v20  ;;  %v138_v37 = vld [vmem:[%s4394_s3] sm:$0xff]  ;;  %175 = vperm.xlu1 %2917, %v143_v42   ;;  %v139_v44 = vld [vmem:[%s4394_s3 + $0x8] sm:$0xff]  ;;  %v144_v45 = vld [vmem:[%s4394_s3 + $0x30] sm:$0xff] }
  0x14   :  { %2641 = vmatprep.subr.bf16.mxu0 %v3274_v23  ;;  %v2956_v39 = vld [vmem:[%s4393_s2 + $0x2c] ss:$20 sps:$4 sm:$0xff]   ;;  %150 = vperm.xlu0 %2916, %v138_v37   ;;  %v2958_v47 = vld [vmem:[%s4393_s2 + $0x28] ss:$20 sps:$4 sm:$0xff]   ;;  %v140_v48 = vld [vmem:[%s4394_s3 + $0x10] sm:$0xff] }
  0x15   :  { %2686 = vmatpush3.bf16.msra.mxu1 %v3269_v22  ;;  %v3377_v46 = vld [vmem:[%s4392_s0 + $0x128] sm:$0xff]   ;;  %v145_v51 = vld [vmem:[%s4394_s3 + $0x38] sm:$0xff]  ;;  %v3402_v53 = vld [vmem:[%s4392_s0 + $0x120] sm:$0xff]  }
  0x16   :  { %2687 = vmatprep.subr.bf16.mxu1 %v3279_v24  ;;  %4519 = vst [vmem:[#allocation31_spill] sm:$0xff] %v3377_v46  ;;  %v2964_v50 = vld [vmem:[%s4393_s2 + $0x54] ss:$20 sps:$4 sm:$0xff]   ;;  %v2967_v52 = vld [vmem:[%s4393_s2 + $0x5c] ss:$20 sps:$4 sm:$0xff]   ;;  %4520 = vst [vmem:[#allocation32_spill] sm:$0xff] %v3402_v53 }
  0x17   :  { %2642 = vmatpush3.bf16.msra.mxu0 %v3287_v25  ;;  %180 = vperm.xlu1 %2917, %v144_v45   ;;  %v141_v54 = vld [vmem:[%s4394_s3 + $0x18] sm:$0xff]  ;;  %v146_v55 = vld [vmem:[%s4394_s3 + $0x40] sm:$0xff]  ;;  %v147_v61 = vld [vmem:[%s4394_s3 + $0x48] sm:$0xff] }
  0x18   :  { %2643 = vmatprep.subr.bf16.mxu0 %v3298_v27  ;;  %155 = vperm.xlu0 %2916, %v139_v44   ;;  %v3415_v56 = vld [vmem:[%s4392_s0 + $0x118] sm:$0xff]   ;;  %v2966_v57 = vld [vmem:[%s4393_s2 + $0x50] ss:$20 sps:$4 sm:$0xff]   ;;  %v3447_v3 = vld [vmem:[%s4392_s0 + $0x108] sm:$0xff]  }
  0x19   :  { %2688 = vmatpush3.bf16.msra.mxu1 %v3292_v26  ;;  %4521 = vst [vmem:[#allocation33_spill] sm:$0xff] %v3415_v56  ;;  %v142_v58 = vld [vmem:[%s4394_s3 + $0x20] sm:$0xff]  ;;  %v2970_v59 = vld [vmem:[%s4393_s2 + $0x58] ss:$20 sps:$4 sm:$0xff]   ;;  %v2972_v60 = vld [vmem:[%s4393_s2 + $0x7c] ss:$20 sps:$4 sm:$0xff]  }
  0x1a   :  { %2689 = vmatprep.subr.bf16.mxu1 %v73_v28  ;;  %v2975_v62 = vld [vmem:[%s4393_s2 + $0x84] ss:$20 sps:$4 sm:$0xff]   ;;  %v3440_v63 = vld [vmem:[%s4392_s0 + $0x110] sm:$0xff]   ;;  %4523 = vst [vmem:[#allocation35_spill] sm:$0xff] %v3447_v3 }
  0x1b   :  { %2644 = vmatpush3.bf16.msra.mxu0 %v3309_v29  ;;  %185 = vperm.xlu1 %2917, %v145_v51   ;;  %4522 = vst [vmem:[#allocation34_spill] sm:$0xff] %v3440_v63  ;;  %v2974_v19 = vld [vmem:[%s4393_s2 + $0x78] ss:$20 sps:$4 sm:$0xff]   ;;  %v2978_v21 = vld [vmem:[%s4393_s2 + $0x80] ss:$20 sps:$4 sm:$0xff]  }
  0x1c   :  { %2645 = vmatprep.subr.bf16.mxu0 %v3318_v31  ;;  %160 = vperm.xlu0 %2916, %v140_v48   ;;  %v2980_v28 = vld [vmem:[%s4393_s2 + $0xa4] ss:$20 sps:$4 sm:$0xff]  }
  0x1d   :  { %2690 = vmatpush3.bf16.msra.mxu1 %v57_v30  ;;  %v2983_v30 = vld [vmem:[%s4393_s2 + $0xac] ss:$20 sps:$4 sm:$0xff]   ;;  %v2988_v37 = vld [vmem:[%s4393_s2 + $0x10] ss:$20 sps:$4 sm:$0xff]  }
  0x1e   :  { %2691 = vmatprep.subr.bf16.mxu1 %v71_v32  ;;  %v3466_v32 = vld [vmem:[%s4392_s0 + $0x100] sm:$0xff]  }
  0x1f   :  { %2646 = vmatpush3.bf16.msra.mxu0 %v3329_v33  ;;  %190 = vperm.xlu1 %2917, %v146_v55   ;;  %4524 = vst [vmem:[#allocation36_spill] sm:$0xff] %v3466_v32  ;;  %v2992_v42 = vld [vmem:[%s4393_s2 + $0xb0] ss:$20 sps:$4 sm:$0xff]  }
  0x20   :  { %2876 = vmatprep.subr.bf16.mxu0 %v3113_v40  ;;  %165 = vperm.xlu0 %2916, %v141_v54  }
  0x21   :  { %2692 = vmatpush3.bf16.msra.mxu1 %v55_v34  ;;  %v2982_v34 = vld [vmem:[%s4393_s2 + $0xa0] ss:$20 sps:$4 sm:$0xff]  }
  0x22   :  { %601 = vmatmul.mubr.bf16.vlgmr.msra.gmra.mxu0 %v2949_v36  ;;  %v2986_v36 = vld [vmem:[%s4393_s2 + $0xa8] ss:$20 sps:$4 sm:$0xff]  }
  0x23   :  { %608 = vmatprep.mubr.bf16.mxu0 %v2956_v39  ;;  %2877 = vmatpush3.bf16.msra.mxu0 %v3339_v35  ;;  %v2990_v39 = vld [vmem:[%s4393_s2 + $0x60] ss:$20 sps:$4 sm:$0xff]  }
  0x24   :  { %674 = vmatmul.mubr.bf16.vlgmr.msra.gmra.mxu1 %v2953_v38  ;;  %2878 = vmatprep.subr.bf16.mxu0 %v3113_v40  ;;  %v2989_v38 = vld [vmem:[%s4393_s2 + $0x38] ss:$20 sps:$4 sm:$0xff]  }
  0x25   :  { %681 = vmatprep.mubr.bf16.mxu1 %v2960_v41  ;;  %170 = vperm.xlu0 %2916, %v142_v58   ;;  %v2991_v41 = vld [vmem:[%s4393_s2 + $0x88] ss:$20 sps:$4 sm:$0xff]  }
  0x26   :  { %195 = vperm.xlu1 %2917, %v147_v61  }
  0x27   :  { %2879 = vmatpush3.bf16.msra.mxu0 %v3364_v43 }
  0x28   :  { %2880 = vmatprep.subr.bf16.mxu0 %v3113_v40 }
  0x2a   :  { %609 = vmatmul.mubr.bf16.gmra.mxu0 %v2958_v47 }
  0x2b   :  { %616 = vmatprep.mubr.bf16.mxu0 %v2964_v50  ;;  %2881 = vmatpush3.bf16.msra.mxu0 %v3377_v46 }
  0x2c   :  { %682 = vmatmul.mubr.bf16.gmra.mxu1 %v2962_v49  ;;  %2882 = vmatprep.subr.bf16.mxu0 %v3113_v40 }
  0x2d   :  { %689 = vmatprep.mubr.bf16.mxu1 %v2967_v52 }
  0x2f   :  { %2883 = vmatpush3.bf16.msra.mxu0 %v3402_v53 }
  0x30   :  { %2884 = vmatprep.subr.bf16.mxu0 %v3113_v40 }
  0x32   :  { %617 = vmatmul.mubr.bf16.gmra.mxu0 %v2966_v57 }
  0x33   :  { %624 = vmatprep.mubr.bf16.mxu0 %v2972_v60  ;;  %2885 = vmatpush3.bf16.msra.mxu0 %v3415_v56 }
  0x34   :  { %690 = vmatmul.mubr.bf16.gmra.mxu1 %v2970_v59  ;;  %2886 = vmatprep.subr.bf16.mxu0 %v3113_v40 }
  0x35   :  { %697 = vmatprep.mubr.bf16.mxu1 %v2975_v62 }
  0x37   :  { %2887 = vmatpush3.bf16.msra.mxu0 %v3440_v63 }
  0x38   :  { %2888 = vmatprep.subr.bf16.mxu0 %v3113_v40 }
  0x3a   :  { %625 = vmatmul.mubr.bf16.gmra.mxu0 %v2974_v19 }
  0x3b   :  { %632 = vmatprep.mubr.bf16.mxu0 %v2980_v28  ;;  %2889 = vmatpush3.bf16.msra.mxu0 %v3447_v3 }
  0x3c   :  { %698 = vmatmul.mubr.bf16.gmra.mxu1 %v2978_v21  ;;  %2890 = vmatprep.subr.bf16.mxu0 %v3113_v40 }
  0x3d   :  { %705 = vmatprep.mubr.bf16.mxu1 %v2983_v30 }
  0x3f   :  { %2891 = vmatpush3.bf16.msra.mxu0 %v3466_v32 }
  0x42   :  { %633 = vmatmul.mubr.bf16.gmra.mxu0 %v2982_v34 }
  0x43   :  { %2892 = vmatprep.mubr.msk.bf16.mxu0 %vm3114_vm0, %v3113_v40 }
  0x44   :  { %706 = vmatmul.mubr.bf16.gmra.mxu1 %v2986_v36 }
  0x4a   :  { %2893 = vmatmul.mubr.bf16.vlgmr.msra.gmra.mxu0 %v2988_v37 }
  0x4b   :  { %2896 = vmatprep.mubr.msk.bf16.mxu0 %vm3114_vm0, %v3113_v40 }
  0x52   :  { %2897 = vmatmul.mubr.bf16.gmra.mxu0 %v2989_v38 }
  0x53   :  { %2900 = vmatprep.mubr.msk.bf16.mxu0 %vm3114_vm0, %v3113_v40 }
  0x5a   :  { %2901 = vmatmul.mubr.bf16.gmra.mxu0 %v2990_v39 }
  0x5b   :  { %2904 = vmatprep.mubr.msk.bf16.mxu0 %vm3114_vm0, %v3113_v40 }
  0x62   :  { %2905 = vmatmul.mubr.bf16.gmra.mxu0 %v2991_v41 }
  0x63   :  { %2908 = vmatprep.mubr.msk.bf16.mxu0 %vm3114_vm0, %v3113_v40 }
  0x6a   :  { %2909 = vmatmul.mubr.bf16.gmra.mxu0 %v2992_v42 }
  0x8e   :  { %v176_v35 = vpop.permute.xlu1 %175 }
  0x8f   :  { %v151_v46 = vpop.permute.xlu0 %150 }
  0x92   :  { %v181_v25 = vpop.permute.xlu1 %180 }
  0x93   :  { %v156_v26 = vpop.permute.xlu0 %155 }
  0x96   :  { %v186_v10 = vpop.permute.xlu1 %185 }
  0x97   :  { %v161_v15 = vpop.permute.xlu0 %160 }
  0xe2   :  { %v2647_v44 = vpop.f32.mrf.mxu0 }
  0xe4   :  { %v2693_v45 = vpop.f32.mrf.mxu1  ;;  %v2648_v47 = vpop.f32.mrf.mxu0 }
  0xe5   :  { %v2649_v48 = vadd.f32 %v2648_v47, %v2647_v44 }
  0xe6   :  { %v2694_v49 = vpop.f32.mrf.mxu1  ;;  %v2650_v50 = vpop.f32.mrf.mxu0 }
  0xe7   :  { %v603_v17 = vadd.f32 %v2649_v48, %v151_v46  ;;  %v2695_v16 = vadd.f32 %v2694_v49, %v2693_v45  ;;  %v166_v49 = vpop.permute.xlu0 %165 }
  0xe8   :  { %v2696_v51 = vpop.f32.mrf.mxu1  ;;  %v2651_v52 = vpop.f32.mrf.mxu0 }
  0xe9   :  { %v2652_v14 = vadd.f32 %v2651_v52, %v2650_v50 }
  0xea   :  { %v2697_v54 = vpop.f32.mrf.mxu1  ;;  %v2653_v55 = vpop.f32.mrf.mxu0 }
  0xeb   :  { %v606_v8 = vadd.f32 %v2652_v14, %v156_v26  ;;  %v2698_v7 = vadd.f32 %v2697_v54, %v2696_v51 }
  0xec   :  { %v3497_v57 = vpop.f32.mrf.mxu1  ;;  %v2654_v58 = vpop.f32.mrf.mxu0 }
  0xed   :  { %v2655_v6 = vadd.f32 %v2654_v58, %v2653_v55  ;;  %v679_v26 = vadd.f32 %v2698_v7, %v606_v8 }
  0xee   :  { %v3499_v59 = vpop.f32.mrf.mxu1  ;;  %v2656_v40 = vpop.f32.mrf.mxu0 }
  0xef   :  { %v611_v50 = vadd.f32 %v2655_v6, %v161_v15  ;;  %v2701_v52 = vadd.f32 %v3499_v59, %v3497_v57  ;;  %v171_v57 = vpop.permute.xlu0 %170 }
  0xf0   :  { %v2657_v60 = vpop.f32.mrf.mxu0  ;;  %v3501_v61 = vpop.f32.mrf.mxu1 }
  0xf1   :  { %v2658_v48 = vadd.f32 %v2657_v60, %v2656_v40 }
  0xf2   :  { %v3503_v62 = vpop.f32.mrf.mxu0  ;;  %v3507_v21 = vpop.f32.mrf.mxu1 }
  0xf4   :  { %v3505_v19 = vpop.f32.mrf.mxu0  ;;  %v3509_v34 = vpop.f32.mrf.mxu1 }
  0xf5   :  { %v2661_v15 = vadd.f32 %v3505_v19, %v3503_v62 }
  0xf6   :  { %v2662_v28 = vpop.f32.mrf.mxu0  ;;  %v3511_v38 = vpop.f32.mrf.mxu1 }
  0xf8   :  { %v2663_v30 = vpop.f32.mrf.mxu0  ;;  %v2708_v42 = vpop.f32.mrf.mxu1 }
  0xf9   :  { %v2664_v22 = vadd.f32 %v2663_v30, %v2662_v28 }
  0xfa   :  { %v2665_v36 = vpop.f32.mrf.mxu0  ;;  %v2709_v32 = vpop.f32.mrf.mxu1 }
  0xfb   :  { %v2710_v12 = vadd.f32 %v2709_v32, %v2708_v42 }
  0xfc   :  { %v2666_v37 = vpop.f32.mrf.mxu0  ;;  %v2711_v56 = vpop.f32.mrf.mxu1 }
  0xfd   :  { %v2667_v11 = vadd.f32 %v2666_v37, %v2665_v36 }
  0xfe   :  { %v2668_v39 = vpop.f32.mrf.mxu0  ;;  %v2712_v33 = vpop.f32.mrf.mxu1 }
  0xff   :  { %v627_v30 = vadd.f32 %v2667_v11, %v181_v25  ;;  %v2713_v5 = vadd.f32 %v2712_v33, %v2711_v56  ;;  %v614_v56 = vadd.f32 %v2658_v48, %v166_v49  ;;  %v3543_v48 = vld [vmem:[%s4395_s1 + $0x8] sm:$0xff] }
 0x100   :  { %v2669_v41 = vpop.f32.mrf.mxu0  ;;  %v2714_v27 = vpop.f32.mrf.mxu1 }
 0x101   :  { %v2670_v4 = vadd.f32 %v2669_v41, %v2668_v39  ;;  %v700_v33 = vadd.f32 %v2713_v5, %v627_v30  ;;  %v619_v41 = vadd.f32 %v2661_v15, %v171_v57  ;;  %v107_v57 = vld [vmem:[%s4395_s1 + $0x20] sm:$0xff] }
 0x102   :  { %v2671_v44 = vpop.f32.mrf.mxu0  ;;  %v2715_v18 = vpop.f32.mrf.mxu1 }
 0x104   :  { %v2672_v47 = vpop.f32.mrf.mxu0 }
 0x105   :  { %v2673_v14 = vadd.f32 %v2672_v47, %v2671_v44 }
 0x106   :  { %v3513_v3 = vpop.f32.mrf.mxu0 }
 0x108   :  { %v3515_v63 = vpop.f32.mrf.mxu0 }
 0x10a   :  { %v748_v53 = vpop.f32.mrf.mxu0 }
 0x10c   :  { %v2894_v43 = vpop.f32.mrf.mxu0 }
 0x10d   :  { %v622_v43 = vadd.f32 %v2664_v22, %v176_v35  ;;  %v191_v22 = vpop.permute.xlu1 %190 }
 0x10e   :  { %v751_v31 = vpop.f32.mrf.mxu0  ;;  %v635_v7 = vadd.f32 %v2673_v14, %v191_v22 }
 0x10f   :  { %v695_v45 = vadd.f32 %v2710_v12, %v622_v43  ;;  %v2704_v12 = vadd.f32 %v3507_v21, %v3501_v61  ;;  %v752_v55 = vadd.f32 %v751_v31, %v679_v26  ;;  %v2707_v31 = vadd.f32 %v3511_v38, %v3509_v34 }
 0x110   :  { %v2895_v29 = vpop.f32.mrf.mxu0 }
 0x111   :  { %v2717_v29 = vpop.f32.mrf.mxu1  ;;  %v196_v5 = vpop.permute.xlu1 %195  ;;  %v687_v61 = vadd.f32 %v2704_v12, %v614_v56  ;;  %v692_v30 = vadd.f32 %v2707_v31, %v619_v41  ;;  %v106_v12 = vld [vmem:[%s4395_s1 + $0x18] sm:$0xff] }
 0x112   :  { %v3517_v24 = vpop.f32.mrf.mxu0 }
 0x113   :  { %v2718_v46 = vpop.f32.mrf.mxu1 }
 0x114   :  { %v2898_v23 = vpop.f32.mrf.mxu0  ;;  %v2719_v8 = vadd.f32 %v2718_v46, %v2717_v29 }
 0x115   :  { %v676_v23 = vadd.f32 %v2695_v16, %v603_v17  ;;  %v630_v16 = vadd.f32 %v2670_v4, %v186_v10  ;;  %v2716_v17 = vadd.f32 %v2715_v18, %v2714_v27  ;;  %v2720_v11 = vpop.f32.mrf.mxu1  ;;  %v2676_v4 = vadd.f32 %v3515_v63, %v3513_v3 }
 0x116   :  { %v3519_v20 = vpop.f32.mrf.mxu0  ;;  %v684_v27 = vadd.f32 %v2701_v52, %v611_v50  ;;  %v708_v44 = vadd.f32 %v2719_v8, %v635_v7  ;;  %v2995_v8 = vld [vmem:[%s4396_s4 + $0x4] ss:$40 sps:$4 sm:$0xff]  }
 0x117   :  { %v749_v35 = vadd.f32 %v748_v53, %v676_v23  ;;  %v2721_v18 = vpop.f32.mrf.mxu1  ;;  %v703_v60 = vadd.f32 %v2716_v17, %v630_v16  ;;  %v638_v63 = vadd.f32 %v2676_v4, %v196_v5  ;;  %v760_v23 = vadd.f32 %v3519_v20, %v687_v61  ;;  %v3551_v16 = vld [vmem:[%s4395_s1 + $0x10] sm:$0xff]  ;;  %2276 = vmatprep.mubr.bf16.mxu1 %v2995_v8 }
 0x118   :  { %v2899_v13 = vpop.f32.mrf.mxu0  ;;  %v757_v62 = vadd.f32 %v3517_v24, %v684_v27  ;;  %v2722_v3 = vadd.f32 %v2721_v18, %v2720_v11 }
 0x11a   :  { %v3521_v9 = vpop.f32.mrf.mxu0  ;;  %v711_v22 = vadd.f32 %v2722_v3, %v638_v63 }
 0x11c   :  { %v2902_v28 = vpop.f32.mrf.mxu0 }
 0x11e   :  { %v767_v13 = vpop.f32.mrf.mxu0 }
 0x11f   :  { %v768_v32 = vadd.f32 %v767_v13, %v695_v45  ;;  %v3538_v45 = vld [vmem:[%s4395_s1] sm:$0xff] }
 0x120   :  { %v2903_v51 = vpop.f32.mrf.mxu0  ;;  %v872_v26 = vadd.f32 %v3543_v48, %v3538_v45 }
 0x121   :  { %v787_v25 = vmax.f32 %v749_v35, %v768_v32 }
 0x122   :  { %v772_v54 = vpop.f32.mrf.mxu0  ;;  %v873_v56 = vadd.f32 %v872_v26, %v3551_v16 }
 0x123   :  { %v792_v53 = vsub.f32 %v749_v35, %v787_v25  ;;  %v797_v58 = vsub.f32 %v768_v32, %v787_v25  ;;  %v773_v6 = vadd.f32 %v772_v54, %v700_v33  ;;  %v765_v35 = vadd.f32 %v3521_v9, %v692_v30 }
 0x124   :  { %v2906_v10 = vpop.f32.mrf.mxu0  ;;  %v874_v15 = vadd.f32 %v873_v56, %v106_v12 }
 0x125   :  { %v802_v59 = vmul.f32 1.442695, %v792_v53  ;;  %v788_v40 = vmax.f32 %v752_v55, %v773_v6  ;;  %v812_v21 = vmul.f32 1.442695, %v797_v58  ;;  %v2998_v10 = vld [vmem:[%s4396_s4 + $0x14] ss:$40 sps:$4 sm:$0xff]  }
 0x126   :  { %v775_v36 = vpop.f32.mrf.mxu0  ;;  %v875_v27 = vadd.f32 %v874_v15, %v107_v57  ;;  %2374 = vmatprep.mubr.bf16.mxu0 %v2998_v10 }
 0x127   :  { %v793_v19 = vsub.f32 %v752_v55, %v788_v40  ;;  %v798_v37 = vsub.f32 %v773_v6, %v788_v40  ;;  %v776_v39 = vadd.f32 %v775_v36, %v703_v60  ;;  %3063 = vpow2.f32 %v802_v59 }
 0x128   :  { %v2907_v42 = vpop.f32.mrf.mxu0  ;;  %3065 = vpow2.f32 %v812_v21  ;;  %v876_v31 = vrot.slane %v875_v27, 4 }
 0x129   :  { %v804_v47 = vmul.f32 1.442695, %v793_v19  ;;  %v814_v43 = vmul.f32 1.442695, %v798_v37  ;;  %v789_v29 = vmax.f32 %v757_v62, %v776_v39 }
 0x12a   :  { %v780_v34 = vpop.f32.mrf.mxu0 }
 0x12b   :  { %3067 = vpow2.f32 %v804_v47  ;;  %v794_v38 = vsub.f32 %v757_v62, %v789_v29  ;;  %v799_v28 = vsub.f32 %v776_v39, %v789_v29  ;;  %v781_v24 = vadd.f32 %v780_v34, %v708_v44 }
 0x12c   :  { %3069 = vpow2.f32 %v814_v43  ;;  %v2910_v46 = vpop.f32.mrf.mxu0  ;;  %v877_v62 = vadd.f32 %v876_v31, %v875_v27 }
 0x12d   :  { %v806_v20 = vmul.f32 1.442695, %v794_v38  ;;  %v816_v49 = vmul.f32 1.442695, %v799_v28  ;;  %v790_v13 = vmax.f32 %v760_v23, %v781_v24 }
 0x12e   :  { %v783_v32 = vpop.f32.mrf.mxu0  ;;  %v878_v39 = vrot.slane %v877_v62, 2 }
 0x12f   :  { %3071 = vpow2.f32 %v806_v20  ;;  %v795_v50 = vsub.f32 %v760_v23, %v790_v13  ;;  %v800_v52 = vsub.f32 %v781_v24, %v790_v13  ;;  %v784_v14 = vadd.f32 %v783_v32, %v711_v22 }
 0x130   :  { %3073 = vpow2.f32 %v816_v49  ;;  %v2911_v51 = vpop.f32.mrf.mxu0  ;;  %v879_v3 = vadd.f32 %v878_v39, %v877_v62 }
 0x131   :  { %v808_v17 = vmul.f32 1.442695, %v795_v50  ;;  %v818_v11 = vmul.f32 1.442695, %v800_v52  ;;  %v791_v25 = vmax.f32 %v765_v35, %v784_v14 }
 0x132   :  { %v880_v38 = vrot.slane %v879_v3, 1 }
 0x133   :  { %3075 = vpow2.f32 %v808_v17  ;;  %v796_v9 = vsub.f32 %v765_v35, %v791_v25  ;;  %v801_v33 = vsub.f32 %v784_v14, %v791_v25 }
 0x134   :  { %3077 = vpow2.f32 %v818_v11  ;;  %v3064_v53 = vpop.eup %3063  ;;  %v881_v32 = vadd.f32 %v880_v38, %v879_v3  ;;  %v4533_v38 = vld [vmem:[#allocation10_spill] sm:$0xff] }
 0x135   :  { %v810_v54 = vmul.f32 1.442695, %v796_v9  ;;  %v820_v55 = vmul.f32 1.442695, %v801_v33  ;;  %v3066_v58 = vpop.eup %3065 }
 0x136   :  { %v822_v5 = vadd.f32 %v3066_v58, %v3064_v53 }
 0x137   :  { %3079 = vpow2.f32 %v810_v54 }
 0x138   :  { %v3068_v6 = vpop.eup %3067  ;;  %3081 = vpow2.f32 %v820_v55 }
 0x139   :  { %v3070_v7 = vpop.eup %3069 }
 0x13a   :  { %v823_v4 = vadd.f32 %v3070_v7, %v3068_v6 }
 0x13c   :  { %v3072_v18 = vpop.eup %3071  ;;  %3083 = vrcp.f32 %v823_v4 }
 0x13d   :  { %v3074_v59 = vpop.eup %3073  ;;  %3085 = vrcp.f32 %v822_v5 }
 0x13e   :  { %v824_v40 = vadd.f32 %v3074_v59, %v3072_v18 }
 0x140   :  { %v3076_v60 = vpop.eup %3075  ;;  %3087 = vrcp.f32 %v824_v40  ;;  %v4528_v40 = vld [vmem:[#allocation5_spill] sm:$0xff] }
 0x141   :  { %v3078_v61 = vpop.eup %3077  ;;  %v4562_v5 = vunpack.c.l.bf16 %v4528_v40 }
 0x142   :  { %v825_v21 = vadd.f32 %v3078_v61, %v3076_v60 }
 0x144   :  { %v3080_v36 = vpop.eup %3079  ;;  %3089 = vrcp.f32 %v825_v21 }
 0x145   :  { %v3082_v19 = vpop.eup %3081 }
 0x146   :  { %v826_v37 = vadd.f32 %v3082_v19, %v3080_v36 }
 0x148   :  { %3091 = vrcp.f32 %v826_v37 }
 0x149   :  { %v3084_v41 = vpop.eup %3083  ;;  %3093 = vrcp.f32 %v881_v32  ;;  %v4541_v32 = vld [vmem:[#allocation19_spill] sm:$0xff] }
 0x14a   :  { %v3086_v63 = vpop.eup %3085  ;;  %v833_v44 = vmul.f32 %v3084_v41, %v3068_v6  ;;  %v838_v47 = vmul.f32 %v3084_v41, %v3070_v7 }
 0x14b   :  { %v832_v43 = vmul.f32 %v3086_v63, %v3064_v53  ;;  %v837_v29 = vmul.f32 %v3086_v63, %v3066_v58 }
 0x14c   :  { %v3567_v24 = vmul.f32 %v833_v44, %v3543_v48  ;;  %v3570_v30 = vmul.f32 %v838_v47, %v3543_v48 }
 0x14d   :  { %v3088_v42 = vpop.eup %3087  ;;  %v3573_v49 = vmul.f32 %v832_v43, %v3538_v45  ;;  %v3576_v13 = vmul.f32 %v837_v29, %v3538_v45  ;;  %v4532_v29 = vld [vmem:[#allocation9_spill] sm:$0xff] }
 0x14e   :  { %v834_v23 = vmul.f32 %v3088_v42, %v3072_v18  ;;  %v839_v34 = vmul.f32 %v3088_v42, %v3074_v59  ;;  %4525 = vst [vmem:[#allocation37_spill] sm:$0xff] %v3570_v30  ;;  %v3115_v59 = vmov 1966171168   ;;  %v4568_v18 = vunpack.c.l.bf16 %v3159_v1 }
 0x14f   :  { %v852_v50 = vadd.f32 %v3567_v24, %v3573_v49  ;;  %v862_v48 = vadd.f32 %v3570_v30, %v3576_v13  ;;  %v996_v27 = vunpack.c.l.s4 %v3115_v59  ;;  %v4545_v59 = vld [vmem:[#allocation23_spill] sm:$0xff] }
 0x150   :  { %v3579_v22 = vmul.f32 %v834_v23, %v3551_v16  ;;  %v3582_v35 = vmul.f32 %v839_v34, %v3551_v16 }
 0x151   :  { %v3090_v28 = vpop.eup %3089 }
 0x152   :  { %v835_v46 = vmul.f32 %v3090_v28, %v3076_v60  ;;  %v840_v20 = vmul.f32 %v3090_v28, %v3078_v61  ;;  %4526 = vst [vmem:[#allocation38_spill] sm:$0xff] %v3582_v35  ;;  %v853_v45 = vadd.f32 %v852_v50, %v3579_v22  ;;  %v863_v51 = vadd.f32 %v862_v48, %v3582_v35  ;;  %v4555_v28 = vld [vmem:[#allocation32_spill] sm:$0xff] }
 0x154   :  { %v3588_v52 = vmul.f32 %v835_v46, %v106_v12  ;;  %v3590_v14 = vmul.f32 %v840_v20, %v106_v12  ;;  %v4554_v46 = vld [vmem:[#allocation31_spill] sm:$0xff] }
 0x155   :  { %v3092_v26 = vpop.eup %3091 }
 0x156   :  { %v836_v17 = vmul.f32 %v3092_v26, %v3080_v36  ;;  %v841_v11 = vmul.f32 %v3092_v26, %v3082_v19  ;;  %v854_v16 = vadd.f32 %v853_v45, %v3588_v52  ;;  %v864_v25 = vadd.f32 %v863_v51, %v3590_v14  ;;  %v4529_v36 = vld [vmem:[#allocation6_spill] sm:$0xff]  ;;  %v3094_v41 = vpop.eup %3093  ;;  %v4548_v26 = vld [vmem:[#allocation25_spill] sm:$0xff] }
 0x157   :  { %v997_v51 = vunpack.c.0.s8 %v996_v27  ;;  %v4553_v27 = vld [vmem:[#allocation30_spill] sm:$0xff] }
 0x158   :  { %v3596_v9 = vmul.f32 %v836_v17, %v107_v57  ;;  %v3598_v33 = vmul.f32 %v841_v11, %v107_v57  ;;  %v4536_v11 = vld [vmem:[#allocation13_spill] sm:$0xff] }
 0x159   :  { %v4540_v17 = vld [vmem:[#allocation17_spill] sm:$0xff] }
 0x15a   :  { %v855_v56 = vadd.f32 %v854_v16, %v3596_v9  ;;  %v865_v12 = vadd.f32 %v864_v25, %v3598_v33  ;;  %v4551_v25 = vld [vmem:[#allocation28_spill] sm:$0xff]  ;;  %v4552_v16 = vld [vmem:[#allocation29_spill] sm:$0xff] }
 0x15c   :  { %v856_v54 = vrot.slane %v855_v56, 4  ;;  %v866_v55 = vrot.slane %v865_v12, 4 }
 0x15e   :  { %v857_v53 = vadd.f32 %v856_v54, %v855_v56  ;;  %v867_v58 = vadd.f32 %v866_v55, %v865_v12  ;;  %v4537_v56 = vld [vmem:[#allocation15_spill] sm:$0xff]  ;;  %v4549_v55 = vld [vmem:[#allocation26_spill] sm:$0xff] }
 0x15f   :  { %v4550_v12 = vld [vmem:[#allocation27_spill] sm:$0xff] }
 0x160   :  { %v858_v8 = vrot.slane %v857_v53, 2  ;;  %v868_v4 = vrot.slane %v867_v58, 2 }
 0x162   :  { %v859_v31 = vadd.f32 %v858_v8, %v857_v53  ;;  %v869_v61 = vadd.f32 %v868_v4, %v867_v58 }
 0x164   :  { %v860_v44 = vrot.slane %v859_v31, 1  ;;  %v870_v47 = vrot.slane %v869_v61, 1 }
 0x166   :  { %v861_v50 = vadd.f32 %v860_v44, %v859_v31  ;;  %v871_v48 = vadd.f32 %v870_v47, %v869_v61  ;;  %v4544_v44 = vld [vmem:[#allocation21_spill] sm:$0xff] }
 0x168   :  { %v884_v54 = vmul.f32 %v3094_v41, %v871_v48  ;;  %3095 = vrcp.f32 %v861_v50  ;;  %v883_v4 = vmul.f32 %v3094_v41, %v861_v50 }
 0x169   :  { %3097 = vrcp.f32 %v871_v48  ;;  %v998_v48 = vlaneseq }
 0x16a   :  { %v887_v31 = vrot.slane %v884_v54, 7  ;;  %v4556_v54 = vld [vmem:[#allocation33_spill] sm:$0xff] }
 0x16b   :  { %v999_v47 = vshrl.u32 %v998_v48, 7 }
 0x16c   :  { %v889_v42 = vsel %vm888_vm1, %v887_v31, %v883_v4 }
 0x16d   :  { %891 = vst [vmem:[%s4397_s5] sm:$0x3] %v889_v42  ;;  %v3669_v34 = vsub.s32 %v997_v51, %v999_v47  ;;  %v4557_v42 = vld [vmem:[#allocation34_spill] sm:$0xff]  ;;  %v3674_v48 = vsub.s32 0, %v999_v47 }
 0x175   :  { %v3096_v41 = vpop.eup %3095 }
 0x176   :  { %v3676_v57 = vpop.eup %3097  ;;  %v895_v4 = vmul.f32 %v3096_v41, %v3567_v24  ;;  %v894_v31 = vmul.f32 %v3096_v41, %v3573_v49  ;;  %v898_v63 = vmul.f32 %v3096_v41, %v3596_v9  ;;  %v3682_v51 = vmul.f32 %v3096_v41, %v3588_v52 }
 0x177   :  { %4558 = vst [vmem:[#allocation6_spill] sm:$0xff] %v3676_v57  ;;  %v899_v23 = vmul.f32 %v3676_v57, %v3576_v13  ;;  %v3688_v43 = vmul.f32 %v3676_v57, %v3598_v33  ;;  %v3691_v47 = vmul.f32 %v3096_v41, %v3579_v22  ;;  %v3695_v24 = vmul.f32 %v3676_v57, %v3590_v14 }
 0x178   :  { %v1043_v49 = vcombine.high %v895_v4, %v895_v4  ;;  %v994_v10 = vcombine.high %v894_v31, %v894_v31  ;;  %v1190_v9 = vcombine.high %v898_v63, %v898_v63  ;;  %v3698_v52 = vrot.slane %v895_v4, %v3669_v34 }
 0x179   :  { %4559 = vst [vmem:[#allocation9_spill] sm:$0xff] %v3688_v43  ;;  %4560 = vst [vmem:[#allocation10_spill] sm:$0xff] %v3691_v47  ;;  %v1239_v8 = vcombine.high %v899_v23, %v899_v23  ;;  %v3701_v13 = vrot.slane %v899_v23, %v3669_v34  ;;  %v3704_v33 = vrot.slane %v894_v31, %v3669_v34 }
 0x17a   :  { %4561 = vst [vmem:[#allocation13_spill] sm:$0xff] %v3695_v24  ;;  %v3707_v22 = vrot.slane %v898_v63, %v3669_v34  ;;  %v1057_v41 = vrot.slane %v1043_v49, %v3669_v34  ;;  %v1008_v14 = vrot.slane %v994_v10, %v3669_v34  ;;  %v1204_v7 = vrot.slane %v1190_v9, %v3669_v34 }
 0x17b   :  { %v1253_v15 = vrot.slane %v1239_v8, %v3669_v34 }
 0x17c   :  { %v1059_v6 = vcombine.high %v1057_v41, %v1057_v41  ;;  %v1010_v49 = vcombine.high %v1008_v14, %v1008_v14  ;;  %v1206_v19 = vcombine.high %v1204_v7, %v1204_v7  ;;  %v3722_v10 = vrot.slane %v1057_v41, %v3669_v34 }
 0x17d   :  { %v1255_v9 = vcombine.high %v1253_v15, %v1253_v15  ;;  %v3725_v4 = vrot.slane %v1253_v15, %v3669_v34  ;;  %v3728_v8 = vrot.slane %v1008_v14, %v3669_v34  ;;  %v3731_v23 = vrot.slane %v1204_v7, %v3669_v34 }
 0x17e   :  { %v1087_v31 = vrot.slane %v1059_v6, %v3669_v34  ;;  %v1038_v63 = vrot.slane %v1010_v49, %v3669_v34  ;;  %v1234_v62 = vrot.slane %v1206_v19, %v3669_v34  ;;  %v1089_v41 = vcombine.high %v3722_v10, %v3722_v10 }
 0x17f   :  { %v1283_v21 = vrot.slane %v1255_v9, %v3669_v34  ;;  %v1285_v15 = vcombine.high %v3725_v4, %v3725_v4  ;;  %v1040_v14 = vcombine.high %v3728_v8, %v3728_v8  ;;  %v1236_v7 = vcombine.high %v3731_v23, %v3731_v23 }
 0x180   :  { %v1091_v60 = vcombine.high %v1087_v31, %v1087_v31  ;;  %v1042_v6 = vcombine.high %v1038_v63, %v1038_v63  ;;  %v1238_v30 = vcombine.high %v1234_v62, %v1234_v62  ;;  %v1543_v49 = vrot.slane %v1089_v41, %v3674_v48 }
 0x181   :  { %v1287_v19 = vcombine.high %v1283_v21, %v1283_v21  ;;  %v1671_v57 = vrot.slane %v1285_v15, %v3674_v48  ;;  %v1511_v35 = vrot.slane %v1040_v14, %v3674_v48  ;;  %v1639_v9 = vrot.slane %v1236_v7, %v3674_v48 }
 0x182   :  { %v1547_v50 = vrot.slane %v1091_v60, %v3674_v48  ;;  %v1515_v58 = vrot.slane %v1042_v6, %v3674_v48  ;;  %v1643_v39 = vrot.slane %v1238_v30, %v3674_v48  ;;  %v1912_v61 = vmul.f32 %v1543_v49, %v4562_v5 }
 0x183   :  { %v1675_v53 = vrot.slane %v1287_v19, %v3674_v48  ;;  %v4563_v41 = vunpack.c.h.bf16 %v4528_v40  ;;  %v4564_v15 = vunpack.c.l.bf16 %v4529_v36  ;;  %v4565_v14 = vunpack.c.h.bf16 %v4529_v36 }
 0x184   :  { %v4566_v60 = vunpack.c.l.bf16 %v3154_v0  ;;  %v4567_v6 = vunpack.c.h.bf16 %v3154_v0  ;;  %v1898_v5 = vmul.f32 %v1515_v58, %v4568_v18  ;;  %v4569_v19 = vunpack.c.h.bf16 %v3159_v1 }
 0x185   :  { %v1913_v45 = vmul.f32 %v1543_v49, %v4563_v41  ;;  %v1976_v20 = vmul.f32 %v1671_v57, %v4564_v15  ;;  %v1977_v7 = vmul.f32 %v1671_v57, %v4565_v14  ;;  %v4570_v49 = vmov %v4568_v18 }
 0x186   :  { %v1914_v3 = vmul.f32 %v1547_v50, %v4566_v60  ;;  %v1915_v30 = vmul.f32 %v1547_v50, %v4567_v6  ;;  %v1899_v2 = vmul.f32 %v1515_v58, %v4569_v19  ;;  %v1978_v41 = vmul.f32 %v1675_v53, %v4570_v49 }
 0x187   :  { %v4571_v15 = vmov %v4569_v19  ;;  %v4572_v57 = vunpack.c.l.bf16 %v4552_v16  ;;  %v4573_v60 = vunpack.c.h.bf16 %v4552_v16  ;;  %v2058_v6 = vpack.c.bf16 %v1913_v45, %v1912_v61 }
 0x188   :  { %v1979_v40 = vmul.f32 %v1675_v53, %v4571_v15  ;;  %v2059_v0 = vpack.c.bf16 %v1915_v30, %v1914_v3  ;;  %v2051_v50 = vpack.c.bf16 %v1899_v2, %v1898_v5  ;;  %v2090_v24 = vpack.c.bf16 %v1977_v7, %v1976_v20 }
 0x189   :  { %v1962_v14 = vmul.f32 %v1643_v39, %v4572_v57  ;;  %v1963_v37 = vmul.f32 %v1643_v39, %v4573_v60  ;;  %v4574_v58 = vunpack.c.l.bf16 %v4529_v36  ;;  %v4575_v49 = vunpack.c.h.bf16 %v4529_v36 }
 0x18a   :  { %v2091_v18 = vpack.c.bf16 %v1979_v40, %v1978_v41  ;;  %2736 = vmatprep.subr.bf16.mxu1 %v2059_v0  ;;  %v4576_v1 = vunpack.c.l.bf16 %v4553_v27  ;;  %v4577_v15 = vunpack.c.h.bf16 %v4553_v27  ;;  %v1539_v39 = vrot.slane %v1087_v31, %v3674_v48  ;;  %v4578_v0 = vld [vmem:[#allocation35_spill] sm:$0xff] }
 0x18b   :  { %v2083_v47 = vpack.c.bf16 %v1963_v37, %v1962_v14  ;;  %v1896_v19 = vmul.f32 %v1511_v35, %v4574_v58  ;;  %v1897_v43 = vmul.f32 %v1511_v35, %v4575_v49  ;;  %v1667_v2 = vrot.slane %v1283_v21, %v3674_v48  ;;  %2737 = vmatpush3.bf16.msra.mxu1 %v2051_v50 }
 0x18c   :  { %v1960_v53 = vmul.f32 %v1639_v9, %v4576_v1  ;;  %v1961_v57 = vmul.f32 %v1639_v9, %v4577_v15  ;;  %v973_v40 = vunpack.c.h.bf16 %v4557_v42  ;;  %2792 = vmatprep.subr.bf16.mxu0 %v2091_v18  ;;  %v1507_v3 = vrot.slane %v1038_v63, %v3674_v48  ;;  %2738 = vmatprep.subr.bf16.mxu1 %v2058_v6 }
 0x18d   :  { %v2050_v37 = vpack.c.bf16 %v1897_v43, %v1896_v19  ;;  %v1635_v35 = vrot.slane %v1234_v62, %v3674_v48  ;;  %v970_v36 = vunpack.c.l.bf16 %v4578_v0  ;;  %2793 = vmatpush3.bf16.msra.mxu0 %v2083_v47  ;;  %v4579_v45 = vunpack.c.l.bf16 %v4532_v29 }
 0x18e   :  { %v2082_v20 = vpack.c.bf16 %v1961_v57, %v1960_v53  ;;  %v4580_v31 = vunpack.c.h.bf16 %v4532_v29  ;;  %2794 = vmatprep.subr.bf16.mxu0 %v2090_v24  ;;  %v4581_v9 = vunpack.c.l.bf16 %v4533_v38  ;;  %v4582_v43 = vunpack.c.h.bf16 %v4533_v38 }
 0x18f   :  { %v1910_v61 = vmul.f32 %v1539_v39, %v4579_v45  ;;  %v4585_v14 = vunpack.c.l.bf16 %v4554_v46  ;;  %v4586_v50 = vunpack.c.h.bf16 %v4554_v46  ;;  %v1535_v24 = vrot.slane %v3722_v10, %v3674_v48  ;;  %2739 = vmatpush3.bf16.msra.mxu1 %v2050_v37 }
 0x190   :  { %v1911_v21 = vmul.f32 %v1539_v39, %v4580_v31  ;;  %v1974_v7 = vmul.f32 %v1667_v2, %v4581_v9  ;;  %v1975_v63 = vmul.f32 %v1667_v2, %v4582_v43  ;;  %v4583_v62 = vmov %v4581_v9 }
 0x191   :  { %v1894_v30 = vmul.f32 %v1507_v3, %v4583_v62  ;;  %v4584_v47 = vmov %v4582_v43  ;;  %v1958_v60 = vmul.f32 %v1635_v35, %v4585_v14  ;;  %v1959_v6 = vmul.f32 %v1635_v35, %v4586_v50  ;;  %2795 = vmatpush3.bf16.msra.mxu0 %v2082_v20 }
 0x192   :  { %v1895_v5 = vmul.f32 %v1507_v3, %v4584_v47  ;;  %v2057_v41 = vpack.c.bf16 %v1911_v21, %v1910_v61  ;;  %v2089_v18 = vpack.c.bf16 %v1975_v63, %v1974_v7  ;;  %v1663_v19 = vrot.slane %v3725_v4, %v3674_v48  ;;  %v4597_v47 = vld [vmem:[#allocation36_spill] sm:$0xff] }
 0x193   :  { %v1503_v38 = vrot.slane %v3728_v8, %v3674_v48  ;;  %v971_v49 = vunpack.c.h.bf16 %v4578_v0  ;;  %v2081_v1 = vpack.c.bf16 %v1959_v6, %v1958_v60  ;;  %v4587_v53 = vunpack.c.l.bf16 %v4536_v11 }
 0x194   :  { %v2049_v58 = vpack.c.bf16 %v1895_v5, %v1894_v30  ;;  %2740 = vmatprep.subr.bf16.mxu1 %v2057_v41  ;;  %v4588_v57 = vunpack.c.h.bf16 %v4536_v11  ;;  %2796 = vmatprep.subr.bf16.mxu0 %v2089_v18  ;;  %v4589_v39 = vunpack.c.l.bf16 %v4537_v56  ;;  %v4590_v4 = vunpack.c.h.bf16 %v4537_v56 }
 0x195   :  { %v1908_v15 = vmul.f32 %v1535_v24, %v4587_v53  ;;  %v1631_v61 = vrot.slane %v3731_v23, %v3674_v48  ;;  %v4593_v31 = vcombine.high %v3698_v52, %v3698_v52  ;;  %v4594_v9 = vcombine.high %v3701_v13, %v3701_v13  ;;  %2797 = vmatpush3.bf16.msra.mxu0 %v2081_v1 }
 0x196   :  { %v1909_v10 = vmul.f32 %v1535_v24, %v4588_v57  ;;  %v1972_v2 = vmul.f32 %v1663_v19, %v4589_v39  ;;  %v1973_v37 = vmul.f32 %v1663_v19, %v4590_v4  ;;  %v4591_v8 = vmov %v4589_v39  ;;  %2741 = vmatpush3.bf16.msra.mxu1 %v2049_v58 }
 0x197   :  { %v1892_v3 = vmul.f32 %v1503_v38, %v4591_v8  ;;  %v4592_v35 = vmov %v4590_v4  ;;  %v1080_v21 = vrot.slane %v4593_v31, %v3669_v34  ;;  %v1276_v7 = vrot.slane %v4594_v9, %v3669_v34 }
 0x198   :  { %v1893_v20 = vmul.f32 %v1503_v38, %v4592_v35  ;;  %v2056_v45 = vpack.c.bf16 %v1909_v10, %v1908_v15  ;;  %v2088_v43 = vpack.c.bf16 %v1973_v37, %v1972_v2  ;;  %v4595_v56 = vcombine.high %v3704_v33, %v3704_v33 }
 0x199   :  { %v4596_v23 = vcombine.high %v3707_v22, %v3707_v22  ;;  %v4489_v5 = vunpack.c.l.bf16 %v4597_v47  ;;  %v4598_v41 = vunpack.c.l.bf16 %v4555_v28  ;;  %v4599_v60 = vunpack.c.h.bf16 %v4555_v28 }
 0x19a   :  { %v2048_v63 = vpack.c.bf16 %v1893_v20, %v1892_v3  ;;  %v1031_v62 = vrot.slane %v4595_v56, %v3669_v34  ;;  %2742 = vmatprep.subr.bf16.mxu1 %v2056_v45  ;;  %v1090_v6 = vcombine.high %v1080_v21, %v1080_v21  ;;  %2798 = vmatprep.subr.bf16.mxu0 %v2088_v43  ;;  %v4600_v2 = vunpack.c.l.bf16 %v4540_v17 }
 0x19b   :  { %v1227_v30 = vrot.slane %v4596_v23, %v3669_v34  ;;  %v1956_v14 = vmul.f32 %v1631_v61, %v4598_v41  ;;  %v1957_v50 = vmul.f32 %v1631_v61, %v4599_v60  ;;  %v1286_v24 = vcombine.high %v1276_v7, %v1276_v7 }
 0x19c   :  { %v1041_v18 = vcombine.high %v1031_v62, %v1031_v62  ;;  %v3851_v19 = vrot.slane %v3698_v52, %v3669_v34  ;;  %v1531_v53 = vrot.slane %v1090_v6, %v3674_v48  ;;  %v3856_v1 = vrot.slane %v3701_v13, %v3669_v34  ;;  %2743 = vmatpush3.bf16.msra.mxu1 %v2048_v63 }
 0x19d   :  { %v1237_v58 = vcombine.high %v1227_v30, %v1227_v30  ;;  %v2080_v38 = vpack.c.bf16 %v1957_v50, %v1956_v14  ;;  %v3860_v15 = vrot.slane %v3704_v33, %v3669_v34  ;;  %v1659_v57 = vrot.slane %v1286_v24, %v3674_v48 }
 0x19e   :  { %v1499_v10 = vrot.slane %v1041_v18, %v3674_v48  ;;  %v1088_v52 = vcombine.high %v3851_v19, %v3851_v19  ;;  %v1906_v4 = vmul.f32 %v1531_v53, %v4600_v2  ;;  %v4601_v13 = vunpack.c.h.bf16 %v4540_v17 }
 0x19f   :  { %v1627_v39 = vrot.slane %v1237_v58, %v3674_v48  ;;  %2799 = vmatpush3.bf16.msra.mxu0 %v2080_v38  ;;  %v1284_v33 = vcombine.high %v3856_v1, %v3856_v1  ;;  %v1039_v8 = vcombine.high %v3860_v15, %v3860_v15  ;;  %v4602_v3 = vunpack.c.l.bf16 %v4541_v32 }
 0x1a0   :  { %v1907_v37 = vmul.f32 %v1531_v53, %v4601_v13  ;;  %v4603_v20 = vunpack.c.h.bf16 %v4541_v32  ;;  %v4606_v56 = vunpack.c.l.bf16 %v4556_v54  ;;  %v4607_v41 = vunpack.c.h.bf16 %v4556_v54 }
 0x1a1   :  { %v1970_v35 = vmul.f32 %v1659_v57, %v4602_v3  ;;  %v4604_v61 = vmov %v4602_v3  ;;  %v1527_v60 = vrot.slane %v1088_v52, %v3674_v48  ;;  %v1655_v24 = vrot.slane %v1284_v33, %v3674_v48 }
 0x1a2   :  { %v1971_v45 = vmul.f32 %v1659_v57, %v4603_v20  ;;  %v1890_v31 = vmul.f32 %v1499_v10, %v4604_v61  ;;  %v4605_v9 = vmov %v4603_v20  ;;  %v2055_v63 = vpack.c.bf16 %v1907_v37, %v1906_v4 }
 0x1a3   :  { %v1891_v43 = vmul.f32 %v1499_v10, %v4605_v9  ;;  %v1954_v23 = vmul.f32 %v1627_v39, %v4606_v56  ;;  %v1955_v14 = vmul.f32 %v1627_v39, %v4607_v41  ;;  %v1495_v18 = vrot.slane %v1039_v8, %v3674_v48  ;;  %v3899_v39 = vld [vmem:[%s4392_s0 + $0x100] sm:$0xff]  }
 0x1a4   :  { %v2087_v50 = vpack.c.bf16 %v1971_v45, %v1970_v35  ;;  %2744 = vmatprep.subr.bf16.mxu1 %v2055_v63  ;;  %v4608_v32 = vunpack.c.l.bf16 %v4544_v44  ;;  %v4609_v53 = vunpack.c.h.bf16 %v4544_v44  ;;  %v1213_v10 = vrot.slane %v3707_v22, %v3669_v34 }
 0x1a5   :  { %v2047_v6 = vpack.c.bf16 %v1891_v43, %v1890_v31  ;;  %v2079_v58 = vpack.c.bf16 %v1955_v14, %v1954_v23  ;;  %v4488_v52 = vunpack.c.h.bf16 %v3899_v39  ;;  %v4610_v2 = vunpack.c.l.bf16 %v4545_v59 }
 0x1a6   :  { %v1904_v38 = vmul.f32 %v1527_v60, %v4608_v32  ;;  %v1905_v57 = vmul.f32 %v1527_v60, %v4609_v53  ;;  %2800 = vmatprep.subr.bf16.mxu0 %v2087_v50  ;;  %v4611_v13 = vunpack.c.h.bf16 %v4545_v59  ;;  %v1235_v20 = vcombine.high %v1213_v10, %v1213_v10 }
 0x1a7   :  { %2745 = vmatpush3.bf16.msra.mxu1 %v2047_v6  ;;  %v1968_v4 = vmul.f32 %v1655_v24, %v4610_v2  ;;  %v4612_v33 = vmov %v4610_v2  ;;  %2801 = vmatpush3.bf16.msra.mxu0 %v2079_v58  ;;  %v1523_v45 = vrot.slane %v1080_v21, %v3674_v48  ;;  %v1651_v31 = vrot.slane %v1276_v7, %v3674_v48 }
 0x1a8   :  { %v1969_v37 = vmul.f32 %v1655_v24, %v4611_v13  ;;  %v1888_v8 = vmul.f32 %v1495_v18, %v4612_v33  ;;  %v2054_v22 = vpack.c.bf16 %v1905_v57, %v1904_v38  ;;  %v4613_v3 = vmov %v4611_v13 }
 0x1a9   :  { %v1889_v35 = vmul.f32 %v1495_v18, %v4613_v3  ;;  %v1491_v9 = vrot.slane %v1031_v62, %v3674_v48  ;;  %v1619_v43 = vrot.slane %v1227_v30, %v3674_v48  ;;  %v1623_v56 = vrot.slane %v1235_v20, %v3674_v48 }
 0x1aa   :  { %v2086_v61 = vpack.c.bf16 %v1969_v37, %v1968_v4  ;;  %2746 = vmatprep.subr.bf16.mxu1 %v2054_v22  ;;  %v4614_v23 = vunpack.c.l.bf16 %v4548_v26  ;;  %v4615_v59 = vunpack.c.h.bf16 %v4548_v26  ;;  %v4616_v21 = vunpack.c.l.bf16 %v4549_v55 }
 0x1ab   :  { %v2046_v63 = vpack.c.bf16 %v1889_v35, %v1888_v8  ;;  %v4617_v7 = vunpack.c.h.bf16 %v4549_v55  ;;  %v4620_v18 = vunpack.c.l.bf16 %v4557_v42  ;;  %v1953_v32 = vmul.f32 %v1623_v56, %v973_v40 }
 0x1ac   :  { %v1902_v41 = vmul.f32 %v1523_v45, %v4614_v23  ;;  %v1903_v14 = vmul.f32 %v1523_v45, %v4615_v59  ;;  %2802 = vmatprep.subr.bf16.mxu0 %v2086_v61  ;;  %v1966_v60 = vmul.f32 %v1651_v31, %v4616_v21  ;;  %v4618_v62 = vmov %v4616_v21  ;;  %v3951_v61 = vld [vmem:[%s4392_s0 + $0xc8] sm:$0xff]  }
 0x1ad   :  { %v1967_v50 = vmul.f32 %v1651_v31, %v4617_v7  ;;  %v1886_v30 = vmul.f32 %v1491_v9, %v4618_v62  ;;  %v4619_v6 = vmov %v4617_v7  ;;  %2747 = vmatpush3.bf16.msra.mxu1 %v2046_v63  ;;  %v1952_v58 = vmul.f32 %v1623_v56, %v4620_v18  ;;  %v4627_v7 = vld [vmem:[#allocation9_spill] sm:$0xff]  ;;  %v4628_v62 = vld [vmem:[#allocation10_spill] sm:$0xff] }
 0x1ae   :  { %v1887_v24 = vmul.f32 %v1491_v9, %v4619_v6  ;;  %v2053_v38 = vpack.c.bf16 %v1903_v14, %v1902_v41  ;;  %v1950_v53 = vmul.f32 %v1619_v43, %v970_v36  ;;  %v1951_v4 = vmul.f32 %v1619_v43, %v971_v49 }
 0x1af   :  { %v2085_v57 = vpack.c.bf16 %v1967_v50, %v1966_v60  ;;  %v1519_v55 = vrot.slane %v3851_v19, %v3674_v48  ;;  %v2078_v13 = vpack.c.bf16 %v1953_v32, %v1952_v58  ;;  %v1647_v37 = vrot.slane %v3856_v1, %v3674_v48 }
 0x1b0   :  { %v2045_v2 = vpack.c.bf16 %v1887_v24, %v1886_v30  ;;  %2748 = vmatprep.subr.bf16.mxu1 %v2053_v38  ;;  %v1487_v33 = vrot.slane %v3860_v15, %v3674_v48  ;;  %v1615_v8 = vrot.slane %v1213_v10, %v3674_v48  ;;  %v2077_v22 = vpack.c.bf16 %v1951_v4, %v1950_v53  ;;  %v2993_v53 = vld [vmem:[%s4396_s4] ss:$40 sps:$4 sm:$0xff]  }
 0x1b1   :  { %v4621_v3 = vunpack.c.l.bf16 %v4550_v12  ;;  %v4622_v20 = vunpack.c.h.bf16 %v4550_v12  ;;  %v1141_v19 = vcombine.high %v3682_v51, %v3682_v51  ;;  %v954_v1 = vunpack.c.l.bf16 %v3951_v61  ;;  %2803 = vmatpush3.bf16.msra.mxu0 %v2078_v13 }
 0x1b2   :  { %2749 = vmatpush3.bf16.msra.mxu1 %v2045_v2  ;;  %v4623_v15 = vunpack.c.l.bf16 %v4551_v25  ;;  %v4624_v31 = vunpack.c.h.bf16 %v4551_v25  ;;  %2804 = vmatprep.subr.bf16.mxu0 %v2085_v57  ;;  %v1948_v59 = vmul.f32 %v1615_v8, %v4489_v5  ;;  %v1949_v14 = vmul.f32 %v1615_v8, %v4488_v52  ;;  %v4629_v25 = vld [vmem:[#allocation13_spill] sm:$0xff] }
 0x1b3   :  { %v1900_v35 = vmul.f32 %v1519_v55, %v4621_v3  ;;  %v1901_v45 = vmul.f32 %v1519_v55, %v4622_v20  ;;  %v1155_v60 = vrot.slane %v1141_v19, %v3669_v34  ;;  %v1435_v50 = vcombine.high %v4627_v7, %v4627_v7 }
 0x1b4   :  { %v1964_v10 = vmul.f32 %v1647_v37, %v4623_v15  ;;  %v1965_v9 = vmul.f32 %v1647_v37, %v4624_v31  ;;  %v4625_v43 = vmov %v4623_v15  ;;  %v4626_v23 = vmov %v4624_v31  ;;  %v2999_v37 = vld [vmem:[%s4396_s4 + $0x54] ss:$40 sps:$4 sm:$0xff]  }
 0x1b5   :  { %v1884_v63 = vmul.f32 %v1487_v33, %v4625_v43  ;;  %v2052_v56 = vpack.c.bf16 %v1901_v45, %v1900_v35  ;;  %v1885_v41 = vmul.f32 %v1487_v33, %v4626_v23  ;;  %v1092_v30 = vcombine.high %v4628_v62, %v4628_v62  ;;  %2805 = vmatpush3.bf16.msra.mxu0 %v2077_v22  ;;  %v2996_v35 = vld [vmem:[%s4396_s4 + $0x10] ss:$40 sps:$4 sm:$0xff]  }
 0x1b6   :  { %v2084_v21 = vpack.c.bf16 %v1965_v9, %v1964_v10  ;;  %v2076_v24 = vpack.c.bf16 %v1949_v14, %v1948_v59  ;;  %v1386_v18 = vcombine.high %v4629_v25, %v4629_v25  ;;  %v3975_v58 = vrot.slane %v3682_v51, %v3669_v34  ;;  %v4014_v10 = vld [vmem:[%s4392_s0 + $0x88] sm:$0xff]  }
 0x1b7   :  { %2750 = vmatprep.subr.bf16.mxu1 %v2052_v56  ;;  %v2044_v6 = vpack.c.bf16 %v1885_v41, %v1884_v63  ;;  %v1157_v32 = vcombine.high %v1155_v60, %v1155_v60  ;;  %v1449_v38 = vrot.slane %v1435_v50, %v3669_v34  ;;  %v1106_v57 = vrot.slane %v1092_v30, %v3669_v34  ;;  %v3008_v56 = vld [vmem:[%s4396_s4 + $0x64] ss:$40 sps:$4 sm:$0xff]  }
 0x1b8   :  { %v3983_v2 = vrot.slane %v1155_v60, %v3669_v34  ;;  %v955_v4 = vunpack.c.h.bf16 %v3951_v61  ;;  %2806 = vmatprep.subr.bf16.mxu0 %v2084_v21  ;;  %v1400_v51 = vrot.slane %v1386_v18, %v3669_v34  ;;  %v1156_v55 = vcombine.high %v3975_v58, %v3975_v58 }
 0x1b9   :  { %2751 = vmatpush3.bf16.msra.mxu1 %v2044_v6  ;;  %v3991_v13 = vrot.slane %v4627_v7, %v3669_v34  ;;  %v1185_v33 = vrot.slane %v1157_v32, %v3669_v34  ;;  %v1451_v8 = vcombine.high %v1449_v38, %v1449_v38  ;;  %v1108_v22 = vcombine.high %v1106_v57, %v1106_v57  ;;  %v4630_v6 = vld [vmem:[#allocation7_spill] sm:$0xff] }
 0x1ba   :  { %v1187_v3 = vcombine.high %v3983_v2, %v3983_v2  ;;  %v1402_v20 = vcombine.high %v1400_v51, %v1400_v51  ;;  %v4003_v45 = vrot.slane %v1449_v38, %v3669_v34  ;;  %v4006_v19 = vrot.slane %v1106_v57, %v3669_v34  ;;  %2807 = vmatpush3.bf16.msra.mxu0 %v2076_v24  ;;  %v4633_v57 = vld [vmem:[#allocation3_spill] sm:$0xff] }
 0x1bb   :  { %v4009_v15 = vrot.slane %v1400_v51, %v3669_v34  ;;  %v1189_v9 = vcombine.high %v1185_v33, %v1185_v33  ;;  %v1479_v43 = vrot.slane %v1451_v8, %v3669_v34  ;;  %v1136_v63 = vrot.slane %v1108_v22, %v3669_v34 }
 0x1bc   :  { %2277 = vmatmul.mubr.bf16.vlgmr.msra.gmra.mxu1 %v2993_v53  ;;  %v4023_v23 = vrot.slane %v1402_v20, %v3669_v34  ;;  %v1607_v41 = vrot.slane %v1187_v3, %v3674_v48  ;;  %v1481_v59 = vcombine.high %v4003_v45, %v4003_v45  ;;  %v1138_v14 = vcombine.high %v4006_v19, %v4006_v19 }
 0x1bd   :  { %2284 = vmatprep.mubr.bf16.mxu1 %v2999_v37  ;;  %v1611_v21 = vrot.slane %v1189_v9, %v3674_v48  ;;  %v1483_v60 = vcombine.high %v1479_v43, %v1479_v43  ;;  %v1140_v7 = vcombine.high %v1136_v63, %v1136_v63  ;;  %v1432_v50 = vcombine.high %v4009_v15, %v4009_v15 }
 0x1be   :  { %2375 = vmatmul.mubr.bf16.vlgmr.msra.gmra.mxu0 %v2996_v35  ;;  %v1434_v30 = vcombine.high %v4023_v23, %v4023_v23  ;;  %v4631_v24 = vunpack.c.l.bf16 %v4630_v6  ;;  %v4632_v32 = vunpack.c.h.bf16 %v4630_v6  ;;  %v1799_v53 = vrot.slane %v1481_v59, %v3674_v48 }
 0x1bf   :  { %v4634_v51 = vunpack.c.l.bf16 %v4633_v57  ;;  %v4635_v8 = vunpack.c.h.bf16 %v4633_v57  ;;  %v1803_v3 = vrot.slane %v1483_v60, %v3674_v48  ;;  %v1579_v35 = vrot.slane %v1140_v7, %v3674_v48  ;;  %2382 = vmatprep.mubr.bf16.mxu0 %v3008_v56 }
 0x1c0   :  { %v1944_v18 = vmul.f32 %v1607_v41, %v4631_v24  ;;  %v1945_v38 = vmul.f32 %v1607_v41, %v4632_v32  ;;  %v1771_v20 = vrot.slane %v1434_v30, %v3674_v48  ;;  %v4636_v24 = vunpack.c.l.bf16 %v4553_v27  ;;  %v3001_v32 = vld [vmem:[%s4396_s4 + $0x50] ss:$40 sps:$4 sm:$0xff]  }
 0x1c1   :  { %v1946_v37 = vmul.f32 %v1611_v21, %v4634_v51  ;;  %v1947_v22 = vmul.f32 %v1611_v21, %v4635_v8  ;;  %v4637_v41 = vunpack.c.h.bf16 %v4553_v27  ;;  %v4638_v21 = vunpack.c.l.bf16 %v4552_v16  ;;  %v4640_v8 = vld [vmem:[#allocation4_spill] sm:$0xff] }
 0x1c2   :  { %v2074_v9 = vpack.c.bf16 %v1945_v38, %v1944_v18  ;;  %v2040_v52 = vmul.f32 %v1799_v53, %v4636_v24  ;;  %v4639_v7 = vunpack.c.h.bf16 %v4552_v16  ;;  %v4641_v30 = vunpack.c.l.bf16 %v4640_v8 }
 0x1c3   :  { %v2041_v59 = vmul.f32 %v1799_v53, %v4637_v41  ;;  %v2075_v51 = vpack.c.bf16 %v1947_v22, %v1946_v37  ;;  %v2042_v60 = vmul.f32 %v1803_v3, %v4638_v21  ;;  %v4642_v38 = vunpack.c.h.bf16 %v4640_v8 }
 0x1c4   :  { %v2043_v56 = vmul.f32 %v1803_v3, %v4639_v7  ;;  %v1930_v18 = vmul.f32 %v1579_v35, %v4641_v30  ;;  %v4643_v27 = vunpack.c.l.bf16 %v4633_v57  ;;  %v4644_v41 = vunpack.c.h.bf16 %v4633_v57  ;;  %2285 = vmatmul.mubr.bf16.gmra.mxu1 %v3001_v32  ;;  %v3004_v57 = vld [vmem:[%s4396_s4 + $0xc] ss:$40 sps:$4 sm:$0xff]  }
 0x1c5   :  { %v1931_v24 = vmul.f32 %v1579_v35, %v4642_v38  ;;  %v2122_v31 = vpack.c.bf16 %v2041_v59, %v2040_v52  ;;  %2764 = vmatprep.subr.bf16.mxu1 %v2075_v51  ;;  %v1575_v22 = vrot.slane %v1138_v14, %v3674_v48  ;;  %v1767_v16 = vrot.slane %v1432_v50, %v3674_v48  ;;  %v4645_v52 = vld [vmem:[#allocation8_spill] sm:$0xff] }
 0x1c6   :  { %v2026_v53 = vmul.f32 %v1771_v20, %v4643_v27  ;;  %v2027_v5 = vmul.f32 %v1771_v20, %v4644_v41  ;;  %v2123_v37 = vpack.c.bf16 %v2043_v56, %v2042_v60  ;;  %v1603_v3 = vrot.slane %v1185_v33, %v3674_v48  ;;  %v4650_v60 = vld [vmem:[#allocation11_spill] sm:$0xff]  ;;  %2325 = vmatprep.mubr.bf16.mxu1 %v3004_v57 }
 0x1c7   :  { %v2067_v21 = vpack.c.bf16 %v1931_v24, %v1930_v18  ;;  %v1795_v30 = vrot.slane %v1479_v43, %v3674_v48  ;;  %v1571_v35 = vrot.slane %v1136_v63, %v3674_v48  ;;  %v4646_v20 = vunpack.c.l.bf16 %v4645_v52  ;;  %v3010_v63 = vld [vmem:[%s4396_s4 + $0x60] ss:$40 sps:$4 sm:$0xff]  }
 0x1c8   :  { %v2115_v7 = vpack.c.bf16 %v2027_v5, %v2026_v53  ;;  %2848 = vmatprep.subr.bf16.mxu0 %v2123_v37  ;;  %v4647_v14 = vunpack.c.h.bf16 %v4645_v52  ;;  %v4648_v33 = vunpack.c.l.bf16 %v4630_v6  ;;  %v4649_v5 = vunpack.c.h.bf16 %v4630_v6  ;;  %v4095_v6 = vld [vmem:[%s4392_s0 + $0xc0] sm:$0xff]   ;;  %2383 = vmatmul.mubr.bf16.gmra.mxu0 %v3010_v63 }
 0x1c9   :  { %v1928_v59 = vmul.f32 %v1575_v22, %v4646_v20  ;;  %v939_v32 = vunpack.c.h.bf16 %v4014_v10  ;;  %2765 = vmatpush3.bf16.msra.mxu1 %v2067_v21  ;;  %v4651_v56 = vunpack.c.l.bf16 %v4650_v60  ;;  %v4652_v38 = vunpack.c.h.bf16 %v4650_v60  ;;  %v4655_v20 = vld [vmem:[#allocation12_spill] sm:$0xff] }
 0x1ca   :  { %v1929_v50 = vmul.f32 %v1575_v22, %v4647_v14  ;;  %v2024_v51 = vmul.f32 %v1767_v16, %v4648_v33  ;;  %v2025_v43 = vmul.f32 %v1767_v16, %v4649_v5  ;;  %2849 = vmatpush3.bf16.msra.mxu0 %v2115_v7  ;;  %v4653_v27 = vunpack.c.l.bf16 %v4554_v46  ;;  %2766 = vmatprep.subr.bf16.mxu1 %v2074_v9 }
 0x1cb   :  { %v1942_v18 = vmul.f32 %v1603_v3, %v4651_v56  ;;  %v1943_v24 = vmul.f32 %v1603_v3, %v4652_v38  ;;  %v952_v41 = vunpack.c.l.bf16 %v4095_v6  ;;  %2850 = vmatprep.subr.bf16.mxu0 %v2122_v31  ;;  %v4654_v16 = vunpack.c.h.bf16 %v4554_v46  ;;  %v3016_v31 = vld [vmem:[%s4396_s4 + $0x24] ss:$40 sps:$4 sm:$0xff]  }
 0x1cc   :  { %v2038_v53 = vmul.f32 %v1795_v30, %v4653_v27  ;;  %v2066_v37 = vpack.c.bf16 %v1929_v50, %v1928_v59  ;;  %v2114_v22 = vpack.c.bf16 %v2025_v43, %v2024_v51  ;;  %v4656_v3 = vunpack.c.l.bf16 %v4655_v20  ;;  %2472 = vmatprep.mubr.bf16.mxu0 %v3016_v31 }
 0x1cd   :  { %v2039_v21 = vmul.f32 %v1795_v30, %v4654_v16  ;;  %v2073_v7 = vpack.c.bf16 %v1943_v24, %v1942_v18  ;;  %v4657_v33 = vunpack.c.h.bf16 %v4655_v20  ;;  %v1763_v56 = vrot.slane %v4023_v23, %v3674_v48  ;;  %v4665_v16 = vld [vmem:[#allocation16_spill] sm:$0xff] }
 0x1ce   :  { %v1926_v14 = vmul.f32 %v1571_v35, %v4656_v3  ;;  %v1599_v46 = vrot.slane %v3983_v2, %v3674_v48  ;;  %v1791_v30 = vrot.slane %v4003_v45, %v3674_v48  ;;  %v1567_v59 = vrot.slane %v4006_v19, %v3674_v48  ;;  %2767 = vmatpush3.bf16.msra.mxu1 %v2066_v37  ;;  %v4123_v2 = vld [vmem:[%s4392_s0 + $0x80] sm:$0xff]  }
 0x1cf   :  { %v1927_v5 = vmul.f32 %v1571_v35, %v4657_v33  ;;  %v2121_v9 = vpack.c.bf16 %v2039_v21, %v2038_v53  ;;  %v953_v35 = vunpack.c.h.bf16 %v4095_v6  ;;  %2851 = vmatpush3.bf16.msra.mxu0 %v2114_v22  ;;  %v4658_v57 = vunpack.c.l.bf16 %v4650_v60  ;;  %2768 = vmatprep.subr.bf16.mxu1 %v2073_v7  ;;  %v4660_v19 = vld [vmem:[#allocation14_spill] sm:$0xff] }
 0x1d0   :  { %v4659_v51 = vmov %v4652_v38  ;;  %v936_v45 = vunpack.c.l.bf16 %v4123_v2  ;;  %v4661_v63 = vunpack.c.l.bf16 %v4660_v19  ;;  %v4662_v38 = vunpack.c.h.bf16 %v4660_v19 }
 0x1d1   :  { %v2065_v23 = vpack.c.bf16 %v1927_v5, %v1926_v14  ;;  %v2022_v50 = vmul.f32 %v1763_v56, %v4658_v57  ;;  %v2023_v43 = vmul.f32 %v1763_v56, %v4659_v51  ;;  %2852 = vmatprep.subr.bf16.mxu0 %v2121_v9  ;;  %v4663_v27 = vunpack.c.l.bf16 %v4555_v28 }
 0x1d2   :  { %v1940_v18 = vmul.f32 %v1599_v46, %v4661_v63  ;;  %v1941_v24 = vmul.f32 %v1599_v46, %v4662_v38  ;;  %v4664_v37 = vunpack.c.h.bf16 %v4555_v28  ;;  %v4666_v21 = vunpack.c.l.bf16 %v4665_v16 }
 0x1d3   :  { %v2036_v53 = vmul.f32 %v1791_v30, %v4663_v27  ;;  %v2113_v60 = vpack.c.bf16 %v2023_v43, %v2022_v50  ;;  %v4667_v14 = vunpack.c.h.bf16 %v4665_v16  ;;  %v1759_v5 = vrot.slane %v4009_v15, %v3674_v48  ;;  %2769 = vmatpush3.bf16.msra.mxu1 %v2065_v23 }
 0x1d4   :  { %v2037_v22 = vmul.f32 %v1791_v30, %v4664_v37  ;;  %v1924_v3 = vmul.f32 %v1567_v59, %v4666_v21  ;;  %v2072_v33 = vpack.c.bf16 %v1941_v24, %v1940_v18  ;;  %v1178_v56 = vrot.slane %v1156_v55, %v3669_v34 }
 0x1d5   :  { %v1925_v7 = vmul.f32 %v1567_v59, %v4667_v14  ;;  %v1450_v28 = vcombine.high %v3991_v13, %v3991_v13  ;;  %v937_v9 = vunpack.c.h.bf16 %v4123_v2  ;;  %2853 = vmatpush3.bf16.msra.mxu0 %v2113_v60  ;;  %v1099_v31 = vrot.slane %v4628_v62, %v3669_v34  ;;  %v3017_v2 = vld [vmem:[%s4396_s4 + $0x6c] ss:$40 sps:$4 sm:$0xff]  }
 0x1d6   :  { %v2120_v46 = vpack.c.bf16 %v2037_v22, %v2036_v53  ;;  %2770 = vmatprep.subr.bf16.mxu1 %v2072_v33  ;;  %v4668_v15 = vmov %v4661_v63  ;;  %v4669_v57 = vmov %v4662_v38  ;;  %v1188_v55 = vcombine.high %v1178_v56, %v1178_v56 }
 0x1d7   :  { %v2064_v30 = vpack.c.bf16 %v1925_v7, %v1924_v3  ;;  %v2020_v59 = vmul.f32 %v1759_v5, %v4668_v15  ;;  %v2021_v50 = vmul.f32 %v1759_v5, %v4669_v57  ;;  %v1472_v51 = vrot.slane %v1450_v28, %v3669_v34 }
 0x1d8   :  { %2854 = vmatprep.subr.bf16.mxu0 %v2120_v46  ;;  %v1107_v43 = vcombine.high %v1099_v31, %v1099_v31  ;;  %v1393_v23 = vrot.slane %v4629_v25, %v3669_v34  ;;  %v1164_v63 = vrot.slane %v3975_v58, %v3669_v34  ;;  %v4160_v62 = vrot.slane %v3991_v13, %v3669_v34  ;;  %v4670_v58 = vld [vmem:[#allocation18_spill] sm:$0xff] }
 0x1d9   :  { %v2112_v18 = vpack.c.bf16 %v2021_v50, %v2020_v59  ;;  %v1595_v38 = vrot.slane %v1188_v55, %v3674_v48  ;;  %v1482_v19 = vcombine.high %v1472_v51, %v1472_v51  ;;  %v4164_v24 = vrot.slane %v1099_v31, %v3669_v34  ;;  %2771 = vmatpush3.bf16.msra.mxu1 %v2064_v30 }
 0x1da   :  { %v1129_v27 = vrot.slane %v1107_v43, %v3669_v34  ;;  %v1401_v53 = vcombine.high %v1393_v23, %v1393_v23  ;;  %v1186_v60 = vcombine.high %v1164_v63, %v1164_v63  ;;  %v1480_v25 = vcombine.high %v4160_v62, %v4160_v62  ;;  %v4675_v43 = vld [vmem:[#allocation22_spill] sm:$0xff] }
 0x1db   :  { %2855 = vmatpush3.bf16.msra.mxu0 %v2112_v18  ;;  %v4671_v37 = vunpack.c.l.bf16 %v4670_v58  ;;  %v4672_v22 = vunpack.c.h.bf16 %v4670_v58  ;;  %v1787_v3 = vrot.slane %v1482_v19, %v3674_v48  ;;  %v1137_v14 = vcombine.high %v4164_v24, %v4164_v24 }
 0x1dc   :  { %v1139_v7 = vcombine.high %v1129_v27, %v1129_v27  ;;  %v1423_v33 = vrot.slane %v1401_v53, %v3669_v34  ;;  %v1591_v5 = vrot.slane %v1186_v60, %v3674_v48  ;;  %v1783_v28 = vrot.slane %v1480_v25, %v3674_v48 }
 0x1dd   :  { %v1938_v13 = vmul.f32 %v1595_v38, %v4671_v37  ;;  %v1939_v21 = vmul.f32 %v1595_v38, %v4672_v22  ;;  %v4673_v30 = vunpack.c.l.bf16 %v4556_v54  ;;  %v4674_v15 = vunpack.c.h.bf16 %v4556_v54 }
 0x1de   :  { %v1559_v57 = vrot.slane %v1137_v14, %v3674_v48  ;;  %v1563_v50 = vrot.slane %v1139_v7, %v3674_v48  ;;  %v1433_v55 = vcombine.high %v1423_v33, %v1423_v33  ;;  %v4676_v18 = vunpack.c.l.bf16 %v4675_v43 }
 0x1df   :  { %v2071_v46 = vpack.c.bf16 %v1939_v21, %v1938_v13  ;;  %v2034_v31 = vmul.f32 %v1787_v3, %v4673_v30  ;;  %v2035_v59 = vmul.f32 %v1787_v3, %v4674_v15  ;;  %v4677_v19 = vunpack.c.h.bf16 %v4675_v43  ;;  %v4679_v13 = vld [vmem:[#allocation24_spill] sm:$0xff] }
 0x1e0   :  { %v1936_v38 = vmul.f32 %v1591_v5, %v4676_v18  ;;  %v4678_v25 = vunpack.c.l.bf16 %v4557_v42  ;;  %v2033_v54 = vmul.f32 %v1783_v28, %v973_v40  ;;  %v4680_v22 = vunpack.c.l.bf16 %v4679_v13  ;;  %v4681_v3 = vld [vmem:[#allocation20_spill] sm:$0xff] }
 0x1e1   :  { %v1937_v53 = vmul.f32 %v1591_v5, %v4677_v19  ;;  %2772 = vmatprep.subr.bf16.mxu1 %v2071_v46  ;;  %v2119_v60 = vpack.c.bf16 %v2035_v59, %v2034_v31  ;;  %v4682_v14 = vunpack.c.l.bf16 %v4681_v3  ;;  %v4683_v30 = vunpack.c.h.bf16 %v4681_v3 }
 0x1e2   :  { %v2032_v37 = vmul.f32 %v1783_v28, %v4678_v25  ;;  %v1920_v21 = vmul.f32 %v1559_v57, %v4680_v22  ;;  %v1755_v18 = vrot.slane %v1433_v55, %v3674_v48  ;;  %v4684_v31 = vunpack.c.h.bf16 %v4679_v13 }
 0x1e3   :  { %v1922_v7 = vmul.f32 %v1563_v50, %v4682_v14  ;;  %v1923_v15 = vmul.f32 %v1563_v50, %v4683_v30  ;;  %v2070_v5 = vpack.c.bf16 %v1937_v53, %v1936_v38  ;;  %2856 = vmatprep.subr.bf16.mxu0 %v2119_v60  ;;  %v1409_v42 = vrot.slane %v1393_v23, %v3669_v34 }
 0x1e4   :  { %v2118_v46 = vpack.c.bf16 %v2033_v54, %v2032_v37  ;;  %v1921_v59 = vmul.f32 %v1559_v57, %v4684_v31  ;;  %v1587_v40 = vrot.slane %v1178_v56, %v3674_v48  ;;  %v4685_v19 = vunpack.c.l.bf16 %v4670_v58 }
 0x1e5   :  { %v2063_v28 = vpack.c.bf16 %v1923_v15, %v1922_v7  ;;  %v4686_v22 = vunpack.c.h.bf16 %v4670_v58  ;;  %v1779_v50 = vrot.slane %v1472_v51, %v3674_v48  ;;  %v1431_v38 = vcombine.high %v1409_v42, %v1409_v42 }
 0x1e6   :  { %v2018_v25 = vmul.f32 %v1755_v18, %v4685_v19  ;;  %v2062_v55 = vpack.c.bf16 %v1921_v59, %v1920_v21  ;;  %v1934_v53 = vmul.f32 %v1587_v40, %v954_v1  ;;  %v1935_v57 = vmul.f32 %v1587_v40, %v955_v4 }
 0x1e7   :  { %v2019_v14 = vmul.f32 %v1755_v18, %v4686_v22  ;;  %2773 = vmatpush3.bf16.msra.mxu1 %v2063_v28  ;;  %v2030_v56 = vmul.f32 %v1779_v50, %v970_v36  ;;  %v2031_v60 = vmul.f32 %v1779_v50, %v971_v49  ;;  %v1555_v58 = vrot.slane %v1129_v27, %v3674_v48  ;;  %v4692_v22 = vld [vmem:[#allocation38_spill] sm:$0xff] }
 0x1e8   :  { %2774 = vmatprep.subr.bf16.mxu1 %v2070_v5  ;;  %v1751_v51 = vrot.slane %v1431_v38, %v3674_v48  ;;  %v2069_v37 = vpack.c.bf16 %v1935_v57, %v1934_v53  ;;  %v1747_v54 = vrot.slane %v1423_v33, %v3674_v48  ;;  %v1583_v21 = vrot.slane %v1164_v63, %v3674_v48 }
 0x1e9   :  { %v2111_v23 = vpack.c.bf16 %v2019_v14, %v2018_v25  ;;  %v2117_v7 = vpack.c.bf16 %v2031_v60, %v2030_v56  ;;  %v4687_v30 = vunpack.c.l.bf16 %v4014_v10  ;;  %v1919_v36 = vmul.f32 %v1555_v58, %v939_v32  ;;  %v4693_v14 = vld [vmem:[#allocation6_spill] sm:$0xff] }
 0x1ea   :  { %v1775_v0 = vrot.slane %v4160_v62, %v3674_v48  ;;  %v4688_v49 = vunpack.c.l.bf16 %v4675_v43  ;;  %v4689_v18 = vunpack.c.h.bf16 %v4675_v43  ;;  %v2014_v63 = vmul.f32 %v1747_v54, %v954_v1 }
 0x1eb   :  { %2857 = vmatpush3.bf16.msra.mxu0 %v2111_v23  ;;  %v1918_v15 = vmul.f32 %v1555_v58, %v4687_v30  ;;  %v2015_v5 = vmul.f32 %v1747_v54, %v955_v4  ;;  %2775 = vmatpush3.bf16.msra.mxu1 %v2062_v55  ;;  %v1932_v59 = vmul.f32 %v1583_v21, %v952_v41  ;;  %v4691_v19 = vunpack.c.h.bf16 %v3899_v39  ;;  %v4694_v55 = vld [vmem:[#allocation37_spill] sm:$0xff] }
 0x1ec   :  { %2858 = vmatprep.subr.bf16.mxu0 %v2118_v46  ;;  %v2016_v27 = vmul.f32 %v1751_v51, %v4688_v49  ;;  %v2017_v33 = vmul.f32 %v1751_v51, %v4689_v18  ;;  %v1933_v62 = vmul.f32 %v1583_v21, %v953_v35  ;;  %v4690_v46 = vunpack.c.l.bf16 %v4597_v47  ;;  %2776 = vmatprep.subr.bf16.mxu1 %v2069_v37  ;;  %v3002_v51 = vld [vmem:[%s4396_s4 + $0x8] ss:$40 sps:$4 sm:$0xff]  }
 0x1ed   :  { %v2061_v31 = vpack.c.bf16 %v1919_v36, %v1918_v15  ;;  %v2109_v43 = vpack.c.bf16 %v2015_v5, %v2014_v63  ;;  %v2029_v1 = vmul.f32 %v1775_v0, %v4691_v19  ;;  %v1551_v61 = vrot.slane %v4164_v24, %v3674_v48 }
 0x1ee   :  { %v2028_v40 = vmul.f32 %v1775_v0, %v4690_v46  ;;  %v2110_v28 = vpack.c.bf16 %v2017_v33, %v2016_v27  ;;  %v2068_v4 = vpack.c.bf16 %v1933_v62, %v1932_v59  ;;  %v1743_v25 = vrot.slane %v1409_v42, %v3674_v48  ;;  %v3014_v0 = vld [vmem:[%s4396_s4 + $0x20] ss:$40 sps:$4 sm:$0xff]   ;;  %v3020_v33 = vld [vmem:[%s4396_s4 + $0x74] ss:$40 sps:$4 sm:$0xff]  }
 0x1ef   :  { %v901_v50 = vmul.f32 %v4693_v14, %v4692_v22  ;;  %v900_v38 = vmul.f32 %v4693_v14, %v4694_v55  ;;  %v1916_v53 = vmul.f32 %v1551_v61, %v936_v45  ;;  %v1917_v39 = vmul.f32 %v1551_v61, %v937_v9  ;;  %2777 = vmatpush3.bf16.msra.mxu1 %v2061_v31 }
 0x1f0   :  { %2859 = vmatpush3.bf16.msra.mxu0 %v2110_v28  ;;  %v2116_v47 = vpack.c.bf16 %v2029_v1, %v2028_v40  ;;  %v2012_v24 = vmul.f32 %v1743_v25, %v952_v41  ;;  %v2013_v42 = vmul.f32 %v1743_v25, %v953_v35  ;;  %2778 = vmatprep.subr.bf16.mxu1 %v2068_v4  ;;  %v3005_v35 = vld [vmem:[%s4396_s4 + $0x5c] ss:$40 sps:$4 sm:$0xff]   ;;  %v4695_v1 = vunpack.c.l.bf16 %v4640_v8 }
 0x1f1   :  { %2860 = vmatprep.subr.bf16.mxu0 %v2117_v7  ;;  %v1337_v57 = vcombine.high %v901_v50, %v901_v50  ;;  %v2060_v23 = vpack.c.bf16 %v1917_v39, %v1916_v53  ;;  %v1288_v56 = vcombine.high %v900_v38, %v900_v38  ;;  %v1344_v54 = vrot.slane %v901_v50, %v3669_v34 }
 0x1f2   :  { %v2108_v60 = vpack.c.bf16 %v2013_v42, %v2012_v24  ;;  %v1295_v36 = vrot.slane %v900_v38, %v3669_v34  ;;  %v4696_v4 = vunpack.c.h.bf16 %v4640_v8  ;;  %v4697_v22 = vunpack.c.l.bf16 %v4645_v52  ;;  %v4699_v38 = vld [vmem:[#allocation2_spill] sm:$0xff] }
 0x1f3   :  { %v1351_v58 = vrot.slane %v1337_v57, %v3669_v34  ;;  %v1302_v37 = vrot.slane %v1288_v56, %v3669_v34  ;;  %2779 = vmatpush3.bf16.msra.mxu1 %v2060_v23  ;;  %v1352_v18 = vcombine.high %v1344_v54, %v1344_v54  ;;  %v4698_v50 = vunpack.c.h.bf16 %v4645_v52 }
 0x1f4   :  { %2861 = vmatpush3.bf16.msra.mxu0 %v2109_v43  ;;  %v1303_v62 = vcombine.high %v1295_v36, %v1295_v36  ;;  %v3007_v43 = vld [vmem:[%s4396_s4 + $0x58] ss:$40 sps:$4 sm:$0xff]   ;;  %v4701_v39 = vunpack.c.h.bf16 %v4699_v38  ;;  %v1360_v8 = vrot.slane %v1344_v54, %v3669_v34  ;;  %v4706_v54 = vunpack.c.h.bf16 %v4655_v20 }
 0x1f5   :  { %2862 = vmatprep.subr.bf16.mxu0 %v2116_v47  ;;  %v1353_v6 = vcombine.high %v1351_v58, %v1351_v58  ;;  %v1367_v41 = vrot.slane %v1351_v58, %v3669_v34  ;;  %v1304_v21 = vcombine.high %v1302_v37, %v1302_v37  ;;  %v1318_v7 = vrot.slane %v1302_v37, %v3669_v34 }
 0x1f6   :  { %2326 = vmatmul.mubr.bf16.vlgmr.msra.gmra.mxu1 %v3002_v51  ;;  %v1374_v19 = vrot.slane %v1352_v18, %v3669_v34  ;;  %v4700_v47 = vunpack.c.l.bf16 %v4699_v38  ;;  %v1325_v23 = vrot.slane %v1303_v62, %v3669_v34  ;;  %v1382_v18 = vcombine.high %v1360_v8, %v1360_v8 }
 0x1f7   :  { %v1381_v30 = vrot.slane %v1353_v6, %v3669_v34  ;;  %v1383_v15 = vcombine.high %v1367_v41, %v1367_v41  ;;  %v1332_v49 = vrot.slane %v1304_v21, %v3669_v34  ;;  %v1334_v27 = vcombine.high %v1318_v7, %v1318_v7  ;;  %2333 = vmatprep.mubr.bf16.mxu1 %v3005_v35  ;;  %v3013_v35 = vld [vmem:[%s4396_s4 + $0x1c] ss:$40 sps:$4 sm:$0xff]  }
 0x1f8   :  { %2863 = vmatpush3.bf16.msra.mxu0 %v2108_v60  ;;  %v1727_v57 = vrot.slane %v1367_v41, %v3674_v48  ;;  %v4702_v60 = vld [vmem:[#allocation5_spill] sm:$0xff]  ;;  %v4705_v21 = vunpack.c.l.bf16 %v4655_v20  ;;  %v1335_v62 = vcombine.high %v1325_v23, %v1325_v23 }
 0x1f9   :  { %v1385_v63 = vcombine.high %v1381_v30, %v1381_v30  ;;  %v1735_v5 = vrot.slane %v1383_v15, %v3674_v48  ;;  %v1336_v31 = vcombine.high %v1332_v49, %v1332_v49  ;;  %v1703_v40 = vrot.slane %v1334_v27, %v3674_v48  ;;  %v3022_v27 = vld [vmem:[%s4396_s4 + $0x70] ss:$40 sps:$4 sm:$0xff]  }
 0x1fa   :  { %v1731_v28 = vrot.slane %v1381_v30, %v3674_v48  ;;  %v4703_v58 = vunpack.c.l.bf16 %v4702_v60  ;;  %v4704_v52 = vunpack.c.h.bf16 %v4702_v60  ;;  %v1699_v6 = vrot.slane %v1332_v49, %v3674_v48 }
 0x1fb   :  { %v1739_v59 = vrot.slane %v1385_v63, %v3674_v48  ;;  %2473 = vmatmul.mubr.bf16.vlgmr.msra.gmra.mxu0 %v3014_v0  ;;  %v1707_v46 = vrot.slane %v1336_v31, %v3674_v48  ;;  %v2008_v14 = vmul.f32 %v1735_v5, %v4697_v22  ;;  %v2009_v55 = vmul.f32 %v1735_v5, %v4698_v50 }
 0x1fc   :  { %2480 = vmatprep.mubr.bf16.mxu0 %v3020_v33  ;;  %v1992_v51 = vmul.f32 %v1703_v40, %v4703_v58  ;;  %v1993_v37 = vmul.f32 %v1703_v40, %v4704_v52  ;;  %v2006_v30 = vmul.f32 %v1731_v28, %v4705_v21  ;;  %v2007_v15 = vmul.f32 %v1731_v28, %v4706_v54 }
 0x1fd   :  { %v2010_v61 = vmul.f32 %v1739_v59, %v4695_v1  ;;  %v2011_v25 = vmul.f32 %v1739_v59, %v4696_v4  ;;  %v1994_v53 = vmul.f32 %v1707_v46, %v4700_v47  ;;  %v1995_v24 = vmul.f32 %v1707_v46, %v4701_v39 }
 0x1fe   :  { %2334 = vmatmul.mubr.bf16.gmra.mxu1 %v3007_v43  ;;  %v2106_v41 = vpack.c.bf16 %v2009_v55, %v2008_v14  ;;  %v1384_v0 = vcombine.high %v1374_v19, %v1374_v19  ;;  %v1695_v49 = vrot.slane %v1318_v7, %v3674_v48  ;;  %v1311_v33 = vrot.slane %v1295_v36, %v3669_v34 }
 0x1ff   :  { %v2107_v42 = vpack.c.bf16 %v2011_v25, %v2010_v61  ;;  %v2099_v56 = vpack.c.bf16 %v1995_v24, %v1994_v53  ;;  %v2098_v63 = vpack.c.bf16 %v1993_v37, %v1992_v51  ;;  %v4707_v5 = vunpack.c.l.bf16 %v4532_v29  ;;  %2423 = vmatprep.mubr.bf16.mxu1 %v3013_v35 }
 0x200   :  { %v4708_v59 = vunpack.c.h.bf16 %v4532_v29  ;;  %v2105_v46 = vpack.c.bf16 %v2007_v15, %v2006_v30  ;;  %v4709_v40 = vunpack.c.l.bf16 %v4665_v16  ;;  %v4710_v43 = vunpack.c.h.bf16 %v4665_v16 }
 0x201   :  { %2820 = vmatprep.subr.bf16.mxu1 %v2107_v42  ;;  %v1990_v31 = vmul.f32 %v1699_v6, %v4707_v5  ;;  %v1723_v7 = vrot.slane %v1384_v0, %v3674_v48  ;;  %v4711_v34 = vunpack.c.l.bf16 %v4536_v11  ;;  %v4712_v29 = vunpack.c.h.bf16 %v4536_v11 }
 0x202   :  { %2821 = vmatpush3.bf16.msra.mxu1 %v2099_v56  ;;  %v1991_v20 = vmul.f32 %v1699_v6, %v4708_v59  ;;  %v2004_v28 = vmul.f32 %v1727_v57, %v4709_v40  ;;  %v2005_v1 = vmul.f32 %v1727_v57, %v4710_v43  ;;  %v1691_v25 = vrot.slane %v1335_v62, %v3674_v48 }
 0x203   :  { %2822 = vmatprep.subr.bf16.mxu1 %v2106_v41  ;;  %2481 = vmatmul.mubr.bf16.gmra.mxu0 %v3022_v27  ;;  %v1988_v36 = vmul.f32 %v1695_v49, %v4711_v34  ;;  %v1989_v4 = vmul.f32 %v1695_v49, %v4712_v29  ;;  %v1333_v22 = vcombine.high %v1311_v33, %v1311_v33  ;;  %v4713_v50 = vunpack.c.l.bf16 %v4681_v3 }
 0x204   :  { %v2097_v61 = vpack.c.bf16 %v1991_v20, %v1990_v31  ;;  %v2104_v14 = vpack.c.bf16 %v2005_v1, %v2004_v28  ;;  %v4714_v55 = vunpack.c.h.bf16 %v4681_v3  ;;  %v1719_v47 = vrot.slane %v1382_v18, %v3674_v48 }
 0x205   :  { %v2002_v16 = vmul.f32 %v1723_v7, %v4713_v50  ;;  %v2096_v53 = vpack.c.bf16 %v1989_v4, %v1988_v36  ;;  %v4715_v39 = vunpack.c.l.bf16 %v4540_v17  ;;  %v4716_v11 = vunpack.c.h.bf16 %v4540_v17 }
 0x206   :  { %2823 = vmatpush3.bf16.msra.mxu1 %v2098_v63  ;;  %v2003_v38 = vmul.f32 %v1723_v7, %v4714_v55  ;;  %v1687_v57 = vrot.slane %v1333_v22, %v3674_v48  ;;  %v4717_v60 = vunpack.c.l.bf16 %v4679_v13  ;;  %v4718_v3 = vunpack.c.h.bf16 %v4679_v13 }
 0x207   :  { %2824 = vmatprep.subr.bf16.mxu1 %v2105_v46  ;;  %v1986_v24 = vmul.f32 %v1691_v25, %v4715_v39  ;;  %v1987_v42 = vmul.f32 %v1691_v25, %v4716_v11  ;;  %v1715_v52 = vrot.slane %v1374_v19, %v3674_v48  ;;  %v4719_v6 = vunpack.c.l.bf16 %v4544_v44 }
 0x208   :  { %v2103_v56 = vpack.c.bf16 %v2003_v38, %v2002_v16  ;;  %v2000_v58 = vmul.f32 %v1719_v47, %v4717_v60  ;;  %v2001_v51 = vmul.f32 %v1719_v47, %v4718_v3  ;;  %v4720_v17 = vunpack.c.h.bf16 %v4544_v44 }
 0x209   :  { %v2095_v37 = vpack.c.bf16 %v1987_v42, %v1986_v24  ;;  %v1984_v35 = vmul.f32 %v1687_v57, %v4719_v6  ;;  %v1683_v21 = vrot.slane %v1325_v23, %v3674_v48  ;;  %v4721_v54 = vunpack.c.l.bf16 %v4014_v10 }
 0x20a   :  { %2825 = vmatpush3.bf16.msra.mxu1 %v2097_v61  ;;  %v1985_v41 = vmul.f32 %v1687_v57, %v4720_v17  ;;  %v2102_v30 = vpack.c.bf16 %v2001_v51, %v2000_v58  ;;  %v1999_v13 = vmul.f32 %v1715_v52, %v939_v32  ;;  %v1711_v19 = vrot.slane %v1360_v8, %v3674_v48 }
 0x20b   :  { %2826 = vmatprep.subr.bf16.mxu1 %v2104_v14  ;;  %v1998_v15 = vmul.f32 %v1715_v52, %v4721_v54  ;;  %v4722_v27 = vunpack.c.l.bf16 %v4548_v26  ;;  %v4723_v44 = vunpack.c.h.bf16 %v4548_v26  ;;  %v1679_v23 = vrot.slane %v1311_v33, %v3674_v48 }
 0x20c   :  { %v2094_v0 = vpack.c.bf16 %v1985_v41, %v1984_v35  ;;  %v1996_v5 = vmul.f32 %v1711_v19, %v936_v45  ;;  %v1997_v10 = vmul.f32 %v1711_v19, %v937_v9  ;;  %v4724_v8 = vunpack.c.l.bf16 %v4550_v12  ;;  %v3011_v45 = vld [vmem:[%s4396_s4 + $0x18] ss:$40 sps:$4 sm:$0xff]  }
 0x20d   :  { %v1982_v49 = vmul.f32 %v1683_v21, %v4722_v27  ;;  %v1983_v18 = vmul.f32 %v1683_v21, %v4723_v44  ;;  %v2101_v63 = vpack.c.bf16 %v1999_v13, %v1998_v15  ;;  %v4725_v59 = vunpack.c.h.bf16 %v4550_v12  ;;  %v3019_v12 = vld [vmem:[%s4396_s4 + $0x68] ss:$40 sps:$4 sm:$0xff]  }
 0x20e   :  { %2827 = vmatpush3.bf16.msra.mxu1 %v2096_v53  ;;  %v1980_v31 = vmul.f32 %v1679_v23, %v4724_v8  ;;  %v2100_v26 = vpack.c.bf16 %v1997_v10, %v1996_v5 }
 0x20f   :  { %2828 = vmatprep.subr.bf16.mxu1 %v2103_v56  ;;  %v2093_v32 = vpack.c.bf16 %v1983_v18, %v1982_v49  ;;  %v1981_v20 = vmul.f32 %v1679_v23, %v4725_v59 }
 0x211   :  { %v2092_v48 = vpack.c.bf16 %v1981_v20, %v1980_v31 }
 0x212   :  { %2829 = vmatpush3.bf16.msra.mxu1 %v2095_v37 }
 0x213   :  { %2830 = vmatprep.subr.bf16.mxu1 %v2102_v30 }
 0x216   :  { %2831 = vmatpush3.bf16.msra.mxu1 %v2094_v0 }
 0x217   :  { %2832 = vmatprep.subr.bf16.mxu1 %v2101_v63 }
 0x21a   :  { %2833 = vmatpush3.bf16.msra.mxu1 %v2093_v32 }
 0x21b   :  { %2834 = vmatprep.subr.bf16.mxu1 %v2100_v26 }
 0x21e   :  { %2835 = vmatpush3.bf16.msra.mxu1 %v2092_v48 }
 0x221   :  { %2424 = vmatmul.mubr.bf16.vlgmr.msra.gmra.mxu1 %v3011_v45 }
 0x222   :  { %2431 = vmatprep.mubr.bf16.mxu1 %v3017_v2 }
 0x229   :  { %2432 = vmatmul.mubr.bf16.gmra.mxu1 %v3019_v12 }
 0x27c   :  { %v2752_v9 = vpop.f32.mrf.mxu1 }
 0x27e   :  { %v2753_v33 = vpop.f32.mrf.mxu1  ;;  %v2808_v28 = vpop.f32.mrf.mxu0 }
 0x27f   :  { %v2754_v57 = vadd.f32 %v2753_v33, %v2752_v9 }
 0x280   :  { %v2755_v62 = vpop.f32.mrf.mxu1  ;;  %v2809_v1 = vpop.f32.mrf.mxu0 }
 0x281   :  { %v2810_v51 = vadd.f32 %v2809_v1, %v2808_v28 }
 0x282   :  { %v2756_v46 = vpop.f32.mrf.mxu1  ;;  %v2811_v34 = vpop.f32.mrf.mxu0 }
 0x283   :  { %v2757_v52 = vadd.f32 %v2756_v46, %v2755_v62 }
 0x284   :  { %v2758_v40 = vpop.f32.mrf.mxu1  ;;  %v2812_v29 = vpop.f32.mrf.mxu0 }
 0x285   :  { %v2813_v54 = vadd.f32 %v2812_v29, %v2811_v34 }
 0x286   :  { %v2759_v43 = vpop.f32.mrf.mxu1 }
 0x287   :  { %v2760_v13 = vadd.f32 %v2759_v43, %v2758_v40 }
 0x288   :  { %v2761_v7 = vpop.f32.mrf.mxu1  ;;  %v2814_v4 = vpop.f32.mrf.mxu0 }
 0x28a   :  { %v2762_v36 = vpop.f32.mrf.mxu1  ;;  %v2815_v22 = vpop.f32.mrf.mxu0 }
 0x28b   :  { %v2816_v49 = vadd.f32 %v2815_v22, %v2814_v4  ;;  %v2763_v8 = vadd.f32 %v2762_v36, %v2761_v7 }
 0x28c   :  { %v2817_v50 = vpop.f32.mrf.mxu0 }
 0x28e   :  { %v2818_v55 = vpop.f32.mrf.mxu0 }
 0x28f   :  { %v2819_v20 = vadd.f32 %v2818_v55, %v2817_v50 }
 0x2b6   :  { %v2780_v61 = vpop.f32.mrf.mxu1 }
 0x2b8   :  { %v2781_v25 = vpop.f32.mrf.mxu1 }
 0x2b9   :  { %v2782_v42 = vadd.f32 %v2781_v25, %v2780_v61 }
 0x2ba   :  { %v2783_v14 = vpop.f32.mrf.mxu1 }
 0x2bb   :  { %v2864_v47 = vpop.f32.mrf.mxu0  ;;  %v2328_v3 = vadd.f32 %v2782_v42, %v2754_v57 }
 0x2bc   :  { %v2784_v16 = vpop.f32.mrf.mxu1 }
 0x2bd   :  { %v2865_v39 = vpop.f32.mrf.mxu0  ;;  %v2785_v56 = vadd.f32 %v2784_v16, %v2783_v14  ;;  %v2377_v41 = vadd.f32 %v2810_v51, %v2328_v3 }
 0x2be   :  { %v2786_v38 = vpop.f32.mrf.mxu1  ;;  %v2866_v0 = vadd.f32 %v2865_v39, %v2864_v47 }
 0x2bf   :  { %v2867_v11 = vpop.f32.mrf.mxu0  ;;  %v2331_v6 = vadd.f32 %v2785_v56, %v2757_v52 }
 0x2c0   :  { %v2787_v53 = vpop.f32.mrf.mxu1 }
 0x2c1   :  { %v2868_v58 = vpop.f32.mrf.mxu0  ;;  %v2788_v21 = vadd.f32 %v2787_v53, %v2786_v38  ;;  %v2380_v27 = vadd.f32 %v2813_v54, %v2331_v6 }
 0x2c2   :  { %v2789_v24 = vpop.f32.mrf.mxu1  ;;  %v2869_v59 = vadd.f32 %v2868_v58, %v2867_v11 }
 0x2c3   :  { %v2870_v17 = vpop.f32.mrf.mxu0  ;;  %v2336_v23 = vadd.f32 %v2788_v21, %v2760_v13 }
 0x2c4   :  { %v2790_v60 = vpop.f32.mrf.mxu1 }
 0x2c5   :  { %v2871_v18 = vpop.f32.mrf.mxu0  ;;  %v2791_v63 = vadd.f32 %v2790_v60, %v2789_v24  ;;  %v2385_v45 = vadd.f32 %v2816_v49, %v2336_v23 }
 0x2c6   :  { %v2872_v46 = vadd.f32 %v2871_v18, %v2870_v17 }
 0x2c7   :  { %v2873_v48 = vpop.f32.mrf.mxu0  ;;  %v2339_v2 = vadd.f32 %v2791_v63, %v2763_v8 }
 0x2c9   :  { %v2874_v28 = vpop.f32.mrf.mxu0  ;;  %v2388_v43 = vadd.f32 %v2819_v20, %v2339_v2 }
 0x2ca   :  { %v2875_v36 = vadd.f32 %v2874_v28, %v2873_v48 }
 0x2e1   :  { %v2836_v37 = vpop.f32.mrf.mxu1 }
 0x2e3   :  { %v2837_v35 = vpop.f32.mrf.mxu1 }
 0x2e4   :  { %v2838_v30 = vadd.f32 %v2837_v35, %v2836_v37 }
 0x2e5   :  { %v2839_v15 = vpop.f32.mrf.mxu1 }
 0x2e6   :  { %v2426_v19 = vadd.f32 %v2838_v30, %v2377_v41 }
 0x2e7   :  { %v2840_v44 = vpop.f32.mrf.mxu1 }
 0x2e8   :  { %v2841_v5 = vadd.f32 %v2840_v44, %v2839_v15  ;;  %v2475_v10 = vadd.f32 %v2866_v0, %v2426_v19 }
 0x2e9   :  { %v2842_v32 = vpop.f32.mrf.mxu1 }
 0x2ea   :  { %v2429_v31 = vadd.f32 %v2841_v5, %v2380_v27  ;;  %2489 = vadd.xlane.f32.xlu0 %v2475_v10 }
 0x2eb   :  { %v2843_v26 = vpop.f32.mrf.mxu1 }
 0x2ec   :  { %v2844_v12 = vadd.f32 %v2843_v26, %v2842_v32  ;;  %v2478_v9 = vadd.f32 %v2869_v59, %v2429_v31 }
 0x2ed   :  { %v2845_v33 = vpop.f32.mrf.mxu1 }
 0x2ee   :  { %v2434_v62 = vadd.f32 %v2844_v12, %v2385_v45  ;;  %2491 = vadd.xlane.f32.xlu1 %v2478_v9 }
 0x2ef   :  { %v2846_v40 = vpop.f32.mrf.mxu1 }
 0x2f0   :  { %v2847_v1 = vadd.f32 %v2846_v40, %v2845_v33  ;;  %v2483_v34 = vadd.f32 %v2872_v46, %v2434_v62 }
 0x2f2   :  { %v2437_v7 = vadd.f32 %v2847_v1, %v2388_v43  ;;  %2493 = vadd.xlane.f32.xlu0 %v2483_v34 }
 0x2f4   :  { %v2486_v61 = vadd.f32 %v2875_v36, %v2437_v7 }
 0x2f6   :  { %2495 = vadd.xlane.f32.xlu0 %v2486_v61 }
 0x373   :  { %v2490_v29 = vpop.xlane.xlu0 %2489 }
 0x374   :  { %v2498_v4 = vmul.f32 0.0078125, %v2490_v29 }
 0x376   :  { %v2502_v25 = vsub.f32 %v2475_v10, %v2498_v4 }
 0x377   :  { %v2492_v22 = vpop.xlane.xlu1 %2491 }
 0x378   :  { %v2499_v14 = vmul.f32 0.0078125, %v2492_v22  ;;  %v2506_v50 = vmul.f32 %v2502_v25, %v2502_v25 }
 0x37a   :  { %v2503_v16 = vsub.f32 %v2478_v9, %v2499_v14  ;;  %2510 = vadd.xlane.f32.xlu1 %v2506_v50 }
 0x37b   :  { %v2494_v55 = vpop.xlane.xlu0 %2493 }
 0x37c   :  { %v2500_v38 = vmul.f32 0.0078125, %v2494_v55  ;;  %v2507_v47 = vmul.f32 %v2503_v16, %v2503_v16 }
 0x37e   :  { %v2504_v53 = vsub.f32 %v2483_v34, %v2500_v38  ;;  %2512 = vadd.xlane.f32.xlu0 %v2507_v47 }
 0x37f   :  { %v2496_v39 = vpop.xlane.xlu0 %2495 }
 0x380   :  { %v2501_v24 = vmul.f32 0.0078125, %v2496_v39  ;;  %v2508_v11 = vmul.f32 %v2504_v53, %v2504_v53 }
 0x382   :  { %v2505_v42 = vsub.f32 %v2486_v61, %v2501_v24  ;;  %2514 = vadd.xlane.f32.xlu1 %v2508_v11 }
 0x384   :  { %v2509_v57 = vmul.f32 %v2505_v42, %v2505_v42 }
 0x386   :  { %2516 = vadd.xlane.f32.xlu0 %v2509_v57 }
 0x403   :  { %v2511_v56 = vpop.xlane.xlu1 %2510 }
 0x404   :  { %v2518_v60 = vmul.f32 0.0078125, %v2511_v56 }
 0x406   :  { %v2522_v58 = vadd.f32 1e-05, %v2518_v60 }
 0x407   :  { %v2513_v3 = vpop.xlane.xlu0 %2512 }
 0x408   :  { %3099 = vrsqrt.f32 %v2522_v58  ;;  %v2519_v51 = vmul.f32 0.0078125, %v2513_v3 }
 0x40a   :  { %v2523_v52 = vadd.f32 1e-05, %v2519_v51 }
 0x40b   :  { %v2515_v37 = vpop.xlane.xlu1 %2514 }
 0x40c   :  { %3101 = vrsqrt.f32 %v2523_v52  ;;  %v2520_v6 = vmul.f32 0.0078125, %v2515_v37 }
 0x40e   :  { %v2524_v35 = vadd.f32 1e-05, %v2520_v6 }
 0x40f   :  { %v2517_v17 = vpop.xlane.xlu0 %2516 }
 0x410   :  { %3103 = vrsqrt.f32 %v2524_v35  ;;  %v2521_v41 = vmul.f32 0.0078125, %v2517_v17 }
 0x412   :  { %v2525_v21 = vadd.f32 1e-05, %v2521_v41 }
 0x414   :  { %3105 = vrsqrt.f32 %v2525_v21 }
 0x415   :  { %v3100_v30 = vpop.eup %3099 }
 0x416   :  { %v2530_v54 = vmul.f32 %v3100_v30, %v2502_v25 }
 0x418   :  { %2534 = vst [vmem:[%s4398_s6] sm:$0xff] %v2530_v54 }
 0x419   :  { %v3102_v15 = vpop.eup %3101 }
 0x41a   :  { %v2531_v13 = vmul.f32 %v3102_v15, %v2503_v16 }
 0x41c   :  { %2535 = vst [vmem:[%s4398_s6 + $0x8] sm:$0xff] %v2531_v13 }
 0x41d   :  { %v3104_v19 = vpop.eup %3103 }
 0x41e   :  { %v2532_v0 = vmul.f32 %v3104_v19, %v2504_v53 }
 0x420   :  { %2536 = vst [vmem:[%s4398_s6 + $0x10] sm:$0xff] %v2532_v0 }
 0x421   :  { %v3106_v27 = vpop.eup %3105 }
 0x422   :  { %v2533_v49 = vmul.f32 %v3106_v27, %v2505_v42 }
 0x424   :  { %2537 = vst [vmem:[%s4398_s6 + $0x18] sm:$0xff] %v2533_v49 }

// kernel: convnet_forward.12
= control target key start
LH: loop header
LB: loop body
LE: loop exit
PB: predicated region body
PF: predicated region fallthrough
CT: control target
= control target key end

     0   :  { %v1851_v1 = vmov 0.0   ;;  %vm1852_vm0 = vmmov 0   ;;  %v1853_v7 = vmov 0   ;;  %vm497_vm1 = vcmask 1041409   ;;  %s2597_s0 = inlined_call_operand.vmem [shape: bf16[384,128], index: 0, kind: input, shape index: {}]   ;;  %s2598_s2 = inlined_call_operand.vmem [shape: bf16[48,384], index: 2, kind: input, shape index: {}]   ;;  %s2599_s3 = inlined_call_operand.vmem [shape: f32[48,1], index: 3, kind: input, shape index: {}]   ;;  %s2600_s1 = inlined_call_operand.vmem [shape: f32[24,128], index: 1, kind: input, shape index: {}]   ;;  %s2601_s4 = inlined_call_operand.vmem [shape: bf16[32,768], index: 4, kind: input, shape index: {}]   ;;  %s2602_s5 = inlined_call_operand.vmem [shape: f32[2,128], index: 5, kind: output, shape index: {0}]   ;;  %s2603_s6 = inlined_call_operand.vmem [shape: f32[32,128], index: 6, kind: output, shape index: {1}]  }
   0x1   :  { %v1893_v0 = vld [vmem:[%s2597_s0 + $0x78] sm:$0xff]   ;;  %1691 = vmatprep.subr.bf16.mxu1 %v1851_v1  ;;  %1707 = vmatprep.mubr.msk.bf16.mxu1 %vm1852_vm0, %v1851_v1  ;;  %v1911_v4 = vld [vmem:[%s2597_s0 + $0x70] sm:$0xff]   ;;  %v1926_v8 = vld [vmem:[%s2597_s0 + $0x68] sm:$0xff]  }
   0x2   :  { %2619 = vst [vmem:[#allocation2_spill] sm:$0xff] %v1893_v0  ;;  %v1899_v2 = vld [vmem:[%s2597_s0 + $0x38] sm:$0xff]   ;;  %2620 = vst [vmem:[#allocation3_spill] sm:$0xff] %v1911_v4  ;;  %v1916_v5 = vld [vmem:[%s2597_s0 + $0x30] sm:$0xff]   ;;  %1739 = vset.pattern.permute.xlu0 %v1853_v7  ;;  %1740 = vset.pattern.permute.xlu1 %v1853_v7 }
   0x3   :  { %v1904_v3 = vld [vmem:[%s2597_s0 + $0xb8] sm:$0xff]   ;;  %v1921_v6 = vld [vmem:[%s2597_s0 + $0xb0] sm:$0xff]   ;;  %1562 = vmatprep.subr.bf16.mxu0 %v1893_v0  ;;  %v1936_v9 = vld [vmem:[%s2597_s0 + $0x28] sm:$0xff]  }
   0x4   :  { %1563 = vmatpush3.bf16.msra.mxu0 %v1899_v2  ;;  %1692 = vmatpush3.bf16.msra.mxu1 %v1904_v3  ;;  %v1941_v10 = vld [vmem:[%s2597_s0 + $0xa8] sm:$0xff]   ;;  %v1946_v11 = vld [vmem:[%s2597_s0 + $0x60] sm:$0xff]   ;;  %v1968_v15 = vld [vmem:[%s2597_s0 + $0x58] sm:$0xff]  }
   0x5   :  { %1564 = vmatprep.subr.bf16.mxu0 %v1911_v4  ;;  %1693 = vmatprep.subr.bf16.mxu1 %v1851_v1  ;;  %v1951_v12 = vld [vmem:[%s2597_s0 + $0x20] sm:$0xff]   ;;  %v1977_v16 = vld [vmem:[%s2597_s0 + $0x18] sm:$0xff]   ;;  %v1987_v18 = vld [vmem:[%s2597_s0 + $0x50] sm:$0xff]  }
   0x6   :  { %v1958_v13 = vld [vmem:[%s2597_s0 + $0xa0] sm:$0xff]   ;;  %v1982_v17 = vld [vmem:[%s2597_s0 + $0x98] sm:$0xff]   ;;  %v2002_v21 = vld [vmem:[%s2597_s0 + $0x10] sm:$0xff]  }
   0x7   :  { %v1767_v14 = vld [vmem:[%s2598_s2 + $0x4] ss:$12 sps:$4 sm:$0xff]   ;;  %v89_v20 = vld [vmem:[%s2599_s3 + $0x18] sm:$0xff]  ;;  %v2012_v23 = vld [vmem:[%s2597_s0 + $0x48] sm:$0xff]  }
   0x8   :  { %1565 = vmatpush3.bf16.msra.mxu0 %v1916_v5  ;;  %1694 = vmatpush3.bf16.msra.mxu1 %v1921_v6  ;;  %v86_v19 = vld [vmem:[%s2599_s3] sm:$0xff]  ;;  %v2007_v22 = vld [vmem:[%s2597_s0 + $0x90] sm:$0xff]   ;;  %v87_v24 = vld [vmem:[%s2599_s3 + $0x8] sm:$0xff] }
   0x9   :  { %1566 = vmatprep.subr.bf16.mxu0 %v1926_v8  ;;  %1695 = vmatprep.subr.bf16.mxu1 %v1851_v1  ;;  %v90_v25 = vld [vmem:[%s2599_s3 + $0x20] sm:$0xff]  ;;  %v2027_v26 = vld [vmem:[%s2597_s0 + $0x8] sm:$0xff]   ;;  %v88_v29 = vld [vmem:[%s2599_s3 + $0x10] sm:$0xff] }
   0xa   :  { %346 = vmatprep.mubr.bf16.mxu0 %v1767_v14  ;;  %94 = vperm.xlu0 %1739, %v86_v19   ;;  %v2032_v27 = vld [vmem:[%s2597_s0 + $0x88] sm:$0xff]   ;;  %v2037_v28 = vld [vmem:[%s2597_s0 + $0x40] sm:$0xff]   ;;  %v1775_v39 = vld [vmem:[%s2598_s2 + $0x30] ss:$12 sps:$4 sm:$0xff]  }
   0xb   :  { %109 = vperm.xlu1 %1740, %v89_v20   ;;  %2621 = vst [vmem:[#allocation4_spill] sm:$0xff] %v2032_v27  ;;  %v91_v30 = vld [vmem:[%s2599_s3 + $0x28] sm:$0xff]  ;;  %v2052_v31 = vld [vmem:[%s2597_s0] sm:$0xff]  }
   0xc   :  { %1567 = vmatpush3.bf16.msra.mxu0 %v1936_v9  ;;  %1696 = vmatpush3.bf16.msra.mxu1 %v1941_v10  ;;  %v2057_v32 = vld [vmem:[%s2597_s0 + $0x80] sm:$0xff]   ;;  %v1768_v34 = vld [vmem:[%s2598_s2 + $0x8] ss:$12 sps:$4 sm:$0xff]  }
   0xd   :  { %1568 = vmatprep.subr.bf16.mxu0 %v1946_v11  ;;  %1697 = vmatprep.subr.bf16.mxu1 %v1851_v1  ;;  %v1765_v33 = vld [vmem:[%s2598_s2] ss:$12 sps:$4 sm:$0xff]   ;;  %v1769_v35 = vld [vmem:[%s2598_s2 + $0x1c] ss:$12 sps:$4 sm:$0xff]   ;;  %v1771_v36 = vld [vmem:[%s2598_s2 + $0x18] ss:$12 sps:$4 sm:$0xff]  }
   0xe   :  { %99 = vperm.xlu0 %1739, %v87_v24   ;;  %v1772_v37 = vld [vmem:[%s2598_s2 + $0x20] ss:$12 sps:$4 sm:$0xff]   ;;  %v1776_v40 = vld [vmem:[%s2598_s2 + $0x38] ss:$12 sps:$4 sm:$0xff]  }
   0xf   :  { %114 = vperm.xlu1 %1740, %v90_v25   ;;  %v1773_v38 = vld [vmem:[%s2598_s2 + $0x34] ss:$12 sps:$4 sm:$0xff]  }
  0x10   :  { %1569 = vmatpush3.bf16.msra.mxu0 %v1951_v12  ;;  %1698 = vmatpush3.bf16.msra.mxu1 %v1958_v13 }
  0x11   :  { %1570 = vmatprep.subr.bf16.mxu0 %v1968_v15  ;;  %1699 = vmatprep.subr.bf16.mxu1 %v1851_v1 }
  0x12   :  { %104 = vperm.xlu0 %1739, %v88_v29  }
  0x13   :  { %119 = vperm.xlu1 %1740, %v91_v30  }
  0x14   :  { %1571 = vmatpush3.bf16.msra.mxu0 %v1977_v16  ;;  %1700 = vmatpush3.bf16.msra.mxu1 %v1982_v17 }
  0x15   :  { %1572 = vmatprep.subr.bf16.mxu0 %v1987_v18  ;;  %1701 = vmatprep.subr.bf16.mxu1 %v1851_v1 }
  0x18   :  { %1573 = vmatpush3.bf16.msra.mxu0 %v2002_v21  ;;  %1702 = vmatpush3.bf16.msra.mxu1 %v2007_v22 }
  0x19   :  { %1574 = vmatprep.subr.bf16.mxu0 %v2012_v23  ;;  %1703 = vmatprep.subr.bf16.mxu1 %v1851_v1 }
  0x1c   :  { %1575 = vmatpush3.bf16.msra.mxu0 %v2027_v26  ;;  %1704 = vmatpush3.bf16.msra.mxu1 %v2032_v27 }
  0x1d   :  { %1576 = vmatprep.subr.bf16.mxu0 %v2037_v28  ;;  %1705 = vmatprep.subr.bf16.mxu1 %v1851_v1 }
  0x20   :  { %1577 = vmatpush3.bf16.msra.mxu0 %v2052_v31  ;;  %1706 = vmatpush3.bf16.msra.mxu1 %v2057_v32 }
  0x23   :  { %347 = vmatmul.mubr.bf16.vlgmr.msra.gmra.mxu0 %v1765_v33  ;;  %1708 = vmatmul.mubr.bf16.vlgmr.msra.gmra.mxu1 %v1768_v34 }
  0x24   :  { %354 = vmatprep.mubr.bf16.mxu0 %v1769_v35  ;;  %1711 = vmatprep.mubr.msk.bf16.mxu1 %vm1852_vm0, %v1851_v1 }
  0x2b   :  { %355 = vmatmul.mubr.bf16.gmra.mxu0 %v1771_v36  ;;  %1712 = vmatmul.mubr.bf16.gmra.mxu1 %v1772_v37 }
  0x2c   :  { %362 = vmatprep.mubr.bf16.mxu0 %v1773_v38  ;;  %1715 = vmatprep.mubr.msk.bf16.mxu1 %vm1852_vm0, %v1851_v1 }
  0x33   :  { %363 = vmatmul.mubr.bf16.gmra.mxu0 %v1775_v39  ;;  %1716 = vmatmul.mubr.bf16.gmra.mxu1 %v1776_v40 }
  0x85   :  { %v95_v49 = vpop.permute.xlu0 %94 }
  0x86   :  { %v110_v55 = vpop.permute.xlu1 %109 }
  0x89   :  { %v100_v58 = vpop.permute.xlu0 %99 }
  0x8a   :  { %v115_v14 = vpop.permute.xlu1 %114 }
  0x8d   :  { %v105_v33 = vpop.permute.xlu0 %104 }
  0xe3   :  { %v1578_v41 = vpop.f32.mrf.mxu0  ;;  %v405_v42 = vpop.f32.mrf.mxu1 }
  0xe5   :  { %v1579_v43 = vpop.f32.mrf.mxu0  ;;  %v1709_v44 = vpop.f32.mrf.mxu1 }
  0xe6   :  { %v1580_v54 = vadd.f32 %v1579_v43, %v1578_v41 }
  0xe7   :  { %v1581_v45 = vpop.f32.mrf.mxu0  ;;  %v408_v46 = vpop.f32.mrf.mxu1 }
  0xe8   :  { %v349_v62 = vadd.f32 %v1580_v54, %v95_v49 }
  0xe9   :  { %v1582_v47 = vpop.f32.mrf.mxu0  ;;  %v1710_v48 = vpop.f32.mrf.mxu1 }
  0xea   :  { %v1583_v59 = vadd.f32 %v1582_v47, %v1581_v45  ;;  %v406_v30 = vadd.f32 %v405_v42, %v349_v62 }
  0xeb   :  { %v1584_v50 = vpop.f32.mrf.mxu0  ;;  %v413_v51 = vpop.f32.mrf.mxu1 }
  0xec   :  { %v352_v20 = vadd.f32 %v1583_v59, %v100_v58 }
  0xed   :  { %v1585_v52 = vpop.f32.mrf.mxu0  ;;  %v1713_v53 = vpop.f32.mrf.mxu1 }
  0xee   :  { %v1586_v24 = vadd.f32 %v1585_v52, %v1584_v50  ;;  %v409_v40 = vadd.f32 %v408_v46, %v352_v20  ;;  %v120_v53 = vpop.permute.xlu1 %119  ;;  %v73_v20 = vld [vmem:[%s2600_s1 + $0x10] sm:$0xff] }
  0xef   :  { %v1587_v56 = vpop.f32.mrf.mxu0  ;;  %v416_v57 = vpop.f32.mrf.mxu1 }
  0xf0   :  { %v357_v41 = vadd.f32 %v1586_v24, %v105_v33  ;;  %v1782_v24 = vld [vmem:[%s2601_s4 + $0xc] ss:$24 sps:$4 sm:$0xff]  }
  0xf1   :  { %v1588_v60 = vpop.f32.mrf.mxu0  ;;  %v1714_v61 = vpop.f32.mrf.mxu1  ;;  %1394 = vmatprep.mubr.bf16.mxu1 %v1782_v24 }
  0xf2   :  { %v1589_v63 = vadd.f32 %v1588_v60, %v1587_v56 }
  0xf3   :  { %v1590_v1 = vpop.f32.mrf.mxu0  ;;  %v421_v7 = vpop.f32.mrf.mxu1 }
  0xf4   :  { %v360_v19 = vadd.f32 %v1589_v63, %v110_v55  ;;  %v414_v55 = vadd.f32 %v413_v51, %v357_v41  ;;  %v71_v63 = vld [vmem:[%s2600_s1] sm:$0xff] }
  0xf5   :  { %v1591_v25 = vpop.f32.mrf.mxu0  ;;  %v1717_v29 = vpop.f32.mrf.mxu1 }
  0xf6   :  { %v417_v34 = vadd.f32 %v416_v57, %v360_v19  ;;  %v1592_v35 = vadd.f32 %v1591_v25, %v1590_v1  ;;  %v72_v1 = vld [vmem:[%s2600_s1 + $0x8] sm:$0xff] }
  0xf7   :  { %v1593_v36 = vpop.f32.mrf.mxu0  ;;  %v424_v37 = vpop.f32.mrf.mxu1  ;;  %v483_v19 = vadd.f32 %v72_v1, %v71_v63 }
  0xf8   :  { %v428_v38 = vmax.f32 %v406_v30, %v417_v34  ;;  %v365_v39 = vadd.f32 %v1592_v35, %v115_v14  ;;  %v1779_v14 = vld [vmem:[%s2601_s4 + $0x4] ss:$24 sps:$4 sm:$0xff]  }
  0xf9   :  { %v1594_v43 = vpop.f32.mrf.mxu0  ;;  %v1718_v44 = vpop.f32.mrf.mxu1  ;;  %1345 = vmatprep.mubr.bf16.mxu0 %v1779_v14  ;;  %v484_v25 = vadd.f32 %v483_v19, %v73_v20 }
  0xfa   :  { %v431_v45 = vsub.f32 %v406_v30, %v428_v38  ;;  %v434_v47 = vsub.f32 %v417_v34, %v428_v38  ;;  %v422_v48 = vadd.f32 %v421_v7, %v365_v39  ;;  %v1595_v49 = vadd.f32 %v1594_v43, %v1593_v36 }
  0xfb   :  { %v485_v34 = vrot.slane %v484_v25, 4 }
  0xfc   :  { %v437_v50 = vmul.f32 1.442695, %v431_v45  ;;  %v443_v52 = vmul.f32 1.442695, %v434_v47  ;;  %v429_v54 = vmax.f32 %v409_v40, %v422_v48  ;;  %v368_v42 = vadd.f32 %v1595_v49, %v120_v53 }
  0xfd   :  { %v486_v38 = vadd.f32 %v485_v34, %v484_v25 }
  0xfe   :  { %1819 = vpow2.f32 %v437_v50  ;;  %v432_v56 = vsub.f32 %v409_v40, %v429_v54  ;;  %v435_v57 = vsub.f32 %v422_v48, %v429_v54  ;;  %v425_v58 = vadd.f32 %v424_v37, %v368_v42 }
  0xff   :  { %1821 = vpow2.f32 %v443_v52  ;;  %v487_v43 = vrot.slane %v486_v38, 2 }
 0x100   :  { %v439_v59 = vmul.f32 1.442695, %v432_v56  ;;  %v445_v46 = vmul.f32 1.442695, %v435_v57  ;;  %v430_v60 = vmax.f32 %v414_v55, %v425_v58 }
 0x101   :  { %v488_v44 = vadd.f32 %v487_v43, %v486_v38 }
 0x102   :  { %1823 = vpow2.f32 %v439_v59  ;;  %v433_v61 = vsub.f32 %v414_v55, %v430_v60  ;;  %v436_v62 = vsub.f32 %v425_v58, %v430_v60 }
 0x103   :  { %1825 = vpow2.f32 %v445_v46  ;;  %v489_v47 = vrot.slane %v488_v44, 1 }
 0x104   :  { %v441_v51 = vmul.f32 1.442695, %v433_v61  ;;  %v447_v7 = vmul.f32 1.442695, %v436_v62 }
 0x105   :  { %v490_v54 = vadd.f32 %v489_v47, %v488_v44 }
 0x106   :  { %1827 = vpow2.f32 %v441_v51 }
 0x107   :  { %1829 = vpow2.f32 %v447_v7 }
 0x10b   :  { %v1820_v29 = vpop.eup %1819 }
 0x10c   :  { %v1822_v30 = vpop.eup %1821 }
 0x10d   :  { %v449_v33 = vadd.f32 %v1822_v30, %v1820_v29 }
 0x10f   :  { %v1824_v35 = vpop.eup %1823  ;;  %1831 = vrcp.f32 %v449_v33 }
 0x110   :  { %v1826_v36 = vpop.eup %1825 }
 0x111   :  { %v450_v37 = vadd.f32 %v1826_v36, %v1824_v35 }
 0x113   :  { %v1828_v39 = vpop.eup %1827  ;;  %1833 = vrcp.f32 %v450_v37 }
 0x114   :  { %v1830_v40 = vpop.eup %1829 }
 0x115   :  { %v451_v41 = vadd.f32 %v1830_v40, %v1828_v39 }
 0x117   :  { %1835 = vrcp.f32 %v451_v41 }
 0x118   :  { %1837 = vrcp.f32 %v490_v54  ;;  %v567_v54 = vlaneseq }
 0x11c   :  { %v1832_v45 = vpop.eup %1831 }
 0x11d   :  { %v455_v49 = vmul.f32 %v1832_v45, %v1820_v29  ;;  %v458_v53 = vmul.f32 %v1832_v45, %v1822_v30 }
 0x11f   :  { %v2112_v57 = vmul.f32 %v455_v49, %v71_v63  ;;  %v2114_v46 = vmul.f32 %v458_v53, %v71_v63  ;;  %v2604_v49 = vunpack.c.l.bf16 %v1911_v4  ;;  %v2605_v53 = vunpack.c.h.bf16 %v1911_v4 }
 0x120   :  { %v1834_v48 = vpop.eup %1833 }
 0x121   :  { %v456_v50 = vmul.f32 %v1834_v48, %v1824_v35  ;;  %v459_v52 = vmul.f32 %v1834_v48, %v1826_v36 }
 0x123   :  { %v2108_v42 = vmul.f32 %v459_v52, %v72_v1  ;;  %v2110_v55 = vmul.f32 %v456_v50, %v72_v1  ;;  %v1854_v50 = vmov 1966171168  }
 0x124   :  { %v1836_v56 = vpop.eup %1835  ;;  %v565_v52 = vunpack.c.l.s4 %v1854_v50 }
 0x125   :  { %2622 = vst [vmem:[#allocation5_spill] sm:$0xff] %v2108_v42  ;;  %v457_v58 = vmul.f32 %v1836_v56, %v1828_v39  ;;  %v460_v59 = vmul.f32 %v1836_v56, %v1830_v40  ;;  %v467_v62 = vadd.f32 %v2110_v55, %v2112_v57  ;;  %v475_v51 = vadd.f32 %v2108_v42, %v2114_v46 }
 0x126   :  { %v2610_v39 = vunpack.c.l.bf16 %v1893_v0  ;;  %v2614_v40 = vunpack.c.h.bf16 %v1893_v0 }
 0x127   :  { %v2116_v60 = vmul.f32 %v457_v58, %v73_v20  ;;  %v2118_v61 = vmul.f32 %v460_v59, %v73_v20  ;;  %v1838_v20 = vpop.eup %1837  ;;  %v2606_v58 = vunpack.c.l.bf16 %v1916_v5  ;;  %v2609_v59 = vunpack.c.h.bf16 %v1916_v5 }
 0x129   :  { %v468_v1 = vadd.f32 %v467_v62, %v2116_v60  ;;  %v476_v7 = vadd.f32 %v475_v51, %v2118_v61 }
 0x12b   :  { %v469_v14 = vrot.slane %v468_v1, 4  ;;  %v477_v19 = vrot.slane %v476_v7, 4 }
 0x12d   :  { %v470_v24 = vadd.f32 %v469_v14, %v468_v1  ;;  %v478_v63 = vadd.f32 %v477_v19, %v476_v7 }
 0x12f   :  { %v471_v25 = vrot.slane %v470_v24, 2  ;;  %v479_v29 = vrot.slane %v478_v63, 2 }
 0x131   :  { %v472_v30 = vadd.f32 %v471_v25, %v470_v24  ;;  %v480_v33 = vadd.f32 %v479_v29, %v478_v63 }
 0x133   :  { %v473_v34 = vrot.slane %v472_v30, 1  ;;  %v481_v35 = vrot.slane %v480_v33, 1 }
 0x135   :  { %v474_v36 = vadd.f32 %v473_v34, %v472_v30  ;;  %v482_v37 = vadd.f32 %v481_v35, %v480_v33  ;;  %v568_v34 = vshrl.u32 %v567_v54, 7 }
 0x137   :  { %1839 = vrcp.f32 %v474_v36  ;;  %v493_v38 = vmul.f32 %v1838_v20, %v482_v37  ;;  %v492_v43 = vmul.f32 %v1838_v20, %v474_v36  ;;  %v566_v20 = vunpack.c.0.s8 %v565_v52 }
 0x138   :  { %1841 = vrcp.f32 %v482_v37  ;;  %v2179_v30 = vsub.s32 0, %v568_v34 }
 0x139   :  { %v496_v44 = vrot.slane %v493_v38, 7  ;;  %v2166_v35 = vsub.s32 %v566_v20, %v568_v34 }
 0x13b   :  { %v498_v56 = vsel %vm497_vm1, %v496_v44, %v492_v43 }
 0x13c   :  { %500 = vst [vmem:[%s2602_s5] sm:$0x3] %v498_v56 }
 0x144   :  { %v1840_v44 = vpop.eup %1839 }
 0x145   :  { %v2172_v54 = vpop.eup %1841  ;;  %v504_v37 = vmul.f32 %v1840_v44, %v2110_v55  ;;  %v503_v38 = vmul.f32 %v1840_v44, %v2112_v57  ;;  %v505_v20 = vmul.f32 %v1840_v44, %v2116_v60 }
 0x146   :  { %2623 = vst [vmem:[#allocation6_spill] sm:$0xff] %v2172_v54  ;;  %v506_v56 = vmul.f32 %v2172_v54, %v2114_v46  ;;  %v2185_v52 = vmul.f32 %v2172_v54, %v2118_v61 }
 0x147   :  { %v612_v33 = vcombine.high %v504_v37, %v504_v37  ;;  %v563_v50 = vcombine.high %v503_v38, %v503_v38  ;;  %v661_v36 = vcombine.high %v505_v20, %v505_v20  ;;  %v2188_v55 = vrot.slane %v504_v37, %v2166_v35 }
 0x148   :  { %2624 = vst [vmem:[#allocation7_spill] sm:$0xff] %v2185_v52  ;;  %v710_v57 = vcombine.high %v506_v56, %v506_v56  ;;  %v2191_v60 = vrot.slane %v506_v56, %v2166_v35  ;;  %v2194_v34 = vrot.slane %v503_v38, %v2166_v35  ;;  %v2197_v44 = vrot.slane %v505_v20, %v2166_v35 }
 0x149   :  { %v626_v46 = vrot.slane %v612_v33, %v2166_v35  ;;  %v577_v61 = vrot.slane %v563_v50, %v2166_v35  ;;  %v675_v43 = vrot.slane %v661_v36, %v2166_v35 }
 0x14a   :  { %v724_v29 = vrot.slane %v710_v57, %v2166_v35 }
 0x14b   :  { %v628_v25 = vcombine.high %v626_v46, %v626_v46  ;;  %v579_v33 = vcombine.high %v577_v61, %v577_v61  ;;  %v677_v63 = vcombine.high %v675_v43, %v675_v43  ;;  %v2212_v50 = vrot.slane %v626_v46, %v2166_v35 }
 0x14c   :  { %v726_v36 = vcombine.high %v724_v29, %v724_v29  ;;  %v2215_v37 = vrot.slane %v724_v29, %v2166_v35  ;;  %v2218_v57 = vrot.slane %v577_v61, %v2166_v35  ;;  %v2221_v56 = vrot.slane %v675_v43, %v2166_v35 }
 0x14d   :  { %v656_v38 = vrot.slane %v628_v25, %v2166_v35  ;;  %v607_v20 = vrot.slane %v579_v33, %v2166_v35  ;;  %v705_v24 = vrot.slane %v677_v63, %v2166_v35  ;;  %v658_v46 = vcombine.high %v2212_v50, %v2212_v50 }
 0x14e   :  { %v754_v19 = vrot.slane %v726_v36, %v2166_v35  ;;  %v756_v29 = vcombine.high %v2215_v37, %v2215_v37  ;;  %v609_v61 = vcombine.high %v2218_v57, %v2218_v57  ;;  %v707_v43 = vcombine.high %v2221_v56, %v2221_v56 }
 0x14f   :  { %v660_v14 = vcombine.high %v656_v38, %v656_v38  ;;  %v611_v25 = vcombine.high %v607_v20, %v607_v20  ;;  %v709_v7 = vcombine.high %v705_v24, %v705_v24  ;;  %v916_v33 = vrot.slane %v658_v46, %v2179_v30 }
 0x150   :  { %v758_v63 = vcombine.high %v754_v19, %v754_v19  ;;  %v980_v1 = vrot.slane %v756_v29, %v2179_v30  ;;  %v884_v51 = vrot.slane %v609_v61, %v2179_v30  ;;  %v948_v36 = vrot.slane %v707_v43, %v2179_v30 }
 0x151   :  { %v920_v62 = vrot.slane %v660_v14, %v2179_v30  ;;  %v888_v48 = vrot.slane %v611_v25, %v2179_v30  ;;  %v952_v47 = vrot.slane %v709_v7, %v2179_v30  ;;  %v1125_v45 = vmul.f32 %v916_v33, %v2604_v49 }
 0x152   :  { %v984_v41 = vrot.slane %v758_v63, %v2179_v30  ;;  %v1126_v46 = vmul.f32 %v916_v33, %v2605_v53  ;;  %v1157_v29 = vmul.f32 %v980_v1, %v2606_v58  ;;  %v1158_v61 = vmul.f32 %v980_v1, %v2609_v59 }
 0x153   :  { %v1127_v14 = vmul.f32 %v920_v62, %v2610_v39  ;;  %v1128_v7 = vmul.f32 %v920_v62, %v2614_v40  ;;  %v2625_v43 = vunpack.c.l.bf16 %v1899_v2  ;;  %v2626_v63 = vunpack.c.h.bf16 %v1899_v2 }
 0x154   :  { %v2629_v1 = vunpack.c.l.bf16 %v1904_v3  ;;  %v2630_v39 = vunpack.c.h.bf16 %v1904_v3  ;;  %v1207_v40 = vpack.c.bf16 %v1126_v46, %v1125_v45  ;;  %v1223_v27 = vpack.c.bf16 %v1158_v61, %v1157_v29 }
 0x155   :  { %v1111_v25 = vmul.f32 %v888_v48, %v2625_v43  ;;  %v1112_v49 = vmul.f32 %v888_v48, %v2626_v63  ;;  %v2627_v33 = vmov %v2625_v43  ;;  %v2628_v58 = vmov %v2626_v63 }
 0x156   :  { %v1159_v53 = vmul.f32 %v984_v41, %v2627_v33  ;;  %v1160_v4 = vmul.f32 %v984_v41, %v2628_v58  ;;  %v1143_v59 = vmul.f32 %v952_v47, %v2629_v1  ;;  %v1144_v52 = vmul.f32 %v952_v47, %v2630_v39 }
 0x157   :  { %v1208_v0 = vpack.c.bf16 %v1128_v7, %v1127_v14  ;;  %v1200_v62 = vpack.c.bf16 %v1112_v49, %v1111_v25  ;;  %v2631_v48 = vunpack.c.l.bf16 %v1916_v5  ;;  %v2632_v33 = vunpack.c.h.bf16 %v1916_v5 }
 0x158   :  { %v1224_v43 = vpack.c.bf16 %v1160_v4, %v1159_v53  ;;  %v1216_v54 = vpack.c.bf16 %v1144_v52, %v1143_v59  ;;  %v2633_v2 = vunpack.c.l.bf16 %v1921_v6  ;;  %v2634_v58 = vunpack.c.h.bf16 %v1921_v6 }
 0x159   :  { %v1109_v63 = vmul.f32 %v884_v51, %v2631_v48  ;;  %v1110_v42 = vmul.f32 %v884_v51, %v2632_v33  ;;  %1607 = vmatprep.subr.bf16.mxu0 %v1208_v0  ;;  %v912_v39 = vrot.slane %v656_v38, %v2179_v30  ;;  %v976_v45 = vrot.slane %v754_v19, %v2179_v30 }
 0x15a   :  { %v1141_v41 = vmul.f32 %v948_v36, %v2633_v2  ;;  %v1142_v1 = vmul.f32 %v948_v36, %v2634_v58  ;;  %v526_v4 = vunpack.c.h.bf16 %v2037_v28  ;;  %1635 = vmatprep.subr.bf16.mxu1 %v1224_v43  ;;  %1608 = vmatpush3.bf16.msra.mxu0 %v1200_v62  ;;  %v880_v49 = vrot.slane %v607_v20, %v2179_v30 }
 0x15b   :  { %v1199_v47 = vpack.c.bf16 %v1110_v42, %v1109_v63  ;;  %v944_v5 = vrot.slane %v705_v24, %v2179_v30  ;;  %v509_v0 = vunpack.c.l.bf16 %v2052_v31  ;;  %1636 = vmatpush3.bf16.msra.mxu1 %v1216_v54  ;;  %1609 = vmatprep.subr.bf16.mxu0 %v1207_v40  ;;  %v2635_v59 = vunpack.c.l.bf16 %v1926_v8 }
 0x15c   :  { %v1215_v53 = vpack.c.bf16 %v1142_v1, %v1141_v41  ;;  %v2636_v52 = vunpack.c.h.bf16 %v1926_v8  ;;  %1637 = vmatprep.subr.bf16.mxu1 %v1223_v27  ;;  %v2637_v38 = vunpack.c.l.bf16 %v1936_v9  ;;  %v2638_v42 = vunpack.c.h.bf16 %v1936_v9 }
 0x15d   :  { %v1123_v51 = vmul.f32 %v912_v39, %v2635_v59  ;;  %v2641_v61 = vunpack.c.l.bf16 %v1941_v10  ;;  %v2642_v7 = vunpack.c.h.bf16 %v1941_v10  ;;  %v908_v27 = vrot.slane %v2212_v50, %v2179_v30 }
 0x15e   :  { %v1124_v19 = vmul.f32 %v912_v39, %v2636_v52  ;;  %v1155_v36 = vmul.f32 %v976_v45, %v2637_v38  ;;  %v1156_v20 = vmul.f32 %v976_v45, %v2638_v42  ;;  %v2639_v24 = vmov %v2637_v38  ;;  %1610 = vmatpush3.bf16.msra.mxu0 %v1199_v47 }
 0x15f   :  { %v1107_v46 = vmul.f32 %v880_v49, %v2639_v24  ;;  %v2640_v54 = vmov %v2638_v42  ;;  %v1139_v14 = vmul.f32 %v944_v5, %v2641_v61  ;;  %v1140_v25 = vmul.f32 %v944_v5, %v2642_v7  ;;  %1638 = vmatpush3.bf16.msra.mxu1 %v1215_v53 }
 0x160   :  { %v1108_v40 = vmul.f32 %v880_v49, %v2640_v54  ;;  %v1206_v29 = vpack.c.bf16 %v1124_v19, %v1123_v51  ;;  %v1222_v62 = vpack.c.bf16 %v1156_v20, %v1155_v36  ;;  %v972_v48 = vrot.slane %v2215_v37, %v2179_v30 }
 0x161   :  { %v876_v9 = vrot.slane %v2218_v57, %v2179_v30  ;;  %v510_v63 = vunpack.c.h.bf16 %v2052_v31  ;;  %v1214_v33 = vpack.c.bf16 %v1140_v25, %v1139_v14  ;;  %v2643_v2 = vunpack.c.l.bf16 %v1946_v11 }
 0x162   :  { %v1198_v43 = vpack.c.bf16 %v1108_v40, %v1107_v46  ;;  %1611 = vmatprep.subr.bf16.mxu0 %v1206_v29  ;;  %v2644_v58 = vunpack.c.h.bf16 %v1946_v11  ;;  %1639 = vmatprep.subr.bf16.mxu1 %v1222_v62  ;;  %v2645_v1 = vunpack.c.l.bf16 %v1951_v12  ;;  %v2646_v37 = vunpack.c.h.bf16 %v1951_v12 }
 0x163   :  { %v1121_v41 = vmul.f32 %v908_v27, %v2643_v2  ;;  %v940_v59 = vrot.slane %v2221_v56, %v2179_v30  ;;  %v2649_v51 = vcombine.high %v2188_v55, %v2188_v55  ;;  %v2650_v19 = vcombine.high %v2191_v60, %v2191_v60  ;;  %1640 = vmatpush3.bf16.msra.mxu1 %v1214_v33 }
 0x164   :  { %v1122_v50 = vmul.f32 %v908_v27, %v2644_v58  ;;  %v1153_v39 = vmul.f32 %v972_v48, %v2645_v1  ;;  %v1154_v45 = vmul.f32 %v972_v48, %v2646_v37  ;;  %v2647_v57 = vmov %v2645_v1  ;;  %1612 = vmatpush3.bf16.msra.mxu0 %v1198_v43 }
 0x165   :  { %v1105_v47 = vmul.f32 %v876_v9, %v2647_v57  ;;  %v2648_v49 = vmov %v2646_v37  ;;  %v649_v52 = vrot.slane %v2649_v51, %v2166_v35  ;;  %v747_v38 = vrot.slane %v2650_v19, %v2166_v35 }
 0x166   :  { %v1106_v5 = vmul.f32 %v876_v9, %v2648_v49  ;;  %v1205_v53 = vpack.c.bf16 %v1122_v50, %v1121_v41  ;;  %v1221_v36 = vpack.c.bf16 %v1154_v45, %v1153_v39  ;;  %v2651_v12 = vcombine.high %v2194_v34, %v2194_v34 }
 0x167   :  { %v2652_v56 = vcombine.high %v2197_v44, %v2197_v44  ;;  %v541_v46 = vunpack.c.l.bf16 %v2057_v32  ;;  %v2653_v54 = vunpack.c.l.bf16 %v1958_v13  ;;  %v2654_v29 = vunpack.c.h.bf16 %v1958_v13 }
 0x168   :  { %v1197_v42 = vpack.c.bf16 %v1106_v5, %v1105_v47  ;;  %v600_v20 = vrot.slane %v2651_v12, %v2166_v35  ;;  %1613 = vmatprep.subr.bf16.mxu0 %v1205_v53  ;;  %v659_v14 = vcombine.high %v649_v52, %v649_v52  ;;  %1641 = vmatprep.subr.bf16.mxu1 %v1221_v36  ;;  %v2655_v50 = vunpack.c.l.bf16 %v1968_v15 }
 0x169   :  { %v698_v24 = vrot.slane %v2652_v56, %v2166_v35  ;;  %v1137_v40 = vmul.f32 %v940_v59, %v2653_v54  ;;  %v1138_v61 = vmul.f32 %v940_v59, %v2654_v29  ;;  %v757_v7 = vcombine.high %v747_v38, %v747_v38 }
 0x16a   :  { %v610_v25 = vcombine.high %v600_v20, %v600_v20  ;;  %v2341_v62 = vrot.slane %v2188_v55, %v2166_v35  ;;  %v904_v48 = vrot.slane %v659_v14, %v2179_v30  ;;  %v2346_v9 = vrot.slane %v2191_v60, %v2166_v35  ;;  %1614 = vmatpush3.bf16.msra.mxu0 %v1197_v42 }
 0x16b   :  { %v708_v27 = vcombine.high %v698_v24, %v698_v24  ;;  %v1213_v43 = vpack.c.bf16 %v1138_v61, %v1137_v40  ;;  %v2350_v33 = vrot.slane %v2194_v34, %v2166_v35  ;;  %v968_v2 = vrot.slane %v757_v7, %v2179_v30 }
 0x16c   :  { %v872_v41 = vrot.slane %v610_v25, %v2179_v30  ;;  %v657_v55 = vcombine.high %v2341_v62, %v2341_v62  ;;  %v1119_v1 = vmul.f32 %v904_v48, %v2655_v50  ;;  %v2656_v60 = vunpack.c.h.bf16 %v1968_v15 }
 0x16d   :  { %v936_v58 = vrot.slane %v708_v27, %v2179_v30  ;;  %1642 = vmatpush3.bf16.msra.mxu1 %v1213_v43  ;;  %v755_v34 = vcombine.high %v2346_v9, %v2346_v9  ;;  %v608_v37 = vcombine.high %v2350_v33, %v2350_v33  ;;  %v2657_v45 = vunpack.c.l.bf16 %v1977_v16 }
 0x16e   :  { %v1120_v39 = vmul.f32 %v904_v48, %v2656_v60  ;;  %v2658_v47 = vunpack.c.h.bf16 %v1977_v16  ;;  %v2661_v36 = vunpack.c.l.bf16 %v1982_v17  ;;  %v2662_v12 = vunpack.c.h.bf16 %v1982_v17 }
 0x16f   :  { %v1151_v57 = vmul.f32 %v968_v2, %v2657_v45  ;;  %v2659_v5 = vmov %v2657_v45  ;;  %v900_v54 = vrot.slane %v657_v55, %v2179_v30  ;;  %v964_v61 = vrot.slane %v755_v34, %v2179_v30 }
 0x170   :  { %v1152_v49 = vmul.f32 %v968_v2, %v2658_v47  ;;  %v1103_v53 = vmul.f32 %v872_v41, %v2659_v5  ;;  %v2660_v59 = vmov %v2658_v47  ;;  %v1204_v19 = vpack.c.bf16 %v1120_v39, %v1119_v1 }
 0x171   :  { %v1104_v51 = vmul.f32 %v872_v41, %v2660_v59  ;;  %v1135_v42 = vmul.f32 %v936_v58, %v2661_v36  ;;  %v1136_v56 = vmul.f32 %v936_v58, %v2662_v12  ;;  %v868_v14 = vrot.slane %v608_v37, %v2179_v30 }
 0x172   :  { %v1220_v40 = vpack.c.bf16 %v1152_v49, %v1151_v57  ;;  %1615 = vmatprep.subr.bf16.mxu0 %v1204_v19  ;;  %v2663_v16 = vunpack.c.l.bf16 %v1987_v18  ;;  %v2664_v27 = vunpack.c.h.bf16 %v1987_v18  ;;  %v684_v48 = vrot.slane %v2197_v44, %v2166_v35 }
 0x173   :  { %v1196_v29 = vpack.c.bf16 %v1104_v51, %v1103_v53  ;;  %v1212_v7 = vpack.c.bf16 %v1136_v56, %v1135_v42  ;;  %v542_v2 = vunpack.c.h.bf16 %v2057_v32  ;;  %v2665_v41 = vunpack.c.l.bf16 %v2002_v21  ;;  %v1792_v32 = vld [vmem:[%s2601_s4 + $0x40] ss:$24 sps:$4 sm:$0xff]  }
 0x174   :  { %v1117_v25 = vmul.f32 %v900_v54, %v2663_v16  ;;  %v1118_v43 = vmul.f32 %v900_v54, %v2664_v27  ;;  %1643 = vmatprep.subr.bf16.mxu1 %v1220_v40  ;;  %v2666_v55 = vunpack.c.h.bf16 %v2002_v21  ;;  %v706_v45 = vcombine.high %v684_v48, %v684_v48  ;;  %v2677_v16 = vld [vmem:[#allocation5_spill] sm:$0xff] }
 0x175   :  { %1616 = vmatpush3.bf16.msra.mxu0 %v1196_v29  ;;  %v1149_v58 = vmul.f32 %v964_v61, %v2665_v41  ;;  %v2667_v1 = vmov %v2665_v41  ;;  %1644 = vmatpush3.bf16.msra.mxu1 %v1212_v7  ;;  %v896_v44 = vrot.slane %v649_v52, %v2179_v30  ;;  %v960_v47 = vrot.slane %v747_v38, %v2179_v30  ;;  %v2679_v41 = vld [vmem:[#allocation4_spill] sm:$0xff] }
 0x176   :  { %v1150_v50 = vmul.f32 %v964_v61, %v2666_v55  ;;  %v1101_v60 = vmul.f32 %v868_v14, %v2667_v1  ;;  %v1203_v39 = vpack.c.bf16 %v1118_v43, %v1117_v25  ;;  %v2668_v34 = vmov %v2666_v55  ;;  %v2678_v25 = vld [vmem:[#allocation6_spill] sm:$0xff] }
 0x177   :  { %v1102_v37 = vmul.f32 %v868_v14, %v2668_v34  ;;  %v864_v49 = vrot.slane %v600_v20, %v2179_v30  ;;  %v928_v5 = vrot.slane %v698_v24, %v2179_v30  ;;  %v932_v59 = vrot.slane %v706_v45, %v2179_v30 }
 0x178   :  { %v1219_v57 = vpack.c.bf16 %v1150_v50, %v1149_v58  ;;  %1617 = vmatprep.subr.bf16.mxu0 %v1203_v39  ;;  %v2669_v51 = vunpack.c.l.bf16 %v2012_v23  ;;  %v2670_v21 = vunpack.c.h.bf16 %v2012_v23  ;;  %v2671_v52 = vunpack.c.l.bf16 %v2027_v26 }
 0x179   :  { %v1195_v53 = vpack.c.bf16 %v1102_v37, %v1101_v60  ;;  %v2672_v38 = vunpack.c.h.bf16 %v2027_v26  ;;  %v2675_v40 = vunpack.c.l.bf16 %v2007_v22  ;;  %v2676_v61 = vunpack.c.h.bf16 %v2007_v22 }
 0x17a   :  { %v1115_v19 = vmul.f32 %v896_v44, %v2669_v51  ;;  %v1116_v36 = vmul.f32 %v896_v44, %v2670_v21  ;;  %1645 = vmatprep.subr.bf16.mxu1 %v1219_v57  ;;  %v1147_v42 = vmul.f32 %v960_v47, %v2671_v52  ;;  %v2673_v20 = vmov %v2671_v52 }
 0x17b   :  { %v1148_v12 = vmul.f32 %v960_v47, %v2672_v38  ;;  %v1099_v24 = vmul.f32 %v864_v49, %v2673_v20  ;;  %v2674_v56 = vmov %v2672_v38  ;;  %1618 = vmatpush3.bf16.msra.mxu0 %v1195_v53  ;;  %v1133_v29 = vmul.f32 %v932_v59, %v2675_v40 }
 0x17c   :  { %v1100_v54 = vmul.f32 %v864_v49, %v2674_v56  ;;  %v1134_v14 = vmul.f32 %v932_v59, %v2676_v61  ;;  %v1202_v7 = vpack.c.bf16 %v1116_v36, %v1115_v19  ;;  %v507_v27 = vmul.f32 %v2678_v25, %v2677_v16  ;;  %v2683_v49 = vld [vmem:[#allocation7_spill] sm:$0xff] }
 0x17d   :  { %v2680_v58 = vunpack.c.l.bf16 %v2679_v41  ;;  %v2681_v50 = vunpack.c.h.bf16 %v2679_v41  ;;  %v892_v26 = vrot.slane %v2341_v62, %v2179_v30  ;;  %v956_v39 = vrot.slane %v2346_v9, %v2179_v30 }
 0x17e   :  { %v1194_v43 = vpack.c.bf16 %v1100_v54, %v1099_v24  ;;  %v1211_v60 = vpack.c.bf16 %v1134_v14, %v1133_v29  ;;  %1619 = vmatprep.subr.bf16.mxu0 %v1202_v7  ;;  %v860_v34 = vrot.slane %v2350_v33, %v2179_v30  ;;  %v924_v37 = vrot.slane %v684_v48, %v2179_v30  ;;  %v1783_v54 = vld [vmem:[%s2601_s4 + $0x34] ss:$24 sps:$4 sm:$0xff]  }
 0x17f   :  { %v1131_v55 = vmul.f32 %v928_v5, %v2680_v58  ;;  %v1132_v1 = vmul.f32 %v928_v5, %v2681_v50  ;;  %v1218_v45 = vpack.c.bf16 %v1148_v12, %v1147_v42  ;;  %v2682_v44 = vunpack.c.l.bf16 %v2037_v28  ;;  %v1777_v12 = vld [vmem:[%s2601_s4] ss:$24 sps:$4 sm:$0xff]  }
 0x180   :  { %v1114_v47 = vmul.f32 %v892_v26, %v526_v4  ;;  %v808_v62 = vcombine.high %v2683_v49, %v2683_v49  ;;  %1646 = vmatpush3.bf16.msra.mxu1 %v1211_v60  ;;  %1620 = vmatpush3.bf16.msra.mxu0 %v1194_v43  ;;  %v1145_v9 = vmul.f32 %v956_v39, %v509_v0 }
 0x181   :  { %v1113_v57 = vmul.f32 %v892_v26, %v2682_v44  ;;  %v1146_v33 = vmul.f32 %v956_v39, %v510_v63  ;;  %v1097_v48 = vmul.f32 %v860_v34, %v509_v0  ;;  %1647 = vmatprep.subr.bf16.mxu1 %v1218_v45  ;;  %v1098_v53 = vmul.f32 %v860_v34, %v510_v63  ;;  %v1785_v39 = vld [vmem:[%s2601_s4 + $0x3c] ss:$24 sps:$4 sm:$0xff]  }
 0x182   :  { %v1129_v59 = vmul.f32 %v924_v37, %v541_v46  ;;  %v1130_v51 = vmul.f32 %v924_v37, %v542_v2  ;;  %v1210_v19 = vpack.c.bf16 %v1132_v1, %v1131_v55  ;;  %v822_v21 = vrot.slane %v808_v62, %v2166_v35 }
 0x183   :  { %v1201_v5 = vpack.c.bf16 %v1114_v47, %v1113_v57  ;;  %v759_v36 = vcombine.high %v507_v27, %v507_v27  ;;  %v815_v52 = vrot.slane %v2683_v49, %v2166_v35  ;;  %v1217_v0 = vpack.c.bf16 %v1146_v33, %v1145_v9 }
 0x184   :  { %v1193_v42 = vpack.c.bf16 %v1098_v53, %v1097_v48  ;;  %v1209_v38 = vpack.c.bf16 %v1130_v51, %v1129_v59  ;;  %v766_v31 = vrot.slane %v507_v27, %v2166_v35  ;;  %1648 = vmatpush3.bf16.msra.mxu1 %v1210_v19  ;;  %v824_v63 = vcombine.high %v822_v21, %v822_v21  ;;  %v1780_v27 = vld [vmem:[%s2601_s4 + $0x8] ss:$24 sps:$4 sm:$0xff]  }
 0x185   :  { %1621 = vmatprep.subr.bf16.mxu0 %v1201_v5  ;;  %v773_v20 = vrot.slane %v759_v36, %v2166_v35  ;;  %v838_v24 = vrot.slane %v822_v21, %v2166_v35  ;;  %v823_v56 = vcombine.high %v815_v52, %v815_v52  ;;  %1649 = vmatprep.subr.bf16.mxu1 %v1217_v0  ;;  %v2684_v45 = vunpack.c.l.bf16 %v1958_v13 }
 0x186   :  { %1622 = vmatpush3.bf16.msra.mxu0 %v1193_v42  ;;  %v774_v40 = vcombine.high %v766_v31, %v766_v31  ;;  %v2460_v29 = vrot.slane %v815_v52, %v2166_v35  ;;  %v2463_v61 = vrot.slane %v766_v31, %v2166_v35  ;;  %v852_v14 = vrot.slane %v824_v63, %v2166_v35 }
 0x187   :  { %v775_v7 = vcombine.high %v773_v20, %v773_v20  ;;  %v854_v16 = vcombine.high %v838_v24, %v838_v24  ;;  %v789_v25 = vrot.slane %v773_v20, %v2166_v35  ;;  %v1036_v43 = vrot.slane %v838_v24, %v2179_v30 }
 0x188   :  { %v845_v58 = vrot.slane %v823_v56, %v2166_v35  ;;  %v2473_v55 = vrot.slane %v774_v40, %v2166_v35  ;;  %v853_v50 = vcombine.high %v2460_v29, %v2460_v29  ;;  %1650 = vmatpush3.bf16.msra.mxu1 %v1209_v38  ;;  %v856_v1 = vcombine.high %v852_v14, %v852_v14  ;;  %v2692_v38 = vld [vmem:[#allocation3_spill] sm:$0xff]  ;;  %v2696_v40 = vld [vmem:[#allocation2_spill] sm:$0xff] }
 0x189   :  { %1346 = vmatmul.mubr.bf16.vlgmr.msra.gmra.mxu0 %v1777_v12  ;;  %v803_v26 = vrot.slane %v775_v7, %v2166_v35  ;;  %v1044_v60 = vrot.slane %v854_v16, %v2179_v30  ;;  %v805_v34 = vcombine.high %v789_v25, %v789_v25  ;;  %v1040_v37 = vrot.slane %v852_v14, %v2179_v30 }
 0x18a   :  { %v1185_v44 = vmul.f32 %v1036_v43, %v2684_v45  ;;  %v2685_v57 = vunpack.c.h.bf16 %v1958_v13  ;;  %1353 = vmatprep.mubr.bf16.mxu0 %v1783_v54  ;;  %v1048_v49 = vrot.slane %v856_v1, %v2179_v30  ;;  %v2686_v35 = vunpack.c.l.bf16 %v1921_v6  ;;  %v1787_v54 = vld [vmem:[%s2601_s4 + $0x30] ss:$24 sps:$4 sm:$0xff]  }
 0x18b   :  { %v807_v62 = vcombine.high %v803_v26, %v803_v26  ;;  %v2687_v33 = vunpack.c.h.bf16 %v1921_v6  ;;  %1395 = vmatmul.mubr.bf16.vlgmr.msra.gmra.mxu1 %v1780_v27  ;;  %v1012_v5 = vrot.slane %v805_v34, %v2179_v30  ;;  %v2688_v53 = vunpack.c.l.bf16 %v1941_v10 }
 0x18c   :  { %v1186_v47 = vmul.f32 %v1036_v43, %v2685_v57  ;;  %v1189_v9 = vmul.f32 %v1044_v60, %v2686_v35  ;;  %v2689_v51 = vunpack.c.h.bf16 %v1941_v10  ;;  %v1008_v19 = vrot.slane %v803_v26, %v2179_v30  ;;  %1402 = vmatprep.mubr.bf16.mxu1 %v1785_v39 }
 0x18d   :  { %v1190_v48 = vmul.f32 %v1044_v60, %v2687_v33  ;;  %v1187_v59 = vmul.f32 %v1040_v37, %v2688_v53  ;;  %v2690_v21 = vunpack.c.l.bf16 %v1904_v3  ;;  %v2691_v52 = vunpack.c.h.bf16 %v1904_v3 }
 0x18e   :  { %v1188_v13 = vmul.f32 %v1040_v37, %v2689_v51  ;;  %v1016_v6 = vrot.slane %v807_v62, %v2179_v30  ;;  %v2693_v31 = vunpack.c.l.bf16 %v2692_v38  ;;  %v2694_v12 = vunpack.c.h.bf16 %v2692_v38 }
 0x18f   :  { %v1191_v36 = vmul.f32 %v1048_v49, %v2690_v21  ;;  %v1192_v0 = vmul.f32 %v1048_v49, %v2691_v52  ;;  %v1239_v42 = vpack.c.bf16 %v1190_v48, %v1189_v9  ;;  %v2695_v24 = vunpack.c.l.bf16 %v1926_v8  ;;  %v1788_v49 = vld [vmem:[%s2601_s4 + $0x38] ss:$24 sps:$4 sm:$0xff]   ;;  %v1791_v9 = vld [vmem:[%s2601_s4 + $0x14] ss:$24 sps:$4 sm:$0xff]  }
 0x190   :  { %v1173_v63 = vmul.f32 %v1012_v5, %v2693_v31  ;;  %v1174_v20 = vmul.f32 %v1012_v5, %v2694_v12  ;;  %v1238_v10 = vpack.c.bf16 %v1188_v13, %v1187_v59  ;;  %v2697_v14 = vunpack.c.l.bf16 %v2696_v40 }
 0x191   :  { %v1171_v56 = vmul.f32 %v1008_v19, %v2695_v24  ;;  %v1240_v3 = vpack.c.bf16 %v1192_v0, %v1191_v36  ;;  %v2698_v16 = vunpack.c.h.bf16 %v2696_v40  ;;  %v2699_v43 = vunpack.c.h.bf16 %v1926_v8  ;;  %1354 = vmatmul.mubr.bf16.gmra.mxu0 %v1787_v54 }
 0x192   :  { %v1175_v7 = vmul.f32 %v1016_v6, %v2697_v14  ;;  %v1231_v26 = vpack.c.bf16 %v1174_v20, %v1173_v63  ;;  %v1237_v60 = vpack.c.bf16 %v1186_v47, %v1185_v44  ;;  %v1004_v39 = vrot.slane %v789_v25, %v2179_v30  ;;  %1443 = vmatprep.mubr.bf16.mxu0 %v1791_v9 }
 0x193   :  { %v1176_v27 = vmul.f32 %v1016_v6, %v2698_v16  ;;  %v1172_v1 = vmul.f32 %v1008_v19, %v2699_v43  ;;  %v855_v34 = vcombine.high %v845_v58, %v845_v58  ;;  %1663 = vmatprep.subr.bf16.mxu0 %v1240_v3  ;;  %1719 = vmatprep.subr.bf16.mxu1 %v1240_v3  ;;  %v2700_v62 = vunpack.c.l.bf16 %v1946_v11 }
 0x194   :  { %v806_v57 = vcombine.high %v2473_v55, %v2473_v55  ;;  %v2701_v35 = vunpack.c.h.bf16 %v1946_v11  ;;  %v1028_v47 = vrot.slane %v853_v50, %v2179_v30  ;;  %v804_v48 = vcombine.high %v2463_v61, %v2463_v61  ;;  %1403 = vmatmul.mubr.bf16.gmra.mxu1 %v1788_v49 }
 0x195   :  { %v1232_v37 = vpack.c.bf16 %v1176_v27, %v1175_v7  ;;  %v1230_v45 = vpack.c.bf16 %v1172_v1, %v1171_v56  ;;  %v1169_v8 = vmul.f32 %v1004_v39, %v2700_v62  ;;  %v1032_v25 = vrot.slane %v855_v34, %v2179_v30 }
 0x196   :  { %v1170_v44 = vmul.f32 %v1004_v39, %v2701_v35  ;;  %v1000_v33 = vrot.slane %v806_v57, %v2179_v30  ;;  %v1024_v5 = vrot.slane %v845_v58, %v2179_v30  ;;  %v2702_v53 = vunpack.c.l.bf16 %v1982_v17 }
 0x197   :  { %1664 = vmatpush3.bf16.msra.mxu0 %v1232_v37  ;;  %1727 = vmatpush3.bf16.msra.mxu1 %v1232_v37  ;;  %v2703_v50 = vunpack.c.h.bf16 %v1982_v17  ;;  %v2704_v13 = vunpack.c.l.bf16 %v1968_v15  ;;  %v2705_v21 = vunpack.c.h.bf16 %v1968_v15  ;;  %v2706_v52 = vunpack.c.l.bf16 %v2007_v22 }
 0x198   :  { %1665 = vmatprep.subr.bf16.mxu0 %v1239_v42  ;;  %1720 = vmatprep.subr.bf16.mxu1 %v1239_v42  ;;  %v1229_v11 = vpack.c.bf16 %v1170_v44, %v1169_v8  ;;  %v1183_v59 = vmul.f32 %v1032_v25, %v2702_v53  ;;  %v2707_v58 = vunpack.c.h.bf16 %v2007_v22  ;;  %v1794_v42 = vld [vmem:[%s2601_s4 + $0x44] ss:$24 sps:$4 sm:$0xff]   ;;  %v996_v17 = vrot.slane %v804_v48, %v2179_v30 }
 0x199   :  { %v1184_v51 = vmul.f32 %v1032_v25, %v2703_v50  ;;  %v1167_v19 = vmul.f32 %v1000_v33, %v2704_v13  ;;  %v1168_v36 = vmul.f32 %v1000_v33, %v2705_v21  ;;  %v1181_v0 = vmul.f32 %v1028_v47, %v2706_v52  ;;  %1451 = vmatprep.mubr.bf16.mxu1 %v1794_v42 }
 0x19a   :  { %v1182_v6 = vmul.f32 %v1028_v47, %v2707_v58  ;;  %v2708_v31 = vunpack.c.l.bf16 %v2679_v41  ;;  %v2709_v15 = vunpack.c.h.bf16 %v2679_v41  ;;  %v992_v22 = vrot.slane %v2473_v55, %v2179_v30 }
 0x19b   :  { %v1236_v38 = vpack.c.bf16 %v1184_v51, %v1183_v59  ;;  %1666 = vmatpush3.bf16.msra.mxu0 %v1231_v26  ;;  %1728 = vmatpush3.bf16.msra.mxu1 %v1231_v26  ;;  %v1228_v20 = vpack.c.bf16 %v1168_v36, %v1167_v19  ;;  %v2710_v56 = vunpack.c.l.bf16 %v1987_v18  ;;  %v2711_v3 = vunpack.c.h.bf16 %v1987_v18 }
 0x19c   :  { %v1179_v63 = vmul.f32 %v1024_v5, %v2708_v31  ;;  %v1180_v12 = vmul.f32 %v1024_v5, %v2709_v15  ;;  %v1235_v24 = vpack.c.bf16 %v1182_v6, %v1181_v0  ;;  %1667 = vmatprep.subr.bf16.mxu0 %v1238_v10  ;;  %1721 = vmatprep.subr.bf16.mxu1 %v1238_v10  ;;  %v2712_v41 = vunpack.c.l.bf16 %v2012_v23 }
 0x19d   :  { %v1165_v54 = vmul.f32 %v996_v17, %v2710_v56  ;;  %v1166_v40 = vmul.f32 %v996_v17, %v2711_v3  ;;  %v2713_v16 = vunpack.c.h.bf16 %v2012_v23  ;;  %v1020_v43 = vrot.slane %v2460_v29, %v2179_v30 }
 0x19e   :  { %v1234_v14 = vpack.c.bf16 %v1180_v12, %v1179_v63  ;;  %v1163_v7 = vmul.f32 %v992_v22, %v2712_v41  ;;  %v988_v55 = vrot.slane %v2463_v61, %v2179_v30  ;;  %v2714_v23 = vunpack.c.l.bf16 %v2037_v28  ;;  %v1789_v28 = vld [vmem:[%s2601_s4 + $0x10] ss:$24 sps:$4 sm:$0xff]  }
 0x19f   :  { %v1164_v27 = vmul.f32 %v992_v22, %v2713_v16  ;;  %v1227_v10 = vpack.c.bf16 %v1166_v40, %v1165_v54  ;;  %1668 = vmatpush3.bf16.msra.mxu0 %v1230_v45  ;;  %1729 = vmatpush3.bf16.msra.mxu1 %v1230_v45  ;;  %v1177_v18 = vmul.f32 %v1020_v43, %v541_v46 }
 0x1a0   :  { %v1178_v26 = vmul.f32 %v1020_v43, %v542_v2  ;;  %1669 = vmatprep.subr.bf16.mxu0 %v1237_v60  ;;  %1722 = vmatprep.subr.bf16.mxu1 %v1237_v60  ;;  %v1161_v39 = vmul.f32 %v988_v55, %v2714_v23  ;;  %v1162_v29 = vmul.f32 %v988_v55, %v526_v4 }
 0x1a1   :  { %v1226_v1 = vpack.c.bf16 %v1164_v27, %v1163_v7 }
 0x1a2   :  { %v1233_v30 = vpack.c.bf16 %v1178_v26, %v1177_v18  ;;  %v1225_v61 = vpack.c.bf16 %v1162_v29, %v1161_v39 }
 0x1a3   :  { %1670 = vmatpush3.bf16.msra.mxu0 %v1229_v11  ;;  %1730 = vmatpush3.bf16.msra.mxu1 %v1229_v11 }
 0x1a4   :  { %1671 = vmatprep.subr.bf16.mxu0 %v1236_v38  ;;  %1723 = vmatprep.subr.bf16.mxu1 %v1236_v38 }
 0x1a7   :  { %1672 = vmatpush3.bf16.msra.mxu0 %v1228_v20  ;;  %1731 = vmatpush3.bf16.msra.mxu1 %v1228_v20 }
 0x1a8   :  { %1673 = vmatprep.subr.bf16.mxu0 %v1235_v24  ;;  %1724 = vmatprep.subr.bf16.mxu1 %v1235_v24 }
 0x1ab   :  { %1674 = vmatpush3.bf16.msra.mxu0 %v1227_v10  ;;  %1732 = vmatpush3.bf16.msra.mxu1 %v1227_v10 }
 0x1ac   :  { %1675 = vmatprep.subr.bf16.mxu0 %v1234_v14  ;;  %1725 = vmatprep.subr.bf16.mxu1 %v1234_v14 }
 0x1af   :  { %1676 = vmatpush3.bf16.msra.mxu0 %v1226_v1  ;;  %1733 = vmatpush3.bf16.msra.mxu1 %v1226_v1 }
 0x1b0   :  { %1677 = vmatprep.subr.bf16.mxu0 %v1233_v30  ;;  %1726 = vmatprep.subr.bf16.mxu1 %v1233_v30 }
 0x1b3   :  { %1678 = vmatpush3.bf16.msra.mxu0 %v1225_v61  ;;  %1734 = vmatpush3.bf16.msra.mxu1 %v1225_v61 }
 0x1b6   :  { %1444 = vmatmul.mubr.bf16.vlgmr.msra.gmra.mxu0 %v1789_v28  ;;  %1452 = vmatmul.mubr.bf16.vlgmr.msra.gmra.mxu1 %v1792_v32 }
 0x249   :  { %v1623_v4 = vpop.f32.mrf.mxu0 }
 0x24b   :  { %v1651_v46 = vpop.f32.mrf.mxu1  ;;  %v1624_v2 = vpop.f32.mrf.mxu0 }
 0x24c   :  { %v1625_v33 = vadd.f32 %v1624_v2, %v1623_v4 }
 0x24d   :  { %v1652_v60 = vpop.f32.mrf.mxu1  ;;  %v1626_v34 = vpop.f32.mrf.mxu0 }
 0x24e   :  { %v1653_v48 = vadd.f32 %v1652_v60, %v1651_v46 }
 0x24f   :  { %v1654_v37 = vpop.f32.mrf.mxu1  ;;  %v1627_v45 = vpop.f32.mrf.mxu0 }
 0x250   :  { %v1628_v53 = vadd.f32 %v1627_v45, %v1626_v34  ;;  %v1397_v13 = vadd.f32 %v1653_v48, %v1625_v33 }
 0x251   :  { %v1655_v57 = vpop.f32.mrf.mxu1  ;;  %v1629_v49 = vpop.f32.mrf.mxu0 }
 0x252   :  { %v1656_v59 = vadd.f32 %v1655_v57, %v1654_v37 }
 0x253   :  { %v1630_v8 = vpop.f32.mrf.mxu0 }
 0x254   :  { %v1657_v62 = vpop.f32.mrf.mxu1  ;;  %v1631_v19 = vadd.f32 %v1630_v8, %v1629_v49  ;;  %v1400_v42 = vadd.f32 %v1656_v59, %v1628_v53 }
 0x255   :  { %v1632_v44 = vpop.f32.mrf.mxu0 }
 0x256   :  { %v1658_v35 = vpop.f32.mrf.mxu1 }
 0x257   :  { %v1633_v47 = vpop.f32.mrf.mxu0  ;;  %v1659_v21 = vadd.f32 %v1658_v35, %v1657_v62 }
 0x258   :  { %v1660_v25 = vpop.f32.mrf.mxu1  ;;  %v1634_v63 = vadd.f32 %v1633_v47, %v1632_v44 }
 0x259   :  { %v1405_v31 = vadd.f32 %v1659_v21, %v1631_v19 }
 0x25a   :  { %v1661_v9 = vpop.f32.mrf.mxu1 }
 0x25b   :  { %v1662_v15 = vadd.f32 %v1661_v9, %v1660_v25 }
 0x25d   :  { %v1408_v56 = vadd.f32 %v1662_v15, %v1634_v63 }
 0x276   :  { %v1679_v5 = vpop.f32.mrf.mxu0  ;;  %v1685_v11 = vpop.f32.mrf.mxu1 }
 0x278   :  { %v1680_v50 = vpop.f32.mrf.mxu0  ;;  %v1686_v51 = vpop.f32.mrf.mxu1 }
 0x279   :  { %v1681_v36 = vadd.f32 %v1680_v50, %v1679_v5  ;;  %v1687_v58 = vadd.f32 %v1686_v51, %v1685_v11 }
 0x27a   :  { %v1682_v52 = vpop.f32.mrf.mxu0  ;;  %v1688_v0 = vpop.f32.mrf.mxu1 }
 0x27b   :  { %v1446_v6 = vadd.f32 %v1681_v36, %v1397_v13  ;;  %v1454_v22 = vadd.f32 %v1687_v58, %v1405_v31 }
 0x27c   :  { %v1683_v38 = vpop.f32.mrf.mxu0  ;;  %v1689_v17 = vpop.f32.mrf.mxu1 }
 0x27d   :  { %v1684_v12 = vadd.f32 %v1683_v38, %v1682_v52  ;;  %1460 = vadd.xlane.f32.xlu0 %v1446_v6  ;;  %v1690_v20 = vadd.f32 %v1689_v17, %v1688_v0 }
 0x27f   :  { %v1449_v24 = vadd.f32 %v1684_v12, %v1400_v42  ;;  %v1457_v54 = vadd.f32 %v1690_v20, %v1408_v56 }
 0x281   :  { %1462 = vadd.xlane.f32.xlu1 %v1449_v24  ;;  %1464 = vadd.xlane.f32.xlu0 %v1454_v22 }
 0x285   :  { %1466 = vadd.xlane.f32.xlu0 %v1457_v54 }
 0x306   :  { %v1461_v3 = vpop.xlane.xlu0 %1460 }
 0x307   :  { %v1469_v40 = vmul.f32 0.0078125, %v1461_v3 }
 0x309   :  { %v1473_v14 = vsub.f32 %v1446_v6, %v1469_v40 }
 0x30a   :  { %v1463_v41 = vpop.xlane.xlu1 %1462  ;;  %v1465_v7 = vpop.xlane.xlu0 %1464 }
 0x30b   :  { %v1470_v16 = vmul.f32 0.0078125, %v1463_v41  ;;  %v1471_v27 = vmul.f32 0.0078125, %v1465_v7  ;;  %v1477_v43 = vmul.f32 %v1473_v14, %v1473_v14 }
 0x30d   :  { %v1474_v55 = vsub.f32 %v1449_v24, %v1470_v16  ;;  %v1475_v10 = vsub.f32 %v1454_v22, %v1471_v27  ;;  %1481 = vadd.xlane.f32.xlu1 %v1477_v43 }
 0x30e   :  { %v1467_v1 = vpop.xlane.xlu0 %1466 }
 0x30f   :  { %v1472_v18 = vmul.f32 0.0078125, %v1467_v1  ;;  %v1478_v26 = vmul.f32 %v1474_v55, %v1474_v55  ;;  %v1479_v23 = vmul.f32 %v1475_v10, %v1475_v10 }
 0x311   :  { %v1476_v39 = vsub.f32 %v1457_v54, %v1472_v18  ;;  %1483 = vadd.xlane.f32.xlu0 %v1478_v26  ;;  %1485 = vadd.xlane.f32.xlu1 %v1479_v23 }
 0x313   :  { %v1480_v29 = vmul.f32 %v1476_v39, %v1476_v39 }
 0x315   :  { %1487 = vadd.xlane.f32.xlu0 %v1480_v29 }
 0x396   :  { %v1482_v30 = vpop.xlane.xlu1 %1481 }
 0x397   :  { %v1489_v61 = vmul.f32 0.0078125, %v1482_v30 }
 0x399   :  { %v1493_v28 = vadd.f32 1e-05, %v1489_v61 }
 0x39a   :  { %v1486_v32 = vpop.xlane.xlu1 %1485  ;;  %v1484_v4 = vpop.xlane.xlu0 %1483 }
 0x39b   :  { %1843 = vrsqrt.f32 %v1493_v28  ;;  %v1491_v46 = vmul.f32 0.0078125, %v1486_v32  ;;  %v1490_v2 = vmul.f32 0.0078125, %v1484_v4 }
 0x39d   :  { %v1495_v60 = vadd.f32 1e-05, %v1491_v46  ;;  %v1494_v34 = vadd.f32 1e-05, %v1490_v2 }
 0x39e   :  { %v1488_v37 = vpop.xlane.xlu0 %1487 }
 0x39f   :  { %1845 = vrsqrt.f32 %v1495_v60  ;;  %v1492_v45 = vmul.f32 0.0078125, %v1488_v37 }
 0x3a0   :  { %1847 = vrsqrt.f32 %v1494_v34 }
 0x3a1   :  { %v1496_v57 = vadd.f32 1e-05, %v1492_v45 }
 0x3a3   :  { %1849 = vrsqrt.f32 %v1496_v57 }
 0x3a8   :  { %v1844_v49 = vpop.eup %1843 }
 0x3a9   :  { %v1501_v62 = vmul.f32 %v1844_v49, %v1473_v14 }
 0x3ab   :  { %1505 = vst [vmem:[%s2603_s6] sm:$0xff] %v1501_v62 }
 0x3ac   :  { %v1846_v8 = vpop.eup %1845 }
 0x3ad   :  { %v1848_v35 = vpop.eup %1847  ;;  %v1503_v44 = vmul.f32 %v1846_v8, %v1475_v10 }
 0x3ae   :  { %v1502_v25 = vmul.f32 %v1848_v35, %v1474_v55 }
 0x3af   :  { %1507 = vst [vmem:[%s2603_s6 + $0x10] sm:$0xff] %v1503_v44 }
 0x3b0   :  { %v1850_v47 = vpop.eup %1849  ;;  %1506 = vst [vmem:[%s2603_s6 + $0x8] sm:$0xff] %v1502_v25 }
 0x3b1   :  { %v1504_v9 = vmul.f32 %v1850_v47, %v1476_v39 }
 0x3b3   :  { %1508 = vst [vmem:[%s2603_s6 + $0x18] sm:$0xff] %v1504_v9 }

// kernel: convnet_forward.13
= control target key start
LH: loop header
LB: loop body
LE: loop exit
PB: predicated region body
PF: predicated region fallthrough
CT: control target
= control target key end

     0   :  { %v1777_v1 = vmov 0.0   ;;  %vm1778_vm0 = vmmov 0   ;;  %v1779_v3 = vmov 0   ;;  %vm1316_vm1 = vcmask 1041409   ;;  %s2519_s0 = inlined_call_operand.vmem [shape: bf16[384,128], index: 0, kind: input, shape index: {}]   ;;  %s2520_s2 = inlined_call_operand.vmem [shape: bf16[240,384], index: 2, kind: input, shape index: {}]   ;;  %s2521_s3 = inlined_call_operand.vmem [shape: f32[240,1], index: 3, kind: input, shape index: {}]   ;;  %s2522_s1 = inlined_call_operand.vmem [shape: f32[24,128], index: 1, kind: input, shape index: {}]   ;;  %s2523_s4 = inlined_call_operand.vmem [shape: f32[10,128], index: 4, kind: output, shape index: {}]  }
   0x1   :  { %v1625_v0 = vld [vmem:[%s2519_s0 + $0x78] sm:$0xff]   ;;  %1544 = vmatprep.subr.bf16.mxu1 %v1777_v1  ;;  %1560 = vmatprep.mubr.msk.bf16.mxu1 %vm1778_vm0, %v1777_v1  ;;  %v1628_v5 = vld [vmem:[%s2519_s0 + $0x70] sm:$0xff]   ;;  %v1631_v8 = vld [vmem:[%s2519_s0 + $0x68] sm:$0xff]   ;;  %vm1319_vm2 = vcmask 1042434   ;;  %vm1322_vm3 = vcmask 1043459   ;;  %vm1325_vm4 = vcmask 1044484  }
   0x2   :  { %v1626_v2 = vld [vmem:[%s2519_s0 + $0x38] sm:$0xff]   ;;  %1623 = vset.pattern.permute.xlu0 %v1779_v3  ;;  %1624 = vset.pattern.permute.xlu1 %v1779_v3  ;;  %v1629_v6 = vld [vmem:[%s2519_s0 + $0x30] sm:$0xff]   ;;  %v1632_v9 = vld [vmem:[%s2519_s0 + $0x28] sm:$0xff]   ;;  %vm1328_vm5 = vcmask 1045509   ;;  %vm1331_vm6 = vcmask 1046534   ;;  %vm1334_vm7 = vcmask 1047559  }
   0x3   :  { %1415 = vmatprep.subr.bf16.mxu0 %v1625_v0  ;;  %v1627_v4 = vld [vmem:[%s2519_s0 + $0xb8] sm:$0xff]   ;;  %v1630_v7 = vld [vmem:[%s2519_s0 + $0xb0] sm:$0xff]   ;;  %v1633_v10 = vld [vmem:[%s2519_s0 + $0xa8] sm:$0xff]  }
   0x4   :  { %1416 = vmatpush3.bf16.msra.mxu0 %v1626_v2  ;;  %1545 = vmatpush3.bf16.msra.mxu1 %v1627_v4  ;;  %v1634_v11 = vld [vmem:[%s2519_s0 + $0x60] sm:$0xff]   ;;  %v1637_v14 = vld [vmem:[%s2519_s0 + $0x58] sm:$0xff]   ;;  %v1640_v17 = vld [vmem:[%s2519_s0 + $0x50] sm:$0xff]  }
   0x5   :  { %1417 = vmatprep.subr.bf16.mxu0 %v1628_v5  ;;  %1546 = vmatprep.subr.bf16.mxu1 %v1777_v1  ;;  %v1635_v12 = vld [vmem:[%s2519_s0 + $0x20] sm:$0xff]   ;;  %v1638_v15 = vld [vmem:[%s2519_s0 + $0x18] sm:$0xff]   ;;  %v1641_v18 = vld [vmem:[%s2519_s0 + $0x10] sm:$0xff]  }
   0x6   :  { %v1636_v13 = vld [vmem:[%s2519_s0 + $0xa0] sm:$0xff]   ;;  %v1639_v16 = vld [vmem:[%s2519_s0 + $0x98] sm:$0xff]   ;;  %v1642_v19 = vld [vmem:[%s2519_s0 + $0x90] sm:$0xff]  }
   0x7   :  { %v1643_v20 = vld [vmem:[%s2519_s0 + $0x48] sm:$0xff]   ;;  %v1646_v23 = vld [vmem:[%s2519_s0 + $0x40] sm:$0xff]   ;;  %v1659_v33 = vld [vmem:[%s2520_s2 + $0x30] ss:$12 sps:$4 sm:$0xff]  }
   0x8   :  { %1418 = vmatpush3.bf16.msra.mxu0 %v1629_v6  ;;  %1547 = vmatpush3.bf16.msra.mxu1 %v1630_v7  ;;  %v1644_v21 = vld [vmem:[%s2519_s0 + $0x8] sm:$0xff]   ;;  %v1651_v24 = vld [vmem:[%s2520_s2 + $0x4] ss:$12 sps:$4 sm:$0xff]   ;;  %v1657_v32 = vld [vmem:[%s2520_s2 + $0x34] ss:$12 sps:$4 sm:$0xff]  }
   0x9   :  { %1419 = vmatprep.subr.bf16.mxu0 %v1631_v8  ;;  %1548 = vmatprep.subr.bf16.mxu1 %v1777_v1  ;;  %v1645_v22 = vld [vmem:[%s2519_s0 + $0x88] sm:$0xff]   ;;  %v1647_v25 = vld [vmem:[%s2519_s0] sm:$0xff]   ;;  %v129_v38 = vld [vmem:[%s2521_s3 + $0x18] sm:$0xff] }
   0xa   :  { %722 = vmatprep.mubr.bf16.mxu0 %v1651_v24  ;;  %v1648_v26 = vld [vmem:[%s2519_s0 + $0x80] sm:$0xff]   ;;  %v1652_v28 = vld [vmem:[%s2520_s2 + $0x8] ss:$12 sps:$4 sm:$0xff]   ;;  %v1661_v36 = vld [vmem:[%s2520_s2 + $0x4c] ss:$12 sps:$4 sm:$0xff]   ;;  %173 = vperm.xlu1 %1624, %v129_v38  }
   0xb   :  { %v1649_v27 = vld [vmem:[%s2520_s2] ss:$12 sps:$4 sm:$0xff]   ;;  %v1653_v29 = vld [vmem:[%s2520_s2 + $0x1c] ss:$12 sps:$4 sm:$0xff]   ;;  %v1655_v30 = vld [vmem:[%s2520_s2 + $0x18] ss:$12 sps:$4 sm:$0xff]  }
   0xc   :  { %1420 = vmatpush3.bf16.msra.mxu0 %v1632_v9  ;;  %1549 = vmatpush3.bf16.msra.mxu1 %v1633_v10  ;;  %v1656_v31 = vld [vmem:[%s2520_s2 + $0x20] ss:$12 sps:$4 sm:$0xff]   ;;  %v1660_v35 = vld [vmem:[%s2520_s2 + $0x38] ss:$12 sps:$4 sm:$0xff]   ;;  %v132_v39 = vld [vmem:[%s2521_s3 + $0x30] sm:$0xff] }
   0xd   :  { %1421 = vmatprep.subr.bf16.mxu0 %v1634_v11  ;;  %1550 = vmatprep.subr.bf16.mxu1 %v1777_v1  ;;  %v126_v34 = vld [vmem:[%s2521_s3] sm:$0xff]  ;;  %v127_v37 = vld [vmem:[%s2521_s3 + $0x8] sm:$0xff]  ;;  %v1664_v42 = vld [vmem:[%s2520_s2 + $0x50] ss:$12 sps:$4 sm:$0xff]  }
   0xe   :  { %158 = vperm.xlu0 %1623, %v126_v34   ;;  %v130_v40 = vld [vmem:[%s2521_s3 + $0x20] sm:$0xff]  ;;  %v1663_v41 = vld [vmem:[%s2520_s2 + $0x48] ss:$12 sps:$4 sm:$0xff]   ;;  %v133_v44 = vld [vmem:[%s2521_s3 + $0x38] sm:$0xff] }
   0xf   :  { %178 = vperm.xlu1 %1624, %v130_v40   ;;  %v1665_v43 = vld [vmem:[%s2520_s2 + $0x64] ss:$12 sps:$4 sm:$0xff]   ;;  %v135_v45 = vld [vmem:[%s2521_s3 + $0x48] sm:$0xff]  ;;  %v137_v53 = vld [vmem:[%s2521_s3 + $0x58] sm:$0xff] }
  0x10   :  { %1422 = vmatpush3.bf16.msra.mxu0 %v1635_v12  ;;  %1551 = vmatpush3.bf16.msra.mxu1 %v1636_v13  ;;  %v136_v46 = vld [vmem:[%s2521_s3 + $0x50] sm:$0xff]  ;;  %v1667_v48 = vld [vmem:[%s2520_s2 + $0x60] ss:$12 sps:$4 sm:$0xff]   ;;  %v1669_v51 = vld [vmem:[%s2520_s2 + $0x7c] ss:$12 sps:$4 sm:$0xff]  }
  0x11   :  { %1423 = vmatprep.subr.bf16.mxu0 %v1637_v14  ;;  %1552 = vmatprep.subr.bf16.mxu1 %v1777_v1  ;;  %v128_v47 = vld [vmem:[%s2521_s3 + $0x10] sm:$0xff]  ;;  %v131_v50 = vld [vmem:[%s2521_s3 + $0x28] sm:$0xff]  ;;  %v134_v52 = vld [vmem:[%s2521_s3 + $0x40] sm:$0xff] }
  0x12   :  { %163 = vperm.xlu0 %1623, %v127_v37   ;;  %v1668_v49 = vld [vmem:[%s2520_s2 + $0x68] ss:$12 sps:$4 sm:$0xff]   ;;  %v138_v54 = vld [vmem:[%s2521_s3 + $0x60] sm:$0xff]  ;;  %v141_v59 = vld [vmem:[%s2521_s3 + $0x78] sm:$0xff] }
  0x13   :  { %193 = vperm.xlu1 %1624, %v133_v44   ;;  %v1671_v55 = vld [vmem:[%s2520_s2 + $0x78] ss:$12 sps:$4 sm:$0xff]   ;;  %v139_v56 = vld [vmem:[%s2521_s3 + $0x68] sm:$0xff]  ;;  %v1673_v58 = vld [vmem:[%s2520_s2 + $0x94] ss:$12 sps:$4 sm:$0xff]  }
  0x14   :  { %1424 = vmatpush3.bf16.msra.mxu0 %v1638_v15  ;;  %1553 = vmatpush3.bf16.msra.mxu1 %v1639_v16  ;;  %v1672_v57 = vld [vmem:[%s2520_s2 + $0x80] ss:$12 sps:$4 sm:$0xff]   ;;  %v140_v61 = vld [vmem:[%s2521_s3 + $0x70] sm:$0xff]  ;;  %v1676_v0 = vld [vmem:[%s2520_s2 + $0x98] ss:$12 sps:$4 sm:$0xff]  }
  0x15   :  { %1425 = vmatprep.subr.bf16.mxu0 %v1640_v17  ;;  %1554 = vmatprep.subr.bf16.mxu1 %v1777_v1  ;;  %v142_v60 = vld [vmem:[%s2521_s3 + $0x80] sm:$0xff]  ;;  %v1675_v62 = vld [vmem:[%s2520_s2 + $0x90] ss:$12 sps:$4 sm:$0xff]   ;;  %v143_v63 = vld [vmem:[%s2521_s3 + $0x88] sm:$0xff] }
  0x16   :  { %188 = vperm.xlu0 %1623, %v132_v39   ;;  %v1677_v2 = vld [vmem:[%s2520_s2 + $0xac] ss:$12 sps:$4 sm:$0xff]   ;;  %v144_v3 = vld [vmem:[%s2521_s3 + $0x90] sm:$0xff]  ;;  %v146_v10 = vld [vmem:[%s2521_s3 + $0xa0] sm:$0xff] }
  0x17   :  { %208 = vperm.xlu1 %1624, %v136_v46   ;;  %v145_v4 = vld [vmem:[%s2521_s3 + $0x98] sm:$0xff]  ;;  %v147_v5 = vld [vmem:[%s2521_s3 + $0xa8] sm:$0xff]  ;;  %v148_v7 = vld [vmem:[%s2521_s3 + $0xb0] sm:$0xff] }
  0x18   :  { %1426 = vmatpush3.bf16.msra.mxu0 %v1641_v18  ;;  %1555 = vmatpush3.bf16.msra.mxu1 %v1642_v19  ;;  %v1679_v6 = vld [vmem:[%s2520_s2 + $0xa8] ss:$12 sps:$4 sm:$0xff]   ;;  %v1680_v8 = vld [vmem:[%s2520_s2 + $0xb0] ss:$12 sps:$4 sm:$0xff]   ;;  %v150_v12 = vld [vmem:[%s2521_s3 + $0xc0] sm:$0xff] }
  0x19   :  { %1427 = vmatprep.subr.bf16.mxu0 %v1643_v20  ;;  %1556 = vmatprep.subr.bf16.mxu1 %v1777_v1  ;;  %v1681_v9 = vld [vmem:[%s2520_s2 + $0xc4] ss:$12 sps:$4 sm:$0xff]   ;;  %v149_v11 = vld [vmem:[%s2521_s3 + $0xb8] sm:$0xff]  ;;  %v1683_v13 = vld [vmem:[%s2520_s2 + $0xc0] ss:$12 sps:$4 sm:$0xff]  }
  0x1a   :  { %203 = vperm.xlu0 %1623, %v135_v45   ;;  %v151_v14 = vld [vmem:[%s2521_s3 + $0xc8] sm:$0xff]  ;;  %v153_v17 = vld [vmem:[%s2521_s3 + $0xd8] sm:$0xff]  ;;  %v154_v18 = vld [vmem:[%s2521_s3 + $0xe0] sm:$0xff] }
  0x1b   :  { %183 = vperm.xlu1 %1624, %v131_v50   ;;  %v1684_v15 = vld [vmem:[%s2520_s2 + $0xc8] ss:$12 sps:$4 sm:$0xff]   ;;  %v1687_v20 = vld [vmem:[%s2520_s2 + $0xd8] ss:$12 sps:$4 sm:$0xff]   ;;  %v1691_v24 = vld [vmem:[%s2520_s2 + $0xf0] ss:$12 sps:$4 sm:$0xff]  }
  0x1c   :  { %1428 = vmatpush3.bf16.msra.mxu0 %v1644_v21  ;;  %1557 = vmatpush3.bf16.msra.mxu1 %v1645_v22  ;;  %v1685_v16 = vld [vmem:[%s2520_s2 + $0xdc] ss:$12 sps:$4 sm:$0xff]   ;;  %v152_v19 = vld [vmem:[%s2521_s3 + $0xd0] sm:$0xff]  ;;  %v1688_v22 = vld [vmem:[%s2520_s2 + $0xe0] ss:$12 sps:$4 sm:$0xff]  }
  0x1d   :  { %1429 = vmatprep.subr.bf16.mxu0 %v1646_v23  ;;  %1558 = vmatprep.subr.bf16.mxu1 %v1777_v1  ;;  %v155_v21 = vld [vmem:[%s2521_s3 + $0xe8] sm:$0xff]  ;;  %v1689_v23 = vld [vmem:[%s2520_s2 + $0xf4] ss:$12 sps:$4 sm:$0xff]   ;;  %v1708_v37 = vld [vmem:[%s2520_s2 + $0x158] ss:$12 sps:$4 sm:$0xff]  }
  0x1e   :  { %168 = vperm.xlu0 %1623, %v128_v47   ;;  %v1704_v34 = vld [vmem:[%s2520_s2 + $0x140] ss:$12 sps:$4 sm:$0xff]  }
  0x1f   :  { %213 = vperm.xlu1 %1624, %v137_v53  }
  0x20   :  { %1430 = vmatpush3.bf16.msra.mxu0 %v1647_v25  ;;  %1559 = vmatpush3.bf16.msra.mxu1 %v1648_v26  ;;  %v1692_v25 = vld [vmem:[%s2520_s2 + $0xf8] ss:$12 sps:$4 sm:$0xff]  }
  0x21   :  { %v1693_v26 = vld [vmem:[%s2520_s2 + $0x10c] ss:$12 sps:$4 sm:$0xff]  }
  0x22   :  { %198 = vperm.xlu0 %1623, %v134_v52  }
  0x23   :  { %723 = vmatmul.mubr.bf16.vlgmr.msra.gmra.mxu0 %v1649_v27  ;;  %1561 = vmatmul.mubr.bf16.vlgmr.msra.gmra.mxu1 %v1652_v28  ;;  %v1695_v27 = vld [vmem:[%s2520_s2 + $0x108] ss:$12 sps:$4 sm:$0xff]   ;;  %v1696_v28 = vld [vmem:[%s2520_s2 + $0x110] ss:$12 sps:$4 sm:$0xff]  }
  0x24   :  { %730 = vmatprep.mubr.bf16.mxu0 %v1653_v29  ;;  %1564 = vmatprep.mubr.msk.bf16.mxu1 %vm1778_vm0, %v1777_v1  ;;  %v1697_v29 = vld [vmem:[%s2520_s2 + $0x124] ss:$12 sps:$4 sm:$0xff]  }
  0x25   :  { %223 = vperm.xlu1 %1624, %v139_v56  }
  0x26   :  { %218 = vperm.xlu0 %1623, %v138_v54  }
  0x29   :  { %238 = vperm.xlu1 %1624, %v142_v60  }
  0x2a   :  { %233 = vperm.xlu0 %1623, %v141_v59  }
  0x2b   :  { %731 = vmatmul.mubr.bf16.gmra.mxu0 %v1655_v30  ;;  %1565 = vmatmul.mubr.bf16.gmra.mxu1 %v1656_v31  ;;  %v1699_v30 = vld [vmem:[%s2520_s2 + $0x120] ss:$12 sps:$4 sm:$0xff]   ;;  %v1700_v31 = vld [vmem:[%s2520_s2 + $0x128] ss:$12 sps:$4 sm:$0xff]  }
  0x2c   :  { %738 = vmatprep.mubr.bf16.mxu0 %v1657_v32  ;;  %1568 = vmatprep.mubr.msk.bf16.mxu1 %vm1778_vm0, %v1777_v1  ;;  %v1701_v32 = vld [vmem:[%s2520_s2 + $0x13c] ss:$12 sps:$4 sm:$0xff]  }
  0x2d   :  { %243 = vperm.xlu1 %1624, %v143_v63  }
  0x2e   :  { %228 = vperm.xlu0 %1623, %v140_v61  }
  0x31   :  { %253 = vperm.xlu1 %1624, %v145_v4  }
  0x32   :  { %248 = vperm.xlu0 %1623, %v144_v3  }
  0x33   :  { %739 = vmatmul.mubr.bf16.gmra.mxu0 %v1659_v33  ;;  %1569 = vmatmul.mubr.bf16.gmra.mxu1 %v1660_v35  ;;  %v1703_v33 = vld [vmem:[%s2520_s2 + $0x138] ss:$12 sps:$4 sm:$0xff]   ;;  %v1705_v35 = vld [vmem:[%s2520_s2 + $0x154] ss:$12 sps:$4 sm:$0xff]  }
  0x34   :  { %746 = vmatprep.mubr.bf16.mxu0 %v1661_v36  ;;  %1572 = vmatprep.mubr.msk.bf16.mxu1 %vm1778_vm0, %v1777_v1  ;;  %v1707_v36 = vld [vmem:[%s2520_s2 + $0x150] ss:$12 sps:$4 sm:$0xff]  }
  0x35   :  { %268 = vperm.xlu1 %1624, %v148_v7  }
  0x36   :  { %263 = vperm.xlu0 %1623, %v147_v5  }
  0x39   :  { %273 = vperm.xlu1 %1624, %v149_v11  }
  0x3a   :  { %258 = vperm.xlu0 %1623, %v146_v10  }
  0x3b   :  { %747 = vmatmul.mubr.bf16.gmra.mxu0 %v1663_v41  ;;  %1573 = vmatmul.mubr.bf16.gmra.mxu1 %v1664_v42 }
  0x3c   :  { %754 = vmatprep.mubr.bf16.mxu0 %v1665_v43  ;;  %1576 = vmatprep.mubr.msk.bf16.mxu1 %vm1778_vm0, %v1777_v1 }
  0x3d   :  { %283 = vperm.xlu1 %1624, %v151_v14  }
  0x3e   :  { %278 = vperm.xlu0 %1623, %v150_v12  }
  0x41   :  { %298 = vperm.xlu1 %1624, %v154_v18  }
  0x42   :  { %293 = vperm.xlu0 %1623, %v153_v17  }
  0x43   :  { %755 = vmatmul.mubr.bf16.gmra.mxu0 %v1667_v48  ;;  %1577 = vmatmul.mubr.bf16.gmra.mxu1 %v1668_v49 }
  0x44   :  { %762 = vmatprep.mubr.bf16.mxu0 %v1669_v51  ;;  %1580 = vmatprep.mubr.msk.bf16.mxu1 %vm1778_vm0, %v1777_v1 }
  0x45   :  { %303 = vperm.xlu1 %1624, %v155_v21  }
  0x46   :  { %288 = vperm.xlu0 %1623, %v152_v19  }
  0x4b   :  { %763 = vmatmul.mubr.bf16.gmra.mxu0 %v1671_v55  ;;  %1581 = vmatmul.mubr.bf16.gmra.mxu1 %v1672_v57 }
  0x4c   :  { %770 = vmatprep.mubr.bf16.mxu0 %v1673_v58  ;;  %1584 = vmatprep.mubr.msk.bf16.mxu1 %vm1778_vm0, %v1777_v1 }
  0x53   :  { %771 = vmatmul.mubr.bf16.gmra.mxu0 %v1675_v62  ;;  %1585 = vmatmul.mubr.bf16.gmra.mxu1 %v1676_v0 }
  0x54   :  { %778 = vmatprep.mubr.bf16.mxu0 %v1677_v2  ;;  %1588 = vmatprep.mubr.msk.bf16.mxu1 %vm1778_vm0, %v1777_v1 }
  0x5b   :  { %779 = vmatmul.mubr.bf16.gmra.mxu0 %v1679_v6  ;;  %1589 = vmatmul.mubr.bf16.gmra.mxu1 %v1680_v8 }
  0x5c   :  { %786 = vmatprep.mubr.bf16.mxu0 %v1681_v9  ;;  %1592 = vmatprep.mubr.msk.bf16.mxu1 %vm1778_vm0, %v1777_v1 }
  0x63   :  { %787 = vmatmul.mubr.bf16.gmra.mxu0 %v1683_v13  ;;  %1593 = vmatmul.mubr.bf16.gmra.mxu1 %v1684_v15 }
  0x64   :  { %794 = vmatprep.mubr.bf16.mxu0 %v1685_v16  ;;  %1596 = vmatprep.mubr.msk.bf16.mxu1 %vm1778_vm0, %v1777_v1 }
  0x6b   :  { %795 = vmatmul.mubr.bf16.gmra.mxu0 %v1687_v20  ;;  %1597 = vmatmul.mubr.bf16.gmra.mxu1 %v1688_v22 }
  0x6c   :  { %802 = vmatprep.mubr.bf16.mxu0 %v1689_v23  ;;  %1600 = vmatprep.mubr.msk.bf16.mxu1 %vm1778_vm0, %v1777_v1 }
  0x73   :  { %803 = vmatmul.mubr.bf16.gmra.mxu0 %v1691_v24  ;;  %1601 = vmatmul.mubr.bf16.gmra.mxu1 %v1692_v25 }
  0x74   :  { %810 = vmatprep.mubr.bf16.mxu0 %v1693_v26  ;;  %1604 = vmatprep.mubr.msk.bf16.mxu1 %vm1778_vm0, %v1777_v1 }
  0x7b   :  { %811 = vmatmul.mubr.bf16.gmra.mxu0 %v1695_v27  ;;  %1605 = vmatmul.mubr.bf16.gmra.mxu1 %v1696_v28 }
  0x7c   :  { %818 = vmatprep.mubr.bf16.mxu0 %v1697_v29  ;;  %1608 = vmatprep.mubr.msk.bf16.mxu1 %vm1778_vm0, %v1777_v1 }
  0x83   :  { %819 = vmatmul.mubr.bf16.gmra.mxu0 %v1699_v30  ;;  %1609 = vmatmul.mubr.bf16.gmra.mxu1 %v1700_v31 }
  0x84   :  { %826 = vmatprep.mubr.bf16.mxu0 %v1701_v32  ;;  %1612 = vmatprep.mubr.msk.bf16.mxu1 %vm1778_vm0, %v1777_v1 }
  0x85   :  { %v174_v40 = vpop.permute.xlu1 %173 }
  0x89   :  { %v159_v38 = vpop.permute.xlu0 %158 }
  0x8b   :  { %827 = vmatmul.mubr.bf16.gmra.mxu0 %v1703_v33  ;;  %1613 = vmatmul.mubr.bf16.gmra.mxu1 %v1704_v34 }
  0x8c   :  { %834 = vmatprep.mubr.bf16.mxu0 %v1705_v35  ;;  %1616 = vmatprep.mubr.msk.bf16.mxu1 %vm1778_vm0, %v1777_v1  ;;  %v179_v1 = vpop.permute.xlu1 %178 }
  0x8d   :  { %v164_v39 = vpop.permute.xlu0 %163 }
  0x90   :  { %v194_v58 = vpop.permute.xlu1 %193 }
  0x91   :  { %v189_v41 = vpop.permute.xlu0 %188 }
  0x93   :  { %835 = vmatmul.mubr.bf16.gmra.mxu0 %v1707_v36  ;;  %1617 = vmatmul.mubr.bf16.gmra.mxu1 %v1708_v37 }
  0x94   :  { %v209_v9 = vpop.permute.xlu1 %208 }
  0x95   :  { %v2140_v48 = vpop.permute.xlu0 %203 }
  0x98   :  { %v184_v20 = vpop.permute.xlu1 %183 }
  0x99   :  { %v169_v60 = vpop.permute.xlu0 %168 }
  0xe3   :  { %v1431_v42 = vpop.f32.mrf.mxu0  ;;  %v877_v43 = vpop.f32.mrf.mxu1 }
  0xe5   :  { %v1432_v44 = vpop.f32.mrf.mxu0  ;;  %v1562_v46 = vpop.f32.mrf.mxu1 }
  0xe6   :  { %v1433_v45 = vadd.f32 %v1432_v44, %v1431_v42 }
  0xe7   :  { %v1434_v47 = vpop.f32.mrf.mxu0  ;;  %v880_v50 = vpop.f32.mrf.mxu1 }
  0xe8   :  { %v725_v49 = vadd.f32 %v1433_v45, %v159_v38 }
  0xe9   :  { %v1435_v51 = vpop.f32.mrf.mxu0  ;;  %v1563_v54 = vpop.f32.mrf.mxu1 }
  0xea   :  { %v2142_v52 = vadd.f32 %v877_v43, %v725_v49  ;;  %v1436_v53 = vadd.f32 %v1435_v51, %v1434_v47 }
  0xeb   :  { %v1437_v55 = vpop.f32.mrf.mxu0  ;;  %v885_v57 = vpop.f32.mrf.mxu1 }
  0xec   :  { %v728_v56 = vadd.f32 %v1436_v53, %v164_v39 }
  0xed   :  { %v1438_v59 = vpop.f32.mrf.mxu0  ;;  %v1566_v63 = vpop.f32.mrf.mxu1 }
  0xee   :  { %v2144_v61 = vadd.f32 %v880_v50, %v728_v56  ;;  %v1439_v62 = vadd.f32 %v1438_v59, %v1437_v55 }
  0xef   :  { %v1440_v0 = vpop.f32.mrf.mxu0  ;;  %v888_v3 = vpop.f32.mrf.mxu1 }
  0xf0   :  { %v733_v2 = vadd.f32 %v1439_v62, %v169_v60 }
  0xf1   :  { %v1441_v4 = vpop.f32.mrf.mxu0  ;;  %v1567_v7 = vpop.f32.mrf.mxu1 }
  0xf2   :  { %v2146_v5 = vadd.f32 %v885_v57, %v733_v2  ;;  %v1442_v6 = vadd.f32 %v1441_v4, %v1440_v0 }
  0xf3   :  { %v1443_v8 = vpop.f32.mrf.mxu0  ;;  %v893_v11 = vpop.f32.mrf.mxu1 }
  0xf4   :  { %2530 = vst [vmem:[#allocation2_spill] sm:$0xff] %v2146_v5  ;;  %v736_v10 = vadd.f32 %v1442_v6, %v174_v40 }
  0xf5   :  { %v1444_v12 = vpop.f32.mrf.mxu0  ;;  %v1570_v15 = vpop.f32.mrf.mxu1 }
  0xf6   :  { %v2148_v13 = vadd.f32 %v888_v3, %v736_v10  ;;  %v1445_v14 = vadd.f32 %v1444_v12, %v1443_v8  ;;  %v214_v8 = vpop.permute.xlu1 %213 }
  0xf7   :  { %v1446_v16 = vpop.f32.mrf.mxu0  ;;  %v896_v18 = vpop.f32.mrf.mxu1 }
  0xf8   :  { %v741_v17 = vadd.f32 %v1445_v14, %v179_v1  ;;  %v199_v1 = vpop.permute.xlu0 %198 }
  0xf9   :  { %v1447_v19 = vpop.f32.mrf.mxu0  ;;  %v1571_v23 = vpop.f32.mrf.mxu1 }
  0xfa   :  { %v2150_v21 = vadd.f32 %v893_v11, %v741_v17  ;;  %v1448_v22 = vadd.f32 %v1447_v19, %v1446_v16 }
  0xfb   :  { %v1449_v24 = vpop.f32.mrf.mxu0  ;;  %v901_v26 = vpop.f32.mrf.mxu1 }
  0xfc   :  { %v744_v25 = vadd.f32 %v1448_v22, %v184_v20  ;;  %v219_v14 = vpop.permute.xlu0 %218 }
  0xfd   :  { %v1450_v27 = vpop.f32.mrf.mxu0  ;;  %v1574_v30 = vpop.f32.mrf.mxu1 }
  0xfe   :  { %v2152_v28 = vadd.f32 %v896_v18, %v744_v25  ;;  %v1451_v29 = vadd.f32 %v1450_v27, %v1449_v24 }
  0xff   :  { %v1452_v31 = vpop.f32.mrf.mxu0  ;;  %v904_v33 = vpop.f32.mrf.mxu1 }
 0x100   :  { %2531 = vst [vmem:[#allocation3_spill] sm:$0xff] %v2152_v28  ;;  %v749_v32 = vadd.f32 %v1451_v29, %v189_v41 }
 0x101   :  { %v1453_v34 = vpop.f32.mrf.mxu0  ;;  %v1575_v37 = vpop.f32.mrf.mxu1 }
 0x102   :  { %v2154_v35 = vadd.f32 %v901_v26, %v749_v32  ;;  %v1454_v36 = vadd.f32 %v1453_v34, %v1452_v31  ;;  %v234_v26 = vpop.permute.xlu0 %233  ;;  %v224_v32 = vpop.permute.xlu1 %223 }
 0x103   :  { %v1455_v38 = vpop.f32.mrf.mxu0  ;;  %v909_v42 = vpop.f32.mrf.mxu1 }
 0x104   :  { %v996_v39 = vmax.f32 %v2142_v52, %v2154_v35  ;;  %v752_v40 = vadd.f32 %v1454_v36, %v194_v58 }
 0x105   :  { %v1456_v43 = vpop.f32.mrf.mxu0  ;;  %v1578_v46 = vpop.f32.mrf.mxu1 }
 0x106   :  { %v2158_v44 = vadd.f32 %v904_v33, %v752_v40  ;;  %v1457_v45 = vadd.f32 %v1456_v43, %v1455_v38 }
 0x107   :  { %v1458_v47 = vpop.f32.mrf.mxu0  ;;  %v912_v50 = vpop.f32.mrf.mxu1 }
 0x108   :  { %v1005_v41 = vmax.f32 %v2144_v61, %v2158_v44  ;;  %v757_v49 = vadd.f32 %v1457_v45, %v199_v1  ;;  %v229_v45 = vpop.permute.xlu0 %228 }
 0x109   :  { %v1459_v51 = vpop.f32.mrf.mxu0  ;;  %v1579_v55 = vpop.f32.mrf.mxu1 }
 0x10a   :  { %v2162_v53 = vadd.f32 %v909_v42, %v757_v49  ;;  %v1460_v54 = vadd.f32 %v1459_v51, %v1458_v47 }
 0x10b   :  { %v1461_v56 = vpop.f32.mrf.mxu0  ;;  %v917_v59 = vpop.f32.mrf.mxu1 }
 0x10c   :  { %2532 = vst [vmem:[#allocation4_spill] sm:$0xff] %v2162_v53  ;;  %v1014_v57 = vmax.f32 %v2146_v5, %v2162_v53  ;;  %v760_v58 = vadd.f32 %v1460_v54, %v2140_v48 }
 0x10d   :  { %v1462_v60 = vpop.f32.mrf.mxu0  ;;  %v1582_v0 = vpop.f32.mrf.mxu1 }
 0x10e   :  { %v2167_v62 = vadd.f32 %v912_v50, %v760_v58  ;;  %v1463_v63 = vadd.f32 %v1462_v60, %v1461_v56  ;;  %v239_v60 = vpop.permute.xlu1 %238 }
 0x10f   :  { %v1464_v2 = vpop.f32.mrf.mxu0  ;;  %v920_v6 = vpop.f32.mrf.mxu1 }
 0x110   :  { %v997_v3 = vmax.f32 %v2148_v13, %v2167_v62  ;;  %v765_v4 = vadd.f32 %v1463_v63, %v209_v9 }
 0x111   :  { %v1465_v7 = vpop.f32.mrf.mxu0  ;;  %v1583_v12 = vpop.f32.mrf.mxu1 }
 0x112   :  { %v2171_v10 = vadd.f32 %v917_v59, %v765_v4  ;;  %v1466_v11 = vadd.f32 %v1465_v7, %v1464_v2 }
 0x113   :  { %v1467_v48 = vpop.f32.mrf.mxu0  ;;  %v925_v17 = vpop.f32.mrf.mxu1 }
 0x114   :  { %v1006_v15 = vmax.f32 %v2150_v21, %v2171_v10  ;;  %v768_v16 = vadd.f32 %v1466_v11, %v214_v8 }
 0x115   :  { %v1468_v18 = vpop.f32.mrf.mxu0  ;;  %v1586_v22 = vpop.f32.mrf.mxu1 }
 0x116   :  { %v2175_v19 = vadd.f32 %v920_v6, %v768_v16  ;;  %v1469_v20 = vadd.f32 %v1468_v18, %v1467_v48  ;;  %v244_v48 = vpop.permute.xlu1 %243 }
 0x117   :  { %v1470_v9 = vpop.f32.mrf.mxu0  ;;  %v928_v25 = vpop.f32.mrf.mxu1 }
 0x118   :  { %2533 = vst [vmem:[#allocation5_spill] sm:$0xff] %v2175_v19  ;;  %v1015_v23 = vmax.f32 %v2152_v28, %v2175_v19  ;;  %v773_v24 = vadd.f32 %v1469_v20, %v219_v14 }
 0x119   :  { %v1471_v27 = vpop.f32.mrf.mxu0  ;;  %v1587_v31 = vpop.f32.mrf.mxu1 }
 0x11a   :  { %v2179_v29 = vadd.f32 %v925_v17, %v773_v24  ;;  %v1472_v30 = vadd.f32 %v1471_v27, %v1470_v9 }
 0x11b   :  { %v1473_v33 = vpop.f32.mrf.mxu0  ;;  %v933_v37 = vpop.f32.mrf.mxu1 }
 0x11c   :  { %v2182_v34 = vmax.f32 %v996_v39, %v2179_v29  ;;  %v776_v36 = vadd.f32 %v1472_v30, %v224_v32 }
 0x11d   :  { %v1474_v38 = vpop.f32.mrf.mxu0  ;;  %v1590_v43 = vpop.f32.mrf.mxu1 }
 0x11e   :  { %v2184_v40 = vadd.f32 %v928_v25, %v776_v36  ;;  %v1475_v42 = vadd.f32 %v1474_v38, %v1473_v33  ;;  %v249_v43 = vpop.permute.xlu0 %248 }
 0x11f   :  { %v1476_v46 = vpop.f32.mrf.mxu0  ;;  %v936_v49 = vpop.f32.mrf.mxu1 }
 0x120   :  { %v2187_v1 = vmax.f32 %v1005_v41, %v2184_v40  ;;  %v781_v47 = vadd.f32 %v1475_v42, %v229_v45 }
 0x121   :  { %v1477_v50 = vpop.f32.mrf.mxu0  ;;  %v1591_v39 = vpop.f32.mrf.mxu1 }
 0x122   :  { %v2189_v51 = vadd.f32 %v933_v37, %v781_v47  ;;  %v1478_v54 = vadd.f32 %v1477_v50, %v1476_v46  ;;  %v264_v39 = vpop.permute.xlu0 %263 }
 0x123   :  { %v1479_v55 = vpop.f32.mrf.mxu0  ;;  %v941_v59 = vpop.f32.mrf.mxu1 }
 0x124   :  { %2534 = vst [vmem:[#allocation6_spill] sm:$0xff] %v2189_v51  ;;  %v2192_v56 = vmax.f32 %v1014_v57, %v2189_v51  ;;  %v784_v58 = vadd.f32 %v1478_v54, %v234_v26 }
 0x125   :  { %v1480_v63 = vpop.f32.mrf.mxu0  ;;  %v1594_v41 = vpop.f32.mrf.mxu1 }
 0x126   :  { %2535 = vst [vmem:[#allocation7_spill] sm:$0xff] %v2192_v56  ;;  %v2194_v0 = vadd.f32 %v936_v49, %v784_v58  ;;  %v1481_v2 = vadd.f32 %v1480_v63, %v1479_v55  ;;  %v254_v49 = vpop.permute.xlu1 %253 }
 0x127   :  { %v1482_v4 = vpop.f32.mrf.mxu0  ;;  %v944_v8 = vpop.f32.mrf.mxu1 }
 0x128   :  { %v2197_v6 = vmax.f32 %v997_v3, %v2194_v0  ;;  %v789_v7 = vadd.f32 %v1481_v2, %v239_v60 }
 0x129   :  { %v1483_v11 = vpop.f32.mrf.mxu0  ;;  %v1595_v57 = vpop.f32.mrf.mxu1 }
 0x12a   :  { %v2199_v12 = vadd.f32 %v941_v59, %v789_v7  ;;  %v1484_v14 = vadd.f32 %v1483_v11, %v1482_v4  ;;  %v269_v63 = vpop.permute.xlu1 %268  ;;  %v2221_v4 = vpop.permute.xlu0 %258 }
 0x12b   :  { %v1485_v16 = vpop.f32.mrf.mxu0  ;;  %v949_v20 = vpop.f32.mrf.mxu1 }
 0x12c   :  { %v2202_v17 = vmax.f32 %v1006_v15, %v2199_v12  ;;  %v792_v18 = vadd.f32 %v1484_v14, %v244_v48 }
 0x12d   :  { %v1486_v22 = vpop.f32.mrf.mxu0  ;;  %v1598_v24 = vpop.f32.mrf.mxu1 }
 0x12e   :  { %v2204_v9 = vadd.f32 %v944_v8, %v792_v18  ;;  %v1487_v14 = vadd.f32 %v1486_v22, %v1485_v16  ;;  %v2223_v18 = vpop.permute.xlu1 %273 }
 0x12f   :  { %v1488_v3 = vpop.f32.mrf.mxu0  ;;  %v2209_v26 = vpop.f32.mrf.mxu1 }
 0x130   :  { %2536 = vst [vmem:[#allocation8_spill] sm:$0xff] %v2204_v9  ;;  %v2207_v25 = vmax.f32 %v1015_v23, %v2204_v9 }
 0x131   :  { %v1489_v27 = vpop.f32.mrf.mxu0  ;;  %v1599_v30 = vpop.f32.mrf.mxu1 }
 0x132   :  { %2537 = vst [vmem:[#allocation9_spill] sm:$0xff] %v2207_v25  ;;  %v284_v28 = vpop.permute.xlu1 %283  ;;  %v1490_v5 = vadd.f32 %v1489_v27, %v1488_v3 }
 0x133   :  { %v2211_v31 = vpop.f32.mrf.mxu0  ;;  %v2213_v32 = vpop.f32.mrf.mxu1 }
 0x135   :  { %v2215_v15 = vpop.f32.mrf.mxu0  ;;  %v1602_v33 = vpop.f32.mrf.mxu1 }
 0x137   :  { %v1494_v36 = vpop.f32.mrf.mxu0  ;;  %v960_v37 = vpop.f32.mrf.mxu1 }
 0x139   :  { %v1495_v38 = vpop.f32.mrf.mxu0  ;;  %v1603_v42 = vpop.f32.mrf.mxu1 }
 0x13a   :  { %v1496_v57 = vadd.f32 %v1495_v38, %v1494_v36  ;;  %v279_v42 = vpop.permute.xlu0 %278 }
 0x13b   :  { %v1497_v45 = vpop.f32.mrf.mxu0  ;;  %v965_v46 = vpop.f32.mrf.mxu1 }
 0x13c   :  { %v808_v9 = vadd.f32 %v1496_v57, %v264_v39  ;;  %v800_v39 = vadd.f32 %v1490_v5, %v254_v49 }
 0x13d   :  { %v1498_v23 = vpop.f32.mrf.mxu0  ;;  %v1606_v47 = vpop.f32.mrf.mxu1 }
 0x13e   :  { %v1499_v25 = vadd.f32 %v1498_v23, %v1497_v45  ;;  %v2229_v36 = vadd.f32 %v960_v37, %v808_v9  ;;  %v299_v45 = vpop.permute.xlu1 %298 }
 0x13f   :  { %v2217_v50 = vpop.f32.mrf.mxu0  ;;  %v2219_v54 = vpop.f32.mrf.mxu1 }
 0x141   :  { %v1501_v55 = vpop.f32.mrf.mxu0  ;;  %v1607_v58 = vpop.f32.mrf.mxu1 }
 0x142   :  { %v797_v58 = vadd.f32 %v1487_v14, %v249_v43  ;;  %v813_v14 = vadd.f32 %v1499_v25, %v269_v63  ;;  %v2244_v25 = vadd.f32 %v2209_v26, %v800_v39 }
 0x143   :  { %v1503_v59 = vpop.f32.mrf.mxu0  ;;  %v973_v60 = vpop.f32.mrf.mxu1 }
 0x144   :  { %v2227_v22 = vadd.f32 %v949_v20, %v797_v58  ;;  %v1001_v20 = vmax.f32 %v2197_v6, %v2229_v36 }
 0x145   :  { %v1504_v2 = vpop.f32.mrf.mxu0  ;;  %v1610_v41 = vpop.f32.mrf.mxu1 }
 0x146   :  { %v1505_v30 = vadd.f32 %v1504_v2, %v1503_v59  ;;  %v294_v2 = vpop.permute.xlu0 %293  ;;  %v1000_v3 = vmax.f32 %v2182_v34, %v2227_v22  ;;  %v2246_v34 = vadd.f32 %v965_v46, %v813_v14 }
 0x147   :  { %v1506_v7 = vpop.f32.mrf.mxu0  ;;  %v976_v8 = vpop.f32.mrf.mxu1 }
 0x148   :  { %v821_v19 = vadd.f32 %v1505_v30, %v279_v42 }
 0x149   :  { %v1507_v11 = vpop.f32.mrf.mxu0  ;;  %v1611_v48 = vpop.f32.mrf.mxu1 }
 0x14a   :  { %v1508_v48 = vadd.f32 %v1507_v11, %v1506_v7 }
 0x14b   :  { %v1509_v24 = vpop.f32.mrf.mxu0  ;;  %v2225_v33 = vpop.f32.mrf.mxu1 }
 0x14c   :  { %2538 = vst [vmem:[#allocation10_spill] sm:$0xff] %v2225_v33  ;;  %v2231_v33 = vadd.f32 %v973_v60, %v821_v19  ;;  %v824_v23 = vadd.f32 %v1508_v48, %v284_v28  ;;  %v1502_v28 = vadd.f32 %v1501_v55, %v2217_v50  ;;  %v1010_v50 = vmax.f32 %v2202_v17, %v2246_v34 }
 0x14d   :  { %v1510_v47 = vpop.f32.mrf.mxu0  ;;  %v1614_v51 = vpop.f32.mrf.mxu1 }
 0x14e   :  { %v1002_v19 = vmax.f32 %v1000_v3, %v2231_v33  ;;  %v2253_v63 = vadd.f32 %v976_v8, %v824_v23  ;;  %v1511_v42 = vadd.f32 %v1510_v47, %v1509_v24 }
 0x14f   :  { %v1512_v41 = vpop.f32.mrf.mxu0  ;;  %v984_v53 = vpop.f32.mrf.mxu1 }
 0x151   :  { %v1513_v16 = vpop.f32.mrf.mxu0  ;;  %v1615_v59 = vpop.f32.mrf.mxu1 }
 0x152   :  { %v1514_v38 = vadd.f32 %v1513_v16, %v1512_v41  ;;  %v816_v16 = vadd.f32 %v1502_v28, %v2223_v18 }
 0x153   :  { %v1515_v56 = vpop.f32.mrf.mxu0  ;;  %v989_v51 = vpop.f32.mrf.mxu1  ;;  %v2539_v3 = vld [vmem:[#allocation10_spill] sm:$0xff] }
 0x154   :  { %v832_v43 = vadd.f32 %v1514_v38, %v294_v2  ;;  %v289_v38 = vpop.permute.xlu0 %288  ;;  %v2299_v14 = vadd.f32 %v2219_v54, %v816_v16 }
 0x155   :  { %v1516_v57 = vpop.f32.mrf.mxu0  ;;  %v1618_v37 = vpop.f32.mrf.mxu1  ;;  %v829_v24 = vadd.f32 %v1511_v42, %v289_v38 }
 0x156   :  { %v2237_v9 = vadd.f32 %v984_v53, %v832_v43  ;;  %v1517_v27 = vadd.f32 %v1516_v57, %v1515_v56  ;;  %v1493_v53 = vadd.f32 %v2215_v15, %v2211_v31  ;;  %v1009_v15 = vmax.f32 %v2187_v1, %v2244_v25  ;;  %v304_v43 = vpop.permute.xlu1 %303  ;;  %v2541_v37 = vld [vmem:[#allocation9_spill] sm:$0xff] }
 0x157   :  { %v2241_v5 = vpop.f32.mrf.mxu1  ;;  %v1518_v49 = vpop.f32.mrf.mxu0 }
 0x158   :  { %v1003_v60 = vmax.f32 %v1001_v20, %v2237_v9  ;;  %v837_v7 = vadd.f32 %v1517_v27, %v299_v45  ;;  %v2304_v20 = vadd.f32 %v2539_v3, %v829_v24  ;;  %v1019_v45 = vmax.f32 %v2541_v37, %v2299_v14 }
 0x159   :  { %v1619_v6 = vpop.f32.mrf.mxu1  ;;  %v1519_v8 = vpop.f32.mrf.mxu0 }
 0x15a   :  { %v2250_v56 = vmax.f32 %v1002_v19, %v1003_v60  ;;  %v2255_v11 = vadd.f32 %v989_v51, %v837_v7  ;;  %v1520_v17 = vadd.f32 %v1519_v8, %v1518_v49  ;;  %v2544_v8 = vld [vmem:[#allocation4_spill] sm:$0xff] }
 0x15c   :  { %v1023_v30 = vsub.f32 %v2142_v52, %v2250_v56  ;;  %v1026_v26 = vsub.f32 %v2148_v13, %v2250_v56  ;;  %v1029_v46 = vsub.f32 %v2154_v35, %v2250_v56  ;;  %v1032_v31 = vsub.f32 %v2167_v62, %v2250_v56 }
 0x15d   :  { %v1035_v55 = vsub.f32 %v2179_v29, %v2250_v56  ;;  %v1038_v52 = vsub.f32 %v2194_v0, %v2250_v56  ;;  %v805_v13 = vadd.f32 %v1493_v53, %v2221_v4  ;;  %v1011_v62 = vmax.f32 %v1009_v15, %v2253_v63 }
 0x15e   :  { %v1053_v35 = vmul.f32 1.442695, %v1023_v30  ;;  %v1059_v58 = vmul.f32 1.442695, %v1026_v26  ;;  %v1065_v41 = vmul.f32 1.442695, %v1029_v46  ;;  %v1012_v1 = vmax.f32 %v1010_v50, %v2255_v11 }
 0x15f   :  { %v1041_v29 = vsub.f32 %v2227_v22, %v2250_v56  ;;  %v1071_v0 = vmul.f32 1.442695, %v1032_v31  ;;  %v2282_v4 = vadd.f32 %v2213_v32, %v805_v13  ;;  %v1044_v47 = vsub.f32 %v2229_v36, %v2250_v56  ;;  %v2542_v31 = vld [vmem:[#allocation2_spill] sm:$0xff]  ;;  %v2543_v50 = vld [vmem:[#allocation3_spill] sm:$0xff] }
 0x160   :  { %1709 = vpow2.f32 %v1053_v35  ;;  %v2279_v59 = vmax.f32 %v1011_v62, %v1012_v1  ;;  %v1077_v2 = vmul.f32 1.442695, %v1035_v55  ;;  %v1083_v51 = vmul.f32 1.442695, %v1038_v52  ;;  %v2546_v35 = vld [vmem:[#allocation6_spill] sm:$0xff]  ;;  %v2547_v1 = vld [vmem:[#allocation8_spill] sm:$0xff] }
 0x161   :  { %1711 = vpow2.f32 %v1059_v58  ;;  %v1095_v54 = vmul.f32 1.442695, %v1044_v47 }
 0x162   :  { %1713 = vpow2.f32 %v1065_v41  ;;  %v1024_v18 = vsub.f32 %v2144_v61, %v2279_v59  ;;  %v1027_v48 = vsub.f32 %v2150_v21, %v2279_v59  ;;  %v1030_v22 = vsub.f32 %v2158_v44, %v2279_v59 }
 0x163   :  { %v1033_v32 = vsub.f32 %v2171_v10, %v2279_v59  ;;  %v1036_v39 = vsub.f32 %v2184_v40, %v2279_v59  ;;  %v1039_v36 = vsub.f32 %v2199_v12, %v2279_v59  ;;  %1715 = vpow2.f32 %v1071_v0  ;;  %v2540_v40 = vld [vmem:[#allocation7_spill] sm:$0xff] }
 0x164   :  { %v1089_v61 = vmul.f32 1.442695, %v1041_v29  ;;  %v840_v21 = vadd.f32 %v1520_v17, %v304_v43  ;;  %v1047_v44 = vsub.f32 %v2231_v33, %v2250_v56  ;;  %v1055_v57 = vmul.f32 1.442695, %v1024_v18 }
 0x165   :  { %1717 = vpow2.f32 %v1077_v2  ;;  %v1061_v10 = vmul.f32 1.442695, %v1027_v48  ;;  %v1018_v27 = vmax.f32 %v2540_v40, %v2282_v4  ;;  %v1050_v12 = vsub.f32 %v2237_v9, %v2250_v56 }
 0x166   :  { %1719 = vpow2.f32 %v1083_v51  ;;  %v1067_v23 = vmul.f32 1.442695, %v1030_v22  ;;  %v2313_v33 = vadd.f32 %v2241_v5, %v840_v21  ;;  %v1101_v19 = vmul.f32 1.442695, %v1047_v44 }
 0x167   :  { %1721 = vpow2.f32 %v1089_v61  ;;  %v1042_v60 = vsub.f32 %v2244_v25, %v2279_v59  ;;  %v1020_v7 = vmax.f32 %v1018_v27, %v2304_v20  ;;  %v1073_v49 = vmul.f32 1.442695, %v1033_v32 }
 0x168   :  { %1723 = vpow2.f32 %v1055_v57  ;;  %v1021_v9 = vmax.f32 %v1019_v45, %v2313_v33  ;;  %v1107_v53 = vmul.f32 1.442695, %v1050_v12  ;;  %v1079_v6 = vmul.f32 1.442695, %v1036_v39 }
 0x169   :  { %1725 = vpow2.f32 %v1061_v10  ;;  %v1045_v25 = vsub.f32 %v2246_v34, %v2279_v59  ;;  %v1085_v30 = vmul.f32 1.442695, %v1039_v36  ;;  %v1091_v26 = vmul.f32 1.442695, %v1042_v60  ;;  %v2545_v34 = vld [vmem:[#allocation5_spill] sm:$0xff] }
 0x16a   :  { %1727 = vpow2.f32 %v1095_v54  ;;  %v2321_v28 = vmax.f32 %v1020_v7, %v1021_v9  ;;  %v1048_v41 = vsub.f32 %v2253_v63, %v2279_v59  ;;  %v1051_v38 = vsub.f32 %v2255_v11, %v2279_v59  ;;  %v2384_v54 = vld [vmem:[%s2522_s1 + $0x8] sm:$0xff] }
 0x16b   :  { %1729 = vpow2.f32 %v1067_v23  ;;  %v1097_v29 = vmul.f32 1.442695, %v1045_v25 }
 0x16c   :  { %1731 = vpow2.f32 %v1101_v19  ;;  %v1025_v15 = vsub.f32 %v2542_v31, %v2321_v28  ;;  %v1028_v55 = vsub.f32 %v2543_v50, %v2321_v28  ;;  %v1031_v13 = vsub.f32 %v2544_v8, %v2321_v28 }
 0x16d   :  { %v2319_v56 = vpop.eup %1709  ;;  %1733 = vpow2.f32 %v1073_v49  ;;  %v1034_v42 = vsub.f32 %v2545_v34, %v2321_v28  ;;  %v1037_v58 = vsub.f32 %v2546_v35, %v2321_v28  ;;  %v1040_v16 = vsub.f32 %v2547_v1, %v2321_v28 }
 0x16e   :  { %v2323_v5 = vpop.eup %1711  ;;  %1735 = vpow2.f32 %v1107_v53  ;;  %v1057_v24 = vmul.f32 1.442695, %v1025_v15  ;;  %v1063_v47 = vmul.f32 1.442695, %v1028_v55  ;;  %v1069_v18 = vmul.f32 1.442695, %v1031_v13 }
 0x16f   :  { %v1113_v46 = vadd.f32 %v2323_v5, %v2319_v56  ;;  %v2333_v52 = vpop.eup %1713  ;;  %1737 = vpow2.f32 %v1079_v6  ;;  %v1103_v22 = vmul.f32 1.442695, %v1048_v41  ;;  %v1075_v11 = vmul.f32 1.442695, %v1034_v42 }
 0x170   :  { %v2346_v17 = vpop.eup %1715  ;;  %1739 = vpow2.f32 %v1085_v30  ;;  %v1109_v32 = vmul.f32 1.442695, %v1051_v38  ;;  %v1043_v36 = vsub.f32 %v2282_v4, %v2321_v28  ;;  %v1081_v61 = vmul.f32 1.442695, %v1037_v58  ;;  %v2378_v4 = vld [vmem:[%s2522_s1] sm:$0xff] }
 0x171   :  { %v1114_v62 = vadd.f32 %v2333_v52, %v1113_v46  ;;  %1741 = vpow2.f32 %v1091_v26  ;;  %v1087_v10 = vmul.f32 1.442695, %v1040_v16  ;;  %v1046_v37 = vsub.f32 %v2299_v14, %v2321_v28  ;;  %v2404_v26 = vld [vmem:[%s2522_s1 + $0x10] sm:$0xff] }
 0x172   :  { %v2351_v2 = vpop.eup %1717  ;;  %1743 = vpow2.f32 %v1057_v24  ;;  %v1093_v23 = vmul.f32 1.442695, %v1043_v36  ;;  %v1049_v49 = vsub.f32 %v2304_v20, %v2321_v28  ;;  %v1286_v53 = vadd.f32 %v2384_v54, %v2378_v4 }
 0x173   :  { %v1115_v0 = vadd.f32 %v2346_v17, %v1114_v62  ;;  %v2353_v63 = vpop.eup %1719  ;;  %1745 = vpow2.f32 %v1063_v47  ;;  %v1052_v25 = vsub.f32 %v2313_v33, %v2321_v28  ;;  %v1099_v30 = vmul.f32 1.442695, %v1046_v37 }
 0x174   :  { %v2356_v43 = vpop.eup %1721  ;;  %1747 = vpow2.f32 %v1097_v29  ;;  %v1105_v15 = vmul.f32 1.442695, %v1049_v49  ;;  %v1287_v55 = vadd.f32 %v1286_v53, %v2404_v26 }
 0x175   :  { %v1116_v48 = vadd.f32 %v2351_v2, %v1115_v0  ;;  %v2358_v59 = vpop.eup %1723  ;;  %1749 = vpow2.f32 %v1069_v18  ;;  %v1111_v8 = vmul.f32 1.442695, %v1052_v25 }
 0x176   :  { %v2361_v39 = vpop.eup %1725  ;;  %1751 = vpow2.f32 %v1103_v22  ;;  %v1288_v41 = vrot.slane %v1287_v55, 4 }
 0x177   :  { %v1117_v51 = vadd.f32 %v2353_v63, %v1116_v48  ;;  %v2365_v21 = vpop.eup %1727  ;;  %v1122_v57 = vadd.f32 %v2361_v39, %v2358_v59  ;;  %1753 = vpow2.f32 %v1075_v11 }
 0x178   :  { %v2370_v3 = vpop.eup %1729  ;;  %1755 = vpow2.f32 %v1109_v32  ;;  %v1289_v18 = vadd.f32 %v1288_v41, %v1287_v55 }
 0x179   :  { %v1118_v44 = vadd.f32 %v2356_v43, %v1117_v51  ;;  %v2372_v40 = vpop.eup %1731  ;;  %v1123_v12 = vadd.f32 %v2370_v3, %v1122_v57  ;;  %1757 = vpow2.f32 %v1081_v61 }
 0x17a   :  { %v2388_v45 = vpop.eup %1733  ;;  %1759 = vpow2.f32 %v1087_v10  ;;  %v1290_v36 = vrot.slane %v1289_v18, 2 }
 0x17b   :  { %v1119_v27 = vadd.f32 %v2365_v21, %v1118_v44  ;;  %v1736_v19 = vpop.eup %1735  ;;  %v1124_v7 = vadd.f32 %v2388_v45, %v1123_v12  ;;  %1761 = vpow2.f32 %v1093_v23 }
 0x17c   :  { %v2394_v9 = vpop.eup %1737  ;;  %v1291_v53 = vadd.f32 %v1290_v36, %v1289_v18 }
 0x17d   :  { %v1120_v60 = vadd.f32 %v2372_v40, %v1119_v27  ;;  %v1125_v14 = vadd.f32 %v2394_v9, %v1124_v7  ;;  %v2406_v46 = vpop.eup %1739 }
 0x17e   :  { %v2408_v20 = vpop.eup %1741  ;;  %v1292_v25 = vrot.slane %v1291_v53, 1 }
 0x17f   :  { %v1121_v6 = vadd.f32 %v1736_v19, %v1120_v60  ;;  %v1126_v31 = vadd.f32 %v2406_v46, %v1125_v14  ;;  %v2411_v50 = vpop.eup %1743 }
 0x180   :  { %v2414_v33 = vpop.eup %1745 }
 0x181   :  { %1763 = vrcp.f32 %v1121_v6  ;;  %v1127_v28 = vadd.f32 %v2408_v20, %v1126_v31  ;;  %v1748_v13 = vpop.eup %1747  ;;  %v1131_v34 = vadd.f32 %v2414_v33, %v2411_v50 }
 0x182   :  { %1765 = vpow2.f32 %v1099_v30  ;;  %v2419_v42 = vpop.eup %1749 }
 0x183   :  { %v1128_v35 = vadd.f32 %v1748_v13, %v1127_v28  ;;  %1767 = vpow2.f32 %v1105_v15  ;;  %v1752_v58 = vpop.eup %1751  ;;  %v1132_v62 = vadd.f32 %v2419_v42, %v1131_v34 }
 0x184   :  { %v2422_v1 = vpop.eup %1753  ;;  %1769 = vpow2.f32 %v1111_v8 }
 0x185   :  { %v1129_v16 = vadd.f32 %v1752_v58, %v1128_v35  ;;  %v1756_v38 = vpop.eup %1755  ;;  %v1133_v29 = vadd.f32 %v2422_v1, %v1132_v62 }
 0x186   :  { %v2425_v0 = vpop.eup %1757 }
 0x187   :  { %v1130_v24 = vadd.f32 %v1756_v38, %v1129_v16  ;;  %v1134_v47 = vadd.f32 %v2425_v0, %v1133_v29  ;;  %v2428_v48 = vpop.eup %1759 }
 0x188   :  { %v2431_v11 = vpop.eup %1761 }
 0x189   :  { %1771 = vrcp.f32 %v1130_v24  ;;  %v1135_v22 = vadd.f32 %v2428_v48, %v1134_v47 }
 0x18b   :  { %v1136_v32 = vadd.f32 %v2431_v11, %v1135_v22 }
 0x18e   :  { %v1764_v51 = vpop.eup %1763 }
 0x18f   :  { %v1149_v61 = vmul.f32 %v1764_v51, %v2333_v52  ;;  %v1152_v44 = vmul.f32 %v1764_v51, %v2346_v17  ;;  %v1155_v57 = vmul.f32 %v1764_v51, %v2351_v2  ;;  %v1158_v10 = vmul.f32 %v1764_v51, %v2353_v63  ;;  %v2438_v27 = vpop.eup %1765 }
 0x190   :  { %v1161_v12 = vmul.f32 %v1764_v51, %v2356_v43  ;;  %v1164_v37 = vmul.f32 %v1764_v51, %v2365_v21  ;;  %v1167_v23 = vmul.f32 %v1764_v51, %v2372_v40  ;;  %v1170_v60 = vmul.f32 %v1764_v51, %v1736_v19  ;;  %v1768_v49 = vpop.eup %1767 }
 0x191   :  { %v1137_v7 = vadd.f32 %v2438_v27, %v1136_v32  ;;  %v1143_v17 = vmul.f32 %v1764_v51, %v2319_v56  ;;  %v1146_v2 = vmul.f32 %v1764_v51, %v2323_v5  ;;  %v1770_v6 = vpop.eup %1769  ;;  %v1185_v14 = vmul.f32 %v2378_v4, %v1152_v44 }
 0x192   :  { %v1188_v43 = vmul.f32 %v2378_v4, %v1155_v57  ;;  %v1191_v21 = vmul.f32 %v2378_v4, %v1158_v10  ;;  %v1194_v40 = vmul.f32 %v2378_v4, %v1161_v12  ;;  %v1197_v19 = vmul.f32 %v2378_v4, %v1164_v37 }
 0x193   :  { %v1138_v52 = vadd.f32 %v1768_v49, %v1137_v7  ;;  %v1200_v30 = vmul.f32 %v2378_v4, %v1167_v23  ;;  %v1203_v56 = vmul.f32 %v2378_v4, %v1170_v60  ;;  %v1176_v5 = vmul.f32 %v2378_v4, %v1143_v17 }
 0x194   :  { %v1179_v15 = vmul.f32 %v2378_v4, %v1146_v2  ;;  %v1182_v55 = vmul.f32 %v2378_v4, %v1149_v61  ;;  %v1293_v12 = vadd.f32 %v1292_v25, %v1291_v53 }
 0x195   :  { %v1139_v63 = vadd.f32 %v1770_v6, %v1138_v52 }
 0x196   :  { %v1772_v31 = vpop.eup %1771 }
 0x197   :  { %1773 = vrcp.f32 %v1139_v63  ;;  %v1150_v28 = vmul.f32 %v1772_v31, %v2370_v3  ;;  %v1153_v8 = vmul.f32 %v1772_v31, %v2388_v45  ;;  %v1156_v34 = vmul.f32 %v1772_v31, %v2394_v9 }
 0x198   :  { %v1159_v35 = vmul.f32 %v1772_v31, %v2406_v46  ;;  %v1162_v62 = vmul.f32 %v1772_v31, %v2408_v20  ;;  %v1165_v41 = vmul.f32 %v1772_v31, %v1748_v13  ;;  %v1168_v16 = vmul.f32 %v1772_v31, %v1752_v58 }
 0x199   :  { %v1171_v29 = vmul.f32 %v1772_v31, %v1756_v38  ;;  %v1186_v24 = vmul.f32 %v2384_v54, %v1153_v8  ;;  %v1189_v47 = vmul.f32 %v2384_v54, %v1156_v34  ;;  %v1144_v4 = vmul.f32 %v1772_v31, %v2358_v59 }
 0x19a   :  { %v1192_v18 = vmul.f32 %v2384_v54, %v1159_v35  ;;  %v1195_v3 = vmul.f32 %v2384_v54, %v1162_v62  ;;  %v1198_v45 = vmul.f32 %v2384_v54, %v1165_v41  ;;  %v1201_v9 = vmul.f32 %v2384_v54, %v1168_v16 }
 0x19b   :  { %v1204_v46 = vmul.f32 %v2384_v54, %v1171_v29  ;;  %v1238_v20 = vadd.f32 %v1189_v47, %v1188_v43  ;;  %v1147_v58 = vmul.f32 %v1772_v31, %v2361_v39  ;;  %v1177_v38 = vmul.f32 %v2384_v54, %v1144_v4 }
 0x19c   :  { %v1246_v13 = vadd.f32 %v1192_v18, %v1191_v21  ;;  %v1254_v22 = vadd.f32 %v1195_v3, %v1194_v40  ;;  %v1183_v32 = vmul.f32 %v2384_v54, %v1150_v28  ;;  %v1230_v59 = vadd.f32 %v1186_v24, %v1185_v14 }
 0x19d   :  { %v2471_v51 = vadd.f32 %v1204_v46, %v1203_v56  ;;  %v1180_v36 = vmul.f32 %v2384_v54, %v1147_v58  ;;  %v1206_v61 = vadd.f32 %v1177_v38, %v1176_v5  ;;  %v1262_v44 = vadd.f32 %v1198_v45, %v1197_v19 }
 0x19e   :  { %v2475_v57 = vadd.f32 %v1201_v9, %v1200_v30  ;;  %v1222_v10 = vadd.f32 %v1183_v32, %v1182_v55  ;;  %1775 = vrcp.f32 %v1293_v12 }
 0x19f   :  { %v1214_v37 = vadd.f32 %v1180_v36, %v1179_v15 }
 0x1a4   :  { %v1774_v23 = vpop.eup %1773 }
 0x1a5   :  { %v1145_v39 = vmul.f32 %v1774_v23, %v2411_v50  ;;  %v1148_v60 = vmul.f32 %v1774_v23, %v2414_v33  ;;  %v1151_v7 = vmul.f32 %v1774_v23, %v2419_v42  ;;  %v1154_v52 = vmul.f32 %v1774_v23, %v2422_v1 }
 0x1a6   :  { %v1157_v17 = vmul.f32 %v1774_v23, %v2425_v0  ;;  %v1160_v54 = vmul.f32 %v1774_v23, %v2428_v48  ;;  %v1163_v2 = vmul.f32 %v1774_v23, %v2431_v11  ;;  %v1166_v63 = vmul.f32 %v1774_v23, %v2438_v27 }
 0x1a7   :  { %v1169_v53 = vmul.f32 %v1774_v23, %v1768_v49  ;;  %v1172_v14 = vmul.f32 %v1774_v23, %v1770_v6  ;;  %v1178_v43 = vmul.f32 %v2404_v26, %v1145_v39  ;;  %v1181_v50 = vmul.f32 %v2404_v26, %v1148_v60 }
 0x1a8   :  { %v1184_v33 = vmul.f32 %v2404_v26, %v1151_v7  ;;  %v1187_v42 = vmul.f32 %v2404_v26, %v1154_v52  ;;  %v1190_v1 = vmul.f32 %v2404_v26, %v1157_v17  ;;  %v1193_v0 = vmul.f32 %v2404_v26, %v1160_v54 }
 0x1a9   :  { %v1196_v48 = vmul.f32 %v2404_v26, %v1163_v2  ;;  %v1199_v11 = vmul.f32 %v2404_v26, %v1166_v63  ;;  %v1202_v27 = vmul.f32 %v2404_v26, %v1169_v53  ;;  %v1205_v49 = vmul.f32 %v2404_v26, %v1172_v14 }
 0x1aa   :  { %v1207_v6 = vadd.f32 %v1206_v61, %v1178_v43  ;;  %v1215_v21 = vadd.f32 %v1214_v37, %v1181_v50  ;;  %v1223_v25 = vadd.f32 %v1222_v10, %v1184_v33  ;;  %v1231_v40 = vadd.f32 %v1230_v59, %v1187_v42 }
 0x1ab   :  { %v1239_v19 = vadd.f32 %v1238_v20, %v1190_v1  ;;  %v1247_v30 = vadd.f32 %v1246_v13, %v1193_v0  ;;  %v1255_v31 = vadd.f32 %v1254_v22, %v1196_v48  ;;  %v1263_v56 = vadd.f32 %v1262_v44, %v1199_v11  ;;  %v2495_v20 = vpop.eup %1775 }
 0x1ac   :  { %v1208_v5 = vrot.slane %v1207_v6, 4  ;;  %v1216_v15 = vrot.slane %v1215_v21, 4  ;;  %v1224_v55 = vrot.slane %v1223_v25, 4  ;;  %v1232_v28 = vrot.slane %v1231_v40, 4 }
 0x1ad   :  { %v1240_v8 = vrot.slane %v1239_v19, 4  ;;  %v1248_v34 = vrot.slane %v1247_v30, 4  ;;  %v1256_v35 = vrot.slane %v1255_v31, 4  ;;  %v1264_v62 = vrot.slane %v1263_v56, 4 }
 0x1ae   :  { %v1209_v41 = vadd.f32 %v1208_v5, %v1207_v6  ;;  %v1217_v16 = vadd.f32 %v1216_v15, %v1215_v21  ;;  %v1225_v29 = vadd.f32 %v1224_v55, %v1223_v25  ;;  %v1233_v26 = vadd.f32 %v1232_v28, %v1231_v40 }
 0x1af   :  { %v1241_v24 = vadd.f32 %v1240_v8, %v1239_v19  ;;  %v1249_v47 = vadd.f32 %v1248_v34, %v1247_v30  ;;  %v1257_v18 = vadd.f32 %v1256_v35, %v1255_v31  ;;  %v1265_v4 = vadd.f32 %v1264_v62, %v1263_v56 }
 0x1b0   :  { %v1210_v3 = vrot.slane %v1209_v41, 2  ;;  %v1218_v45 = vrot.slane %v1217_v16, 2  ;;  %v1226_v9 = vrot.slane %v1225_v29, 2  ;;  %v1234_v46 = vrot.slane %v1233_v26, 2 }
 0x1b1   :  { %v1242_v13 = vrot.slane %v1241_v24, 2  ;;  %v1250_v58 = vrot.slane %v1249_v47, 2  ;;  %v1258_v38 = vrot.slane %v1257_v18, 2  ;;  %v1266_v22 = vrot.slane %v1265_v4, 2 }
 0x1b2   :  { %v1211_v32 = vadd.f32 %v1210_v3, %v1209_v41  ;;  %v1219_v59 = vadd.f32 %v1218_v45, %v1217_v16  ;;  %v1227_v36 = vadd.f32 %v1226_v9, %v1225_v29  ;;  %v1235_v61 = vadd.f32 %v1234_v46, %v1233_v26 }
 0x1b3   :  { %v1243_v44 = vadd.f32 %v1242_v13, %v1241_v24  ;;  %v1251_v10 = vadd.f32 %v1250_v58, %v1249_v47  ;;  %v1259_v12 = vadd.f32 %v1258_v38, %v1257_v18  ;;  %v1267_v37 = vadd.f32 %v1266_v22, %v1265_v4 }
 0x1b4   :  { %v1212_v23 = vrot.slane %v1211_v32, 1  ;;  %v1220_v39 = vrot.slane %v1219_v59, 1  ;;  %v1228_v60 = vrot.slane %v1227_v36, 1  ;;  %v1236_v7 = vrot.slane %v1235_v61, 1 }
 0x1b5   :  { %v1244_v52 = vrot.slane %v1243_v44, 1  ;;  %v1252_v17 = vrot.slane %v1251_v10, 1  ;;  %v1260_v54 = vrot.slane %v1259_v12, 1  ;;  %v1268_v2 = vrot.slane %v1267_v37, 1 }
 0x1b6   :  { %v1221_v63 = vadd.f32 %v1220_v39, %v1219_v59  ;;  %v1229_v53 = vadd.f32 %v1228_v60, %v1227_v36  ;;  %v1237_v14 = vadd.f32 %v1236_v7, %v1235_v61  ;;  %v1213_v43 = vadd.f32 %v1212_v23, %v1211_v32 }
 0x1b7   :  { %v1245_v50 = vadd.f32 %v1244_v52, %v1243_v44  ;;  %v1253_v33 = vadd.f32 %v1252_v17, %v1251_v10  ;;  %v1261_v42 = vadd.f32 %v1260_v54, %v1259_v12  ;;  %v1271_v1 = vadd.f32 %v2475_v57, %v1202_v27 }
 0x1b8   :  { %v1279_v0 = vadd.f32 %v2471_v51, %v1205_v49  ;;  %v1296_v48 = vmul.f32 %v2495_v20, %v1221_v63  ;;  %v1269_v11 = vadd.f32 %v1268_v2, %v1267_v37  ;;  %v1297_v6 = vmul.f32 %v2495_v20, %v1229_v53 }
 0x1b9   :  { %v1298_v21 = vmul.f32 %v2495_v20, %v1237_v14  ;;  %v1272_v25 = vrot.slane %v1271_v1, 4  ;;  %v1299_v19 = vmul.f32 %v2495_v20, %v1245_v50  ;;  %v1295_v30 = vmul.f32 %v2495_v20, %v1213_v43 }
 0x1ba   :  { %v1280_v40 = vrot.slane %v1279_v0, 4  ;;  %v1300_v31 = vmul.f32 %v2495_v20, %v1253_v33  ;;  %v1315_v57 = vrot.slane %v1296_v48, 7  ;;  %v1318_v27 = vrot.slane %v1297_v6, 6 }
 0x1bb   :  { %v1273_v51 = vadd.f32 %v1272_v25, %v1271_v1  ;;  %v1301_v56 = vmul.f32 %v2495_v20, %v1261_v42  ;;  %v1302_v5 = vmul.f32 %v2495_v20, %v1269_v11  ;;  %v1321_v55 = vrot.slane %v1298_v21, 5 }
 0x1bc   :  { %v1281_v49 = vadd.f32 %v1280_v40, %v1279_v0  ;;  %v1317_v15 = vsel %vm1316_vm1, %v1315_v57, %v1295_v30  ;;  %v1324_v35 = vrot.slane %v1299_v19, 4  ;;  %v1327_v41 = vrot.slane %v1300_v31, 3 }
 0x1bd   :  { %v1274_v28 = vrot.slane %v1273_v51, 2  ;;  %v1320_v34 = vsel %vm1319_vm2, %v1318_v27, %v1317_v15  ;;  %v1330_v24 = vrot.slane %v1301_v56, 2  ;;  %v1333_v18 = vrot.slane %v1302_v5, 1 }
 0x1be   :  { %v1282_v8 = vrot.slane %v1281_v49, 2  ;;  %v1323_v62 = vsel %vm1322_vm3, %v1321_v55, %v1320_v34 }
 0x1bf   :  { %v1275_v16 = vadd.f32 %v1274_v28, %v1273_v51  ;;  %v1326_v26 = vsel %vm1325_vm4, %v1324_v35, %v1323_v62 }
 0x1c0   :  { %v1283_v29 = vadd.f32 %v1282_v8, %v1281_v49  ;;  %v1329_v47 = vsel %vm1328_vm5, %v1327_v41, %v1326_v26 }
 0x1c1   :  { %v1276_v4 = vrot.slane %v1275_v16, 1  ;;  %v1332_v45 = vsel %vm1331_vm6, %v1330_v24, %v1329_v47 }
 0x1c2   :  { %v1284_v3 = vrot.slane %v1283_v29, 1  ;;  %v1335_v9 = vsel %vm1334_vm7, %v1333_v18, %v1332_v45 }
 0x1c3   :  { %v1277_v46 = vadd.f32 %v1276_v4, %v1275_v16  ;;  %1340 = vst [vmem:[%s2523_s4] sm:$0xff] %v1335_v9 }
 0x1c4   :  { %v1285_v13 = vadd.f32 %v1284_v3, %v1283_v29 }
 0x1c5   :  { %v1303_v38 = vmul.f32 %v2495_v20, %v1277_v46 }
 0x1c6   :  { %v1304_v58 = vmul.f32 %v2495_v20, %v1285_v13 }
 0x1c8   :  { %v1336_v22 = vrot.slane %v1304_v58, 7 }
 0x1ca   :  { %v1337_v32 = vsel %vm1316_vm1, %v1336_v22, %v1303_v38 }
 0x1cb   :  { %1341 = vst [vmem:[%s2523_s4 + $0x8] sm:$0x3] %v1337_v32 }

</bundles_post_ra>
